<compile_context>
chip_gen: v5e
topology: v5e:2x2
jax: 0.10.0
libtpu: 0.0.40
codegen_flags: <defaults>
</compile_context>

<pallas_src>
import functools

import numpy as np

import jax
import jax.numpy as jnp
from jax.experimental import pallas as pl
from jax.experimental.pallas import tpu as pltpu

_H0 = 8  # sublane-aligned start row of the interior inside the staging buffer


def _resblock_kernel(x_ref, t1_ref, b1_ref, t2_ref, b2_ref, o_ref,
                     p_ref, q_ref, acc_ref, *, D, NB, H, WC, act_type,
                     neg_slope):
    """conv1 -> act -> conv2 -> 0.1*out + x for NB batch elements per step.

    Layouts (lane axis = packed W*C = WC):
      x_ref/o_ref : (D, NB, H, WC)        f32
      t*_ref      : (3, 3*WC, WC)         bf16  (kd-indexed stacked Toeplitz)
      b*_ref      : (1, WC)               f32
      p_ref       : (D, NB, H + 9, WC)    f32   staging, interior at row _H0
      q_ref       : (D*NB*H, 3*WC)        bf16  kh-expanded matmul LHS
      acc_ref     : (D*NB*H, WC)          f32   conv accumulator
    """
    S = NB * H        # rows per depth plane in the flattened (d, n, h) order
    M = D * S         # output rows per conv

    # H-edge masks for 'same' padding (computed once, reused by both convs).
    h_idx = jax.lax.broadcasted_iota(jnp.int32, (D, NB, H, WC), 2)
    is_h_first = h_idx == 0
    is_h_last = h_idx == H - 1

    def stage(v4):
        """Write the kh-expanded LHS of a 3x3x3 'same' conv into q_ref.

        q[(d*NB + n)*H + h, kh*WC:(kh+1)*WC] = v_pad[d, n, h + kh - 1, :].
        H edges are zeroed here via selects; D edges are handled in conv();
        W edges are baked into the Toeplitz weights.  All q stores are aligned
        and lane-dense (full 128-lane unmasked stores).
        """
        dt = q_ref.dtype
        q_ref[:, WC:2 * WC] = v4.astype(dt).reshape(M, WC)          # kh = 1
        # Shift along H by +-1 through the f32 staging buffer: one aligned
        # interior store, then two sublane-offset reads (rows _H0-1 / _H0+1).
        # The two rows read outside the interior are masked to zero, so they
        # never have to be stored -> no halo maintenance, no cross-step state.
        p_ref[:, :, _H0:_H0 + H, :] = v4.astype(p_ref.dtype)
        left = jnp.where(is_h_first, 0.0, p_ref[:, :, _H0 - 1:_H0 - 1 + H, :])
        q_ref[:, 0:WC] = left.reshape(M, WC).astype(dt)             # kh = 0
        right = jnp.where(is_h_last, 0.0, p_ref[:, :, _H0 + 1:_H0 + 1 + H, :])
        q_ref[:, 2 * WC:3 * WC] = right.reshape(M, WC).astype(dt)   # kh = 2

    def conv(t_ref, b_ref):
        """acc = 3x3x3 'same' conv of the staged input + bias.

        kd is handled as aligned row offsets into q/acc (the out-of-range
        plane of the kd=0 / kd=2 taps is simply excluded from the matmul), so
        each conv is 3 MXU matmuls with K = 3*WC and M in {M, M-S}.
        """
        acc_ref[...] = (
            jnp.dot(q_ref[...], t_ref[1], preferred_element_type=jnp.float32)
            + b_ref[...])
        if D > 1:
            acc_ref[S:M, :] += jnp.dot(q_ref[0:M - S, :], t_ref[0],
                                       preferred_element_type=jnp.float32)
            acc_ref[0:M - S, :] += jnp.dot(q_ref[S:M, :], t_ref[2],
                                           preferred_element_type=jnp.float32)

    stage(x_ref[...].astype(jnp.float32))
    conv(t1_ref, b1_ref)

    h = acc_ref[...]
    if act_type == "LeakyReLu":
        h = jnp.where(h >= 0, h, neg_slope * h)
    else:
        h = jnp.maximum(h, 0.0)

    stage(h.reshape(D, NB, H, WC))
    conv(t2_ref, b2_ref)

    out = (0.1 * acc_ref[...].reshape(D, NB, H, WC)
           + x_ref[...].astype(jnp.float32))
    o_ref[...] = out.astype(o_ref.dtype)


def pack_conv3x3x3_params(w, b, width):
    """Host-side (numpy) packing of a PyTorch-layout Conv3d(C, C, 3) weight/bias.

    w: (Cout, Cin, 3, 3, 3)  -- torch nn.Conv3d .weight layout;  b: (Cout,).
    Returns:
      T: (3, 3*width*Cin, width*Cout) bf16 -- for each kd, the (kh, kw, Cin)
         contraction folded into one block-Toeplitz matrix over the packed
         (w*Cin) lane axis; 'same' zero padding along W is baked in by dropping
         out-of-range bands.  (FLOP/memory blow-up ~W/3 / W^2*C^2: fine for
         small W; tile W for large W -- see NOTE at top.)
      bias_tiled: (1, width*Cout) f32 -- bias replicated across W.
    """
    w = np.asarray(w, np.float32)
    b = np.asarray(b, np.float32)
    c_out, c_in = w.shape[0], w.shape[1]
    T = np.zeros((3, 3, width * c_in, width * c_out), np.float32)
    for kh in range(3):
        for kw in range(3):
            blk = np.transpose(w[:, :, :, kh, kw], (2, 1, 0))  # (kd, Cin, Cout)
            for wo in range(width):
                wi = wo + kw - 1
                if 0 <= wi < width:
                    T[:, kh, wi * c_in:(wi + 1) * c_in,
                      wo * c_out:(wo + 1) * c_out] = blk
    T = T.reshape(3, 3 * width * c_in, width * c_out)
    bias = np.tile(b, width).reshape(1, width * c_out)
    return jnp.asarray(T, jnp.bfloat16), jnp.asarray(bias, jnp.float32)


@functools.partial(jax.jit, static_argnames=("act_type",))
def residual_block_3d_packed(x, t1, b1, t2, b2, act_type="LeakyReLu"):
    """ResidualBlock3D forward on the packed lane-dense layout (D, N, H, W*C)."""
    D, N, H, WC = x.shape
    assert WC % 128 == 0, "packed W*C must be a multiple of 128 (lane width)"
    assert H % 8 == 0, "H must be a multiple of 8 (sublane width)"
    assert t1.shape == (3, 3 * WC, WC) and t2.shape == (3, 3 * WC, WC)
    assert b1.shape == (1, WC) and b2.shape == (1, WC)

    nb = 2 if N % 2 == 0 else 1  # 2 batch elems/step -> M = 2*D*H MXU rows
    m_rows = D * nb * H

    kernel = functools.partial(_resblock_kernel, D=D, NB=nb, H=H, WC=WC,
                               act_type=act_type, neg_slope=0.2)

    weight_spec = pl.BlockSpec((3, 3 * WC, WC), lambda i: (0, 0, 0))
    bias_spec = pl.BlockSpec((1, WC), lambda i: (0, 0))
    # TODO(synk): for VMEM-tight configurations mark weight/bias specs with
    # pipeline_mode=pl.Buffered(1) (constant index_map => double-buffering is
    # wasted VMEM); not needed at this footprint (~2.3 MiB total).

    return pl.pallas_call(
        kernel,
        out_shape=jax.ShapeDtypeStruct((D, N, H, WC), x.dtype),
        grid=(N // nb,),
        in_specs=[
            pl.BlockSpec((D, nb, H, WC), lambda i: (0, i, 0, 0)),   # x
            weight_spec,                                            # Toeplitz W1
            bias_spec,                                              # bias1
            weight_spec,                                            # Toeplitz W2
            bias_spec,                                              # bias2
        ],
        out_specs=pl.BlockSpec((D, nb, H, WC), lambda i: (0, i, 0, 0)),
        scratch_shapes=[
            pltpu.VMEM((D, nb, H + 9, WC), jnp.float32),   # staging (aligned interior)
            pltpu.VMEM((m_rows, 3 * WC), jnp.bfloat16),    # kh-expanded LHS
            pltpu.VMEM((m_rows, WC), jnp.float32),         # f32 accumulator
        ],
        compiler_params=pltpu.CompilerParams(
            dimension_semantics=("parallel",)),
    )(x, t1, b1, t2, b2)


@functools.partial(jax.jit, static_argnames=("act_type",))
def residual_block_3d_ncdhw(x_ncdhw, t1, b1, t2, b2, act_type="LeakyReLu"):
    """NCDHW adapter (interface parity with the PyTorch module only).

    These transposes are outside the kernel's cost: in a real EDSR stack the
    packed (D, N, H, W*C) layout should be kept across the whole chain of
    residual blocks and converted once at the ends.
    """
    N, C, D, H, W = x_ncdhw.shape
    x = jnp.transpose(x_ncdhw, (2, 0, 3, 4, 1)).reshape(D, N, H, W * C)
    y = residual_block_3d_packed(x, t1, b1, t2, b2, act_type=act_type)
    y = y.reshape(D, N, H, W, C)
    return jnp.transpose(y, (1, 4, 0, 2, 3))  # -> NCDHW


def _reference_block(x_ncdhw, w1, b1, w2, b2, act_type="LeakyReLu"):
    """Pure-JAX reference using lax.conv_general_dilated (for verification)."""
    x = jnp.transpose(x_ncdhw, (0, 2, 3, 4, 1))  # NDHWC

    def conv(v, w, b):
        k = jnp.transpose(w, (2, 3, 4, 1, 0))    # (Cout,Cin,kd,kh,kw)->DHWIO
        y = jax.lax.conv_general_dilated(
            v, k, window_strides=(1, 1, 1), padding="SAME",
            dimension_numbers=("NDHWC", "DHWIO", "NDHWC"))
        return y + b.reshape(1, 1, 1, 1, -1)

    y = conv(x, w1, b1)
    y = (jnp.where(y >= 0, y, 0.2 * y) if act_type == "LeakyReLu"
         else jnp.maximum(y, 0.0))
    y = conv(y, w2, b2)
    out = 0.1 * y + x
    return jnp.transpose(out, (0, 4, 1, 2, 3))


def _init_conv_params(key, c_in, c_out):
    """Deterministic PyTorch-like uniform init, torch Conv3d weight layout."""
    k_w, k_b = jax.random.split(key)
    fan_in = c_in * 27
    bound = 1.0 / float(np.sqrt(fan_in))
    w = jax.random.uniform(k_w, (c_out, c_in, 3, 3, 3), jnp.float32,
                           -bound, bound)
    b = jax.random.uniform(k_b, (c_out,), jnp.float32, -bound, bound)
    return w, b


if __name__ == "__main__":
    # Small shapes consistent with the module (NCDHW, filter_size channels).
    # W*C = 128 -> lane-dense; H = 16 -> sublane aligned; N = 2 -> M = 256.
    N, C, D, H, W = 2, 8, 8, 16, 16
    act_type = "LeakyReLu"

    key = jax.random.PRNGKey(0)
    k_x, k_c1, k_c2 = jax.random.split(key, 3)
    x = jax.random.normal(k_x, (N, C, D, H, W), jnp.float32)
    w1, b1 = _init_conv_params(k_c1, C, C)
    w2, b2 = _init_conv_params(k_c2, C, C)

    # Pack conv weights once, outside the jitted path (host-side numpy).
    t1, b1t = pack_conv3x3x3_params(w1, b1, W)
    t2, b2t = pack_conv3x3x3_params(w2, b2, W)

    out = jax.block_until_ready(
        residual_block_3d_ncdhw(x, t1, b1t, t2, b2t, act_type=act_type))
    assert out.shape == (N, C, D, H, W)

    # Mirror the module's `assert not torch.equal(out, x)` (host-side check).
    assert not bool(jnp.all(out == x)), "output unexpectedly equals input"

    ref = jax.block_until_ready(_reference_block(x, w1, b1, w2, b2, act_type))
    max_err = float(jnp.max(jnp.abs(out - ref)))
    # bf16 MXU operands with f32 accumulation; conv path is scaled by 0.1, so
    # the end-to-end error stays well below this tolerance.
    assert bool(jnp.allclose(out, ref, rtol=3e-3, atol=3e-3)), \
        f"mismatch vs reference (max abs err {max_err:.2e})"

    print("KERNEL_OK")
</pallas_src>

<mosaic_0001>
module attributes {stable_mosaic.version = 11 : i64} {
  func.func @_resblock_kernel(%arg0: i32, %arg1: memref<8x2x16x128xf32, #tpu.memory_space<vmem>>, %arg2: memref<3x384x128xbf16, #tpu.memory_space<vmem>>, %arg3: memref<1x128xf32, #tpu.memory_space<vmem>>, %arg4: memref<3x384x128xbf16, #tpu.memory_space<vmem>>, %arg5: memref<1x128xf32, #tpu.memory_space<vmem>>, %arg6: memref<8x2x16x128xf32, #tpu.memory_space<vmem>>, %arg7: memref<8x2x25x128xf32, #tpu.memory_space<vmem>>, %arg8: memref<256x384xbf16, #tpu.memory_space<vmem>>, %arg9: memref<256x128xf32, #tpu.memory_space<vmem>>) attributes {dimension_semantics = [#tpu.dimension_semantics<parallel>], iteration_bounds = array<i64: 1>, scalar_prefetch = 0 : i64, scratch_operands = 3 : i64, tpu.core_type = #tpu.core_type<tc>, window_params = [{transform_indices = @transform_0, window_bounds = array<i64: 8, 2, 16, 128>}, {pipeline_mode = #tpu.pipeline_mode<synchronous>, transform_indices = @transform_1, window_bounds = array<i64: 3, 384, 128>}, {pipeline_mode = #tpu.pipeline_mode<synchronous>, transform_indices = @transform_2, window_bounds = array<i64: 1, 128>}, {pipeline_mode = #tpu.pipeline_mode<synchronous>, transform_indices = @transform_3, window_bounds = array<i64: 3, 384, 128>}, {pipeline_mode = #tpu.pipeline_mode<synchronous>, transform_indices = @transform_4, window_bounds = array<i64: 1, 128>}, {transform_indices = @transform_5, window_bounds = array<i64: 8, 2, 16, 128>}]} {
    %0 = tpu.iota {dimensions = array<i32: 2>} : vector<8x2x16x128xi32>
    %c0_i32 = arith.constant 0 : i32
    %1 = vector.broadcast %c0_i32 : i32 to vector<8x2x16x128xi32>
    %2 = arith.cmpi eq, %0, %1 : vector<8x2x16x128xi32>
    %c15_i32 = arith.constant 15 : i32
    %3 = vector.broadcast %c15_i32 : i32 to vector<8x2x16x128xi32>
    %4 = arith.cmpi eq, %0, %3 : vector<8x2x16x128xi32>
    %c0 = arith.constant 0 : index
    %c0_0 = arith.constant 0 : index
    %c0_1 = arith.constant 0 : index
    %c0_2 = arith.constant 0 : index
    %5 = vector.load %arg1[%c0, %c0_0, %c0_1, %c0_2] : memref<8x2x16x128xf32, #tpu.memory_space<vmem>>, vector<8x2x16x128xf32>
    %6 = arith.truncf %5 : vector<8x2x16x128xf32> to vector<8x2x16x128xbf16>
    %7 = vector.shape_cast %6 : vector<8x2x16x128xbf16> to vector<256x128xbf16>
    %c0_3 = arith.constant 0 : index
    %c128 = arith.constant 128 : index
    %8 = vector.load %arg8[%c0_3, %c128] : memref<256x384xbf16, #tpu.memory_space<vmem>>, vector<256x128xbf16>
    tpu.vector_store %arg8[%c0_3, %c128], %7 {strides = array<i32>} : memref<256x384xbf16, #tpu.memory_space<vmem>>, vector<256x128xbf16>,
    %c0_4 = arith.constant 0 : index
    %c0_5 = arith.constant 0 : index
    %c8 = arith.constant 8 : index
    %c0_6 = arith.constant 0 : index
    %9 = vector.load %arg7[%c0_4, %c0_5, %c8, %c0_6] : memref<8x2x25x128xf32, #tpu.memory_space<vmem>>, vector<8x2x16x128xf32>
    tpu.vector_store %arg7[%c0_4, %c0_5, %c8, %c0_6], %5 {strides = array<i32>} : memref<8x2x25x128xf32, #tpu.memory_space<vmem>>, vector<8x2x16x128xf32>,
    %c0_7 = arith.constant 0 : index
    %c0_8 = arith.constant 0 : index
    %c7 = arith.constant 7 : index
    %c0_9 = arith.constant 0 : index
    %10 = vector.load %arg7[%c0_7, %c0_8, %c7, %c0_9] : memref<8x2x25x128xf32, #tpu.memory_space<vmem>>, vector<8x2x16x128xf32>
    %cst = arith.constant 0.000000e+00 : f32
    %11 = vector.broadcast %cst : f32 to vector<8x2x16x128xf32>
    %12 = arith.select %2, %11, %10 : vector<8x2x16x128xi1>, vector<8x2x16x128xf32>
    %13 = vector.shape_cast %12 : vector<8x2x16x128xf32> to vector<256x128xf32>
    %14 = arith.truncf %13 : vector<256x128xf32> to vector<256x128xbf16>
    %c0_10 = arith.constant 0 : index
    %c0_11 = arith.constant 0 : index
    %15 = vector.load %arg8[%c0_10, %c0_11] : memref<256x384xbf16, #tpu.memory_space<vmem>>, vector<256x128xbf16>
    tpu.vector_store %arg8[%c0_10, %c0_11], %14 {strides = array<i32>} : memref<256x384xbf16, #tpu.memory_space<vmem>>, vector<256x128xbf16>,
    %c0_12 = arith.constant 0 : index
    %c0_13 = arith.constant 0 : index
    %c9 = arith.constant 9 : index
    %c0_14 = arith.constant 0 : index
    %16 = vector.load %arg7[%c0_12, %c0_13, %c9, %c0_14] : memref<8x2x25x128xf32, #tpu.memory_space<vmem>>, vector<8x2x16x128xf32>
    %cst_15 = arith.constant 0.000000e+00 : f32
    %17 = vector.broadcast %cst_15 : f32 to vector<8x2x16x128xf32>
    %18 = arith.select %4, %17, %16 : vector<8x2x16x128xi1>, vector<8x2x16x128xf32>
    %19 = vector.shape_cast %18 : vector<8x2x16x128xf32> to vector<256x128xf32>
    %20 = arith.truncf %19 : vector<256x128xf32> to vector<256x128xbf16>
    %c0_16 = arith.constant 0 : index
    %c256 = arith.constant 256 : index
    %21 = vector.load %arg8[%c0_16, %c256] : memref<256x384xbf16, #tpu.memory_space<vmem>>, vector<256x128xbf16>
    tpu.vector_store %arg8[%c0_16, %c256], %20 {strides = array<i32>} : memref<256x384xbf16, #tpu.memory_space<vmem>>, vector<256x128xbf16>,
    %c0_17 = arith.constant 0 : index
    %c0_18 = arith.constant 0 : index
    %22 = vector.load %arg8[%c0_17, %c0_18] : memref<256x384xbf16, #tpu.memory_space<vmem>>, vector<256x384xbf16>
    %c1 = arith.constant 1 : index
    %c0_19 = arith.constant 0 : index
    %c0_20 = arith.constant 0 : index
    %23 = vector.load %arg2[%c1, %c0_19, %c0_20] : memref<3x384x128xbf16, #tpu.memory_space<vmem>>, vector<1x384x128xbf16>
    %24 = vector.shape_cast %23 : vector<1x384x128xbf16> to vector<384x128xbf16>
    %cst_21 = arith.constant dense<0.000000e+00> : vector<256x128xf32>
    %25 = tpu.matmul %22, %24, %cst_21 {dimension_numbers = #tpu.dot_dimension_numbers<[1], [0], [0], [1], [0, 0, 1, 1], [], []>} : vector<256x384xbf16>, vector<384x128xbf16>, vector<256x128xf32> -> vector<256x128xf32>
    %c0_22 = arith.constant 0 : index
    %c0_23 = arith.constant 0 : index
    %26 = vector.load %arg3[%c0_22, %c0_23] : memref<1x128xf32, #tpu.memory_space<vmem>>, vector<1x128xf32>
    %27 = vector.broadcast %26 : vector<1x128xf32> to vector<256x128xf32>
    %28 = arith.addf %25, %27 : vector<256x128xf32>
    %c0_24 = arith.constant 0 : index
    %c0_25 = arith.constant 0 : index
    %29 = vector.load %arg9[%c0_24, %c0_25] : memref<256x128xf32, #tpu.memory_space<vmem>>, vector<256x128xf32>
    tpu.vector_store %arg9[%c0_24, %c0_25], %28 {strides = array<i32>} : memref<256x128xf32, #tpu.memory_space<vmem>>, vector<256x128xf32>,
    %c32 = arith.constant 32 : index
    %c0_26 = arith.constant 0 : index
    %30 = vector.load %arg9[%c32, %c0_26] : memref<256x128xf32, #tpu.memory_space<vmem>>, vector<224x128xf32>
    %c0_27 = arith.constant 0 : index
    %c0_28 = arith.constant 0 : index
    %31 = vector.load %arg8[%c0_27, %c0_28] : memref<256x384xbf16, #tpu.memory_space<vmem>>, vector<224x384xbf16>
    %c0_29 = arith.constant 0 : index
    %c0_30 = arith.constant 0 : index
    %c0_31 = arith.constant 0 : index
    %32 = vector.load %arg2[%c0_29, %c0_30, %c0_31] : memref<3x384x128xbf16, #tpu.memory_space<vmem>>, vector<1x384x128xbf16>
    %33 = vector.shape_cast %32 : vector<1x384x128xbf16> to vector<384x128xbf16>
    %cst_32 = arith.constant dense<0.000000e+00> : vector<224x128xf32>
    %34 = tpu.matmul %31, %33, %cst_32 {dimension_numbers = #tpu.dot_dimension_numbers<[1], [0], [0], [1], [0, 0, 1, 1], [], []>} : vector<224x384xbf16>, vector<384x128xbf16>, vector<224x128xf32> -> vector<224x128xf32>
    %35 = arith.addf %30, %34 : vector<224x128xf32>
    %c32_33 = arith.constant 32 : index
    %c0_34 = arith.constant 0 : index
    %36 = vector.load %arg9[%c32_33, %c0_34] : memref<256x128xf32, #tpu.memory_space<vmem>>, vector<224x128xf32>
    tpu.vector_store %arg9[%c32_33, %c0_34], %35 {strides = array<i32>} : memref<256x128xf32, #tpu.memory_space<vmem>>, vector<224x128xf32>,
    %c0_35 = arith.constant 0 : index
    %c0_36 = arith.constant 0 : index
    %37 = vector.load %arg9[%c0_35, %c0_36] : memref<256x128xf32, #tpu.memory_space<vmem>>, vector<224x128xf32>
    %c32_37 = arith.constant 32 : index
    %c0_38 = arith.constant 0 : index
    %38 = vector.load %arg8[%c32_37, %c0_38] : memref<256x384xbf16, #tpu.memory_space<vmem>>, vector<224x384xbf16>
    %c2 = arith.constant 2 : index
    %c0_39 = arith.constant 0 : index
    %c0_40 = arith.constant 0 : index
    %39 = vector.load %arg2[%c2, %c0_39, %c0_40] : memref<3x384x128xbf16, #tpu.memory_space<vmem>>, vector<1x384x128xbf16>
    %40 = vector.shape_cast %39 : vector<1x384x128xbf16> to vector<384x128xbf16>
    %cst_41 = arith.constant dense<0.000000e+00> : vector<224x128xf32>
    %41 = tpu.matmul %38, %40, %cst_41 {dimension_numbers = #tpu.dot_dimension_numbers<[1], [0], [0], [1], [0, 0, 1, 1], [], []>} : vector<224x384xbf16>, vector<384x128xbf16>, vector<224x128xf32> -> vector<224x128xf32>
    %42 = arith.addf %37, %41 : vector<224x128xf32>
    %c0_42 = arith.constant 0 : index
    %c0_43 = arith.constant 0 : index
    %43 = vector.load %arg9[%c0_42, %c0_43] : memref<256x128xf32, #tpu.memory_space<vmem>>, vector<224x128xf32>
    tpu.vector_store %arg9[%c0_42, %c0_43], %42 {strides = array<i32>} : memref<256x128xf32, #tpu.memory_space<vmem>>, vector<224x128xf32>,
    %c0_44 = arith.constant 0 : index
    %c0_45 = arith.constant 0 : index
    %44 = vector.load %arg9[%c0_44, %c0_45] : memref<256x128xf32, #tpu.memory_space<vmem>>, vector<256x128xf32>
    %cst_46 = arith.constant 0.000000e+00 : f32
    %45 = vector.broadcast %cst_46 : f32 to vector<256x128xf32>
    %46 = arith.cmpf oge, %44, %45 : vector<256x128xf32>
    %cst_47 = arith.constant 2.000000e-01 : f32
    %47 = vector.broadcast %cst_47 : f32 to vector<256x128xf32>
    %48 = arith.mulf %47, %44 : vector<256x128xf32>
    %49 = arith.select %46, %44, %48 : vector<256x128xi1>, vector<256x128xf32>
    %50 = vector.shape_cast %49 : vector<256x128xf32> to vector<8x2x16x128xf32>
    %51 = arith.truncf %50 : vector<8x2x16x128xf32> to vector<8x2x16x128xbf16>
    %52 = vector.shape_cast %51 : vector<8x2x16x128xbf16> to vector<256x128xbf16>
    %c0_48 = arith.constant 0 : index
    %c128_49 = arith.constant 128 : index
    %53 = vector.load %arg8[%c0_48, %c128_49] : memref<256x384xbf16, #tpu.memory_space<vmem>>, vector<256x128xbf16>
    tpu.vector_store %arg8[%c0_48, %c128_49], %52 {strides = array<i32>} : memref<256x384xbf16, #tpu.memory_space<vmem>>, vector<256x128xbf16>,
    %c0_50 = arith.constant 0 : index
    %c0_51 = arith.constant 0 : index
    %c8_52 = arith.constant 8 : index
    %c0_53 = arith.constant 0 : index
    %54 = vector.load %arg7[%c0_50, %c0_51, %c8_52, %c0_53] : memref<8x2x25x128xf32, #tpu.memory_space<vmem>>, vector<8x2x16x128xf32>
    tpu.vector_store %arg7[%c0_50, %c0_51, %c8_52, %c0_53], %50 {strides = array<i32>} : memref<8x2x25x128xf32, #tpu.memory_space<vmem>>, vector<8x2x16x128xf32>,
    %c0_54 = arith.constant 0 : index
    %c0_55 = arith.constant 0 : index
    %c7_56 = arith.constant 7 : index
    %c0_57 = arith.constant 0 : index
    %55 = vector.load %arg7[%c0_54, %c0_55, %c7_56, %c0_57] : memref<8x2x25x128xf32, #tpu.memory_space<vmem>>, vector<8x2x16x128xf32>
    %cst_58 = arith.constant 0.000000e+00 : f32
    %56 = vector.broadcast %cst_58 : f32 to vector<8x2x16x128xf32>
    %57 = arith.select %2, %56, %55 : vector<8x2x16x128xi1>, vector<8x2x16x128xf32>
    %58 = vector.shape_cast %57 : vector<8x2x16x128xf32> to vector<256x128xf32>
    %59 = arith.truncf %58 : vector<256x128xf32> to vector<256x128xbf16>
    %c0_59 = arith.constant 0 : index
    %c0_60 = arith.constant 0 : index
    %60 = vector.load %arg8[%c0_59, %c0_60] : memref<256x384xbf16, #tpu.memory_space<vmem>>, vector<256x128xbf16>
    tpu.vector_store %arg8[%c0_59, %c0_60], %59 {strides = array<i32>} : memref<256x384xbf16, #tpu.memory_space<vmem>>, vector<256x128xbf16>,
    %c0_61 = arith.constant 0 : index
    %c0_62 = arith.constant 0 : index
    %c9_63 = arith.constant 9 : index
    %c0_64 = arith.constant 0 : index
    %61 = vector.load %arg7[%c0_61, %c0_62, %c9_63, %c0_64] : memref<8x2x25x128xf32, #tpu.memory_space<vmem>>, vector<8x2x16x128xf32>
    %cst_65 = arith.constant 0.000000e+00 : f32
    %62 = vector.broadcast %cst_65 : f32 to vector<8x2x16x128xf32>
    %63 = arith.select %4, %62, %61 : vector<8x2x16x128xi1>, vector<8x2x16x128xf32>
    %64 = vector.shape_cast %63 : vector<8x2x16x128xf32> to vector<256x128xf32>
    %65 = arith.truncf %64 : vector<256x128xf32> to vector<256x128xbf16>
    %c0_66 = arith.constant 0 : index
    %c256_67 = arith.constant 256 : index
    %66 = vector.load %arg8[%c0_66, %c256_67] : memref<256x384xbf16, #tpu.memory_space<vmem>>, vector<256x128xbf16>
    tpu.vector_store %arg8[%c0_66, %c256_67], %65 {strides = array<i32>} : memref<256x384xbf16, #tpu.memory_space<vmem>>, vector<256x128xbf16>,
    %c0_68 = arith.constant 0 : index
    %c0_69 = arith.constant 0 : index
    %67 = vector.load %arg8[%c0_68, %c0_69] : memref<256x384xbf16, #tpu.memory_space<vmem>>, vector<256x384xbf16>
    %c1_70 = arith.constant 1 : index
    %c0_71 = arith.constant 0 : index
    %c0_72 = arith.constant 0 : index
    %68 = vector.load %arg4[%c1_70, %c0_71, %c0_72] : memref<3x384x128xbf16, #tpu.memory_space<vmem>>, vector<1x384x128xbf16>
    %69 = vector.shape_cast %68 : vector<1x384x128xbf16> to vector<384x128xbf16>
    %cst_73 = arith.constant dense<0.000000e+00> : vector<256x128xf32>
    %70 = tpu.matmul %67, %69, %cst_73 {dimension_numbers = #tpu.dot_dimension_numbers<[1], [0], [0], [1], [0, 0, 1, 1], [], []>} : vector<256x384xbf16>, vector<384x128xbf16>, vector<256x128xf32> -> vector<256x128xf32>
    %c0_74 = arith.constant 0 : index
    %c0_75 = arith.constant 0 : index
    %71 = vector.load %arg5[%c0_74, %c0_75] : memref<1x128xf32, #tpu.memory_space<vmem>>, vector<1x128xf32>
    %72 = vector.broadcast %71 : vector<1x128xf32> to vector<256x128xf32>
    %73 = arith.addf %70, %72 : vector<256x128xf32>
    %c0_76 = arith.constant 0 : index
    %c0_77 = arith.constant 0 : index
    %74 = vector.load %arg9[%c0_76, %c0_77] : memref<256x128xf32, #tpu.memory_space<vmem>>, vector<256x128xf32>
    tpu.vector_store %arg9[%c0_76, %c0_77], %73 {strides = array<i32>} : memref<256x128xf32, #tpu.memory_space<vmem>>, vector<256x128xf32>,
    %c32_78 = arith.constant 32 : index
    %c0_79 = arith.constant 0 : index
    %75 = vector.load %arg9[%c32_78, %c0_79] : memref<256x128xf32, #tpu.memory_space<vmem>>, vector<224x128xf32>
    %c0_80 = arith.constant 0 : index
    %c0_81 = arith.constant 0 : index
    %76 = vector.load %arg8[%c0_80, %c0_81] : memref<256x384xbf16, #tpu.memory_space<vmem>>, vector<224x384xbf16>
    %c0_82 = arith.constant 0 : index
    %c0_83 = arith.constant 0 : index
    %c0_84 = arith.constant 0 : index
    %77 = vector.load %arg4[%c0_82, %c0_83, %c0_84] : memref<3x384x128xbf16, #tpu.memory_space<vmem>>, vector<1x384x128xbf16>
    %78 = vector.shape_cast %77 : vector<1x384x128xbf16> to vector<384x128xbf16>
    %cst_85 = arith.constant dense<0.000000e+00> : vector<224x128xf32>
    %79 = tpu.matmul %76, %78, %cst_85 {dimension_numbers = #tpu.dot_dimension_numbers<[1], [0], [0], [1], [0, 0, 1, 1], [], []>} : vector<224x384xbf16>, vector<384x128xbf16>, vector<224x128xf32> -> vector<224x128xf32>
    %80 = arith.addf %75, %79 : vector<224x128xf32>
    %c32_86 = arith.constant 32 : index
    %c0_87 = arith.constant 0 : index
    %81 = vector.load %arg9[%c32_86, %c0_87] : memref<256x128xf32, #tpu.memory_space<vmem>>, vector<224x128xf32>
    tpu.vector_store %arg9[%c32_86, %c0_87], %80 {strides = array<i32>} : memref<256x128xf32, #tpu.memory_space<vmem>>, vector<224x128xf32>,
    %c0_88 = arith.constant 0 : index
    %c0_89 = arith.constant 0 : index
    %82 = vector.load %arg9[%c0_88, %c0_89] : memref<256x128xf32, #tpu.memory_space<vmem>>, vector<224x128xf32>
    %c32_90 = arith.constant 32 : index
    %c0_91 = arith.constant 0 : index
    %83 = vector.load %arg8[%c32_90, %c0_91] : memref<256x384xbf16, #tpu.memory_space<vmem>>, vector<224x384xbf16>
    %c2_92 = arith.constant 2 : index
    %c0_93 = arith.constant 0 : index
    %c0_94 = arith.constant 0 : index
    %84 = vector.load %arg4[%c2_92, %c0_93, %c0_94] : memref<3x384x128xbf16, #tpu.memory_space<vmem>>, vector<1x384x128xbf16>
    %85 = vector.shape_cast %84 : vector<1x384x128xbf16> to vector<384x128xbf16>
    %cst_95 = arith.constant dense<0.000000e+00> : vector<224x128xf32>
    %86 = tpu.matmul %83, %85, %cst_95 {dimension_numbers = #tpu.dot_dimension_numbers<[1], [0], [0], [1], [0, 0, 1, 1], [], []>} : vector<224x384xbf16>, vector<384x128xbf16>, vector<224x128xf32> -> vector<224x128xf32>
    %87 = arith.addf %82, %86 : vector<224x128xf32>
    %c0_96 = arith.constant 0 : index
    %c0_97 = arith.constant 0 : index
    %88 = vector.load %arg9[%c0_96, %c0_97] : memref<256x128xf32, #tpu.memory_space<vmem>>, vector<224x128xf32>
    tpu.vector_store %arg9[%c0_96, %c0_97], %87 {strides = array<i32>} : memref<256x128xf32, #tpu.memory_space<vmem>>, vector<224x128xf32>,
    %c0_98 = arith.constant 0 : index
    %c0_99 = arith.constant 0 : index
    %89 = vector.load %arg9[%c0_98, %c0_99] : memref<256x128xf32, #tpu.memory_space<vmem>>, vector<256x128xf32>
    %90 = vector.shape_cast %89 : vector<256x128xf32> to vector<8x2x16x128xf32>
    %cst_100 = arith.constant 1.000000e-01 : f32
    %91 = vector.broadcast %cst_100 : f32 to vector<8x2x16x128xf32>
    %92 = arith.mulf %91, %90 : vector<8x2x16x128xf32>
    %c0_101 = arith.constant 0 : index
    %c0_102 = arith.constant 0 : index
    %c0_103 = arith.constant 0 : index
    %c0_104 = arith.constant 0 : index
    %93 = vector.load %arg1[%c0_101, %c0_102, %c0_103, %c0_104] : memref<8x2x16x128xf32, #tpu.memory_space<vmem>>, vector<8x2x16x128xf32>
    %94 = arith.addf %92, %93 : vector<8x2x16x128xf32>
    %c0_105 = arith.constant 0 : index
    %c0_106 = arith.constant 0 : index
    %c0_107 = arith.constant 0 : index
    %c0_108 = arith.constant 0 : index
    %95 = vector.load %arg6[%c0_105, %c0_106, %c0_107, %c0_108] : memref<8x2x16x128xf32, #tpu.memory_space<vmem>>, vector<8x2x16x128xf32>
    tpu.vector_store %arg6[%c0_105, %c0_106, %c0_107, %c0_108], %94 {strides = array<i32>} : memref<8x2x16x128xf32, #tpu.memory_space<vmem>>, vector<8x2x16x128xf32>,
    return
  }
  func.func @transform_0(%arg0: i32) -> (i32, i32, i32, i32) {
    %c0_i32 = arith.constant 0 : i32
    %c0_i32_0 = arith.constant 0 : i32
    %c0_i32_1 = arith.constant 0 : i32
    %c0_i32_2 = arith.constant 0 : i32
    return %c0_i32, %arg0, %c0_i32_0, %c0_i32_1 : i32, i32, i32, i32
  }
  func.func @transform_1(%arg0: i32) -> (i32, i32, i32) {
    %c0_i32 = arith.constant 0 : i32
    %c0_i32_0 = arith.constant 0 : i32
    %c0_i32_1 = arith.constant 0 : i32
    %c0_i32_2 = arith.constant 0 : i32
    return %c0_i32, %c0_i32_0, %c0_i32_1 : i32, i32, i32
  }
  func.func @transform_2(%arg0: i32) -> (i32, i32) {
    %c0_i32 = arith.constant 0 : i32
    %c0_i32_0 = arith.constant 0 : i32
    %c0_i32_1 = arith.constant 0 : i32
    return %c0_i32, %c0_i32_0 : i32, i32
  }
  func.func @transform_3(%arg0: i32) -> (i32, i32, i32) {
    %c0_i32 = arith.constant 0 : i32
    %c0_i32_0 = arith.constant 0 : i32
    %c0_i32_1 = arith.constant 0 : i32
    %c0_i32_2 = arith.constant 0 : i32
    return %c0_i32, %c0_i32_0, %c0_i32_1 : i32, i32, i32
  }
  func.func @transform_4(%arg0: i32) -> (i32, i32) {
    %c0_i32 = arith.constant 0 : i32
    %c0_i32_0 = arith.constant 0 : i32
    %c0_i32_1 = arith.constant 0 : i32
    return %c0_i32, %c0_i32_0 : i32, i32
  }
  func.func @transform_5(%arg0: i32) -> (i32, i32, i32, i32) {
    %c0_i32 = arith.constant 0 : i32
    %c0_i32_0 = arith.constant 0 : i32
    %c0_i32_1 = arith.constant 0 : i32
    %c0_i32_2 = arith.constant 0 : i32
    return %c0_i32, %arg0, %c0_i32_0, %c0_i32_1 : i32, i32, i32, i32
  }
}

</mosaic_0001>

<bundles_post_ra>
// kernel: residual_block_3d_packed.1
= control target key start
LH: loop header
LB: loop body
LE: loop exit
PB: predicated region body
PF: predicated region fallthrough
CT: control target
= control target key end

     0   :  { %10 = vsyncpa [#allocation6], 0  ;;  %s9493_s0 = inlined_call_operand.hbm [shape: f32[8,2,16,128], index: 0, kind: input, shape index: {}]   ;;  %s9494_s1 = inlined_call_operand.hbm [shape: bf16[3,384,128], index: 1, kind: input, shape index: {}]   ;;  %s9495_s2 = inlined_call_operand.vmem [shape: f32[1,128], index: 2, kind: input, shape index: {}]   ;;  %s9496_s3 = inlined_call_operand.hbm [shape: bf16[3,384,128], index: 3, kind: input, shape index: {}]   ;;  %s9497_s4 = inlined_call_operand.vmem [shape: f32[1,128], index: 4, kind: input, shape index: {}]   ;;  %s9498_s5 = inlined_call_operand.hbm [shape: f32[8,2,16,128], index: 5, kind: output, shape index: {}]  }
   0x1   :  { %11 = vsyncpa [#allocation9], 0  ;;  %s30_s20 = sshll.u32 %s9494_s1, 4  ;;  %s31_s20 = int_to_ptr.hbm [resolvable:$true] %s30_s20 }
   0x2   :  { %12 = vsyncpa [#allocation7], 0  ;;  %s8119_s21 = smov [#allocation8]   ;;  %s17_s25 = sshll.u32 %s9493_s0, 4  ;;  %s18_s25 = int_to_ptr.hbm [resolvable:$true] %s17_s25 }
   0x3   :  { %s32_s22 = sshll.u32 %s8119_s21, 4  ;;  %s8120_s26 = smov 64   ;;  %s33_s22 = int_to_ptr.vmem [resolvable:$true] %s32_s22 }
   0x4   :  { %s8121_s27 = smov 4   ;;  %s8122_s28 = smov [#allocation5]  }
   0x5   :  { %38 = dma.hbm_to_vmem [thread:$0]  %s31_s20, 9216, %s33_s22, [#allocation9], %s8120_s26, %s8120_s26, %s8121_s27  }
   0x6   :  { %s19_s29 = sshll.u32 %s8122_s28, 4  ;;  %s8123_s30 = smov 128   ;;  %s20_s29 = int_to_ptr.vmem [resolvable:$true] %s19_s29 }
   0x7   :  { %s8124_s6 = smov 8   ;;  %s45_s8 = sshll.u32 %s9496_s3, 4  ;;  %s46_s8 = int_to_ptr.hbm [resolvable:$true] %s45_s8 }
   0x8   :  { %25 = dma.hbm_to_vmem [thread:$0]  %s18_s25, 4096, %s20_s29, [#allocation6], %s8123_s30, %s8123_s30, %s8124_s6  }
   0x9   :  { %s8125_s9 = smov [#allocation10]  }
   0xa   :  { %s47_s0 = sshll.u32 %s8125_s9, 4  ;;  %s48_s0 = int_to_ptr.vmem [resolvable:$true] %s47_s0 }
   0xb   :  { %53 = dma.hbm_to_vmem [thread:$0]  %s46_s8, 9216, %s48_s0, [#allocation9], %s8120_s26, %s8120_s26, %s8121_s27  }
   0xc   :  { %8113 = dma.done.wait [#allocation6], 4096  }
   0xd   :  { %8114 = vsyncadd [#allocation6], 4294963200 }
   0xe   :  { %8115 = dma.done.wait [#allocation9], 18432  }
   0xf   :  { %8116 = vsyncadd [#allocation9], 4294948864  ;;  %v7612_v0 = vld [vmem:[#allocation8 + $0xf8] sm:$0xff]  ;;  %v7611_v2 = vld [vmem:[#allocation8 + $0xf0] sm:$0xff]  ;;  %v68_v3 = vlaneseq  ;;  %s5911_s19 = sshll.u32 %s9498_s5, 4  ;;  %s5912_s19 = int_to_ptr.hbm [resolvable:$true] %s5911_s19 }
  0x10   :  { %v8169_v1 = vld [vmem:[#allocation8 + $0x38] sm:$0xff]  ;;  %7965 = vmatpush.bf16.msra.mxu1 %v7612_v0  ;;  %7966 = vmatpush.bf16.msra.mxu2 %v7612_v0  ;;  %v8172_v4 = vld [vmem:[#allocation8 + $0x30] sm:$0xff]  ;;  %v91_v5 = vld [vmem:[#allocation5 + $0x80] sm:$0xff] }
  0x11   :  { %7981 = vmatpush.bf16.msra.mxu3 %v8169_v1  ;;  %976 = vmatpush.bf16.msra.mxu0 %v7612_v0  ;;  %v92_v6 = vld [vmem:[#allocation5 + $0x88] sm:$0xff]  ;;  %v8174_v8 = vshrl.u32 %v68_v3, 7  ;;  %187 = vst [vmem:[#allocation2 + $0x108] sm:$0xff] %v91_v5  ;;  %v103_v9 = vld [vmem:[#allocation5 + $0xe0] sm:$0xff]  ;;  %v93_v14 = vld [vmem:[#allocation5 + $0x90] sm:$0xff] }
  0x12   :  { %v7610_v7 = vld [vmem:[#allocation8 + $0xe8] sm:$0xff]  ;;  %188 = vst [vmem:[#allocation2 + $0x110] sm:$0xff] %v92_v6  ;;  %v8179_v12 = vld [vmem:[#allocation5 + $0x40] sm:$0xff]  ;;  %v94_v17 = vld [vmem:[#allocation5 + $0x98] sm:$0xff] }
  0x13   :  { %9503 = vst [vmem:[#allocation15_spill] sm:$0xff] %v8174_v8  ;;  %v104_v10 = vld [vmem:[#allocation5 + $0xe8] sm:$0xff]  ;;  %v7609_v15 = vld [vmem:[#allocation8 + $0xe0] sm:$0xff]  ;;  %vm71_vm0 = vcmp.eq.s32.totalorder %v8174_v8, 0  ;;  %v105_v18 = vld [vmem:[#allocation5 + $0xf0] sm:$0xff] }
  0x14   :  { %7967 = vmatpush.bf16.msra.mxu1 %v7611_v2  ;;  %7968 = vmatpush.bf16.msra.mxu2 %v7611_v2  ;;  %v8177_v11 = vld [vmem:[#allocation8 + $0x28] sm:$0xff]  ;;  %199 = vst [vmem:[#allocation2 + $0x1c8] sm:$0xff] %v103_v9  ;;  %v8183_v16 = vld [vmem:[#allocation8 + $0x20] sm:$0xff]  ;;  %v106_v19 = vld [vmem:[#allocation5 + $0xf8] sm:$0xff] }
  0x15   :  { %7982 = vmatpush.bf16.msra.mxu3 %v8172_v4  ;;  %977 = vmatpush.bf16.msra.mxu0 %v7611_v2  ;;  %v8181_v13 = vld [vmem:[#allocation5 + $0x48] sm:$0xff]  ;;  %200 = vst [vmem:[#allocation2 + $0x1d0] sm:$0xff] %v104_v10  ;;  %v8189_v21 = vld [vmem:[#allocation5 + $0x50] sm:$0xff]  ;;  %v7608_v22 = vld [vmem:[#allocation8 + $0xd8] sm:$0xff] }
  0x16   :  { %179 = vst [vmem:[#allocation2 + $0x88] sm:$0xff] %v8179_v12  ;;  %v8194_v25 = vld [vmem:[#allocation8 + $0x18] sm:$0xff]  ;;  %v7607_v34 = vld [vmem:[#allocation8 + $0xd0] sm:$0xff]  ;;  %v7606_v46 = vld [vmem:[#allocation8 + $0xc8] sm:$0xff] }
  0x17   :  { %180 = vst [vmem:[#allocation2 + $0x90] sm:$0xff] %v8181_v13  ;;  %v8202_v37 = vld [vmem:[#allocation8 + $0x10] sm:$0xff]  ;;  %v8209_v49 = vld [vmem:[#allocation8 + $0x8] sm:$0xff]  ;;  %v7605_v53 = vld [vmem:[#allocation8 + $0xc0] sm:$0xff] }
  0x18   :  { %7969 = vmatpush.bf16.msra.mxu1 %v7610_v7  ;;  %7970 = vmatpush.bf16.msra.mxu2 %v7610_v7  ;;  %189 = vst [vmem:[#allocation2 + $0x128] sm:$0xff] %v93_v14  ;;  %v219_v20 = vld [vmem:[#allocation2 + $0x107] sm:$0xff]  ;;  %v8211_v54 = vld [vmem:[#allocation5 + $0x58] sm:$0xff] }
  0x19   :  { %7983 = vmatpush.bf16.msra.mxu3 %v8177_v11  ;;  %978 = vmatpush.bf16.msra.mxu0 %v7610_v7  ;;  %190 = vst [vmem:[#allocation2 + $0x130] sm:$0xff] %v94_v17  ;;  %v220_v23 = vld [vmem:[#allocation2 + $0x10f] sm:$0xff]  ;;  %v251_v24 = vsel %vm71_vm0, 0.0, %v219_v20  ;;  %v8215_v56 = vld [vmem:[#allocation8] sm:$0xff]  ;;  %v7628_v63 = vld [vmem:[#allocation8 + $0x178] sm:$0xff] }
  0x1a   :  { %201 = vst [vmem:[#allocation2 + $0x1e8] sm:$0xff] %v105_v18  ;;  %v283_v26 = vpack.c.bf16 %v251_v24, %v251_v24  ;;  %v284_v27 = vpack.c.bf16 %v220_v23, %v220_v23  ;;  %v95_v59 = vld [vmem:[#allocation5 + $0xa0] sm:$0xff]  ;;  %v96_v0 = vld [vmem:[#allocation5 + $0xa8] sm:$0xff]  ;;  %v7686_v3 = vld [vmem:[#allocation8 + $0x78] sm:$0xff] }
  0x1b   :  { %v231_v28 = vld [vmem:[#allocation2 + $0x1c7] sm:$0xff]  ;;  %202 = vst [vmem:[#allocation2 + $0x1f0] sm:$0xff] %v106_v19  ;;  %v7627_v17 = vld [vmem:[#allocation8 + $0x170] sm:$0xff]  ;;  %v98_v23 = vld [vmem:[#allocation5 + $0xb8] sm:$0xff] }
  0x1c   :  { %7971 = vmatpush.bf16.msra.mxu1 %v7609_v15  ;;  %7972 = vmatpush.bf16.msra.mxu2 %v7609_v15  ;;  %v232_v29 = vld [vmem:[#allocation2 + $0x1cf] sm:$0xff]  ;;  %v263_v30 = vsel %vm71_vm0, 0.0, %v231_v28  ;;  %181 = vst [vmem:[#allocation2 + $0xa8] sm:$0xff] %v8189_v21  ;;  %v8219_v5 = vld [vmem:[#allocation5] sm:$0xff] }
  0x1d   :  { %7984 = vmatpush.bf16.msra.mxu3 %v8183_v16  ;;  %979 = vmatpush.bf16.msra.mxu0 %v7609_v15  ;;  %315 = vst [vmem:[#allocation3 + $0xc0] sm:$0xf] %v283_v26  ;;  %v295_v31 = vpack.c.bf16 %v263_v30, %v263_v30  ;;  %v296_v32 = vpack.c.bf16 %v232_v29, %v232_v29  ;;  %v211_v33 = vld [vmem:[#allocation2 + $0x87] sm:$0xff]  ;;  %v7685_v19 = vld [vmem:[#allocation8 + $0x70] sm:$0xff]  ;;  %v7620_v26 = vld [vmem:[#allocation8 + $0x138] sm:$0xff] }
  0x1e   :  { %316 = vst [vmem:[#allocation3 + $0xcc] sm:$0xf] %v284_v27  ;;  %v212_v35 = vld [vmem:[#allocation2 + $0x8f] sm:$0xff]  ;;  %v243_v36 = vsel %vm71_vm0, 0.0, %v211_v33  ;;  %v8223_v15 = vld [vmem:[#allocation5 + $0x60] sm:$0xff] }
  0x1f   :  { %327 = vst [vmem:[#allocation3 + $0x150] sm:$0xf] %v295_v31  ;;  %v275_v38 = vpack.c.bf16 %v243_v36, %v243_v36  ;;  %v276_v39 = vpack.c.bf16 %v212_v35, %v212_v35  ;;  %v221_v40 = vld [vmem:[#allocation2 + $0x127] sm:$0xff]  ;;  %v97_v20 = vld [vmem:[#allocation5 + $0xb0] sm:$0xff] }
  0x20   :  { %7973 = vmatpush.bf16.msra.mxu1 %v7608_v22  ;;  %7974 = vmatpush.bf16.msra.mxu2 %v7608_v22  ;;  %328 = vst [vmem:[#allocation3 + $0x15c] sm:$0xf] %v296_v32  ;;  %v222_v41 = vld [vmem:[#allocation2 + $0x12f] sm:$0xff]  ;;  %v253_v42 = vsel %vm71_vm0, 0.0, %v221_v40  ;;  %v8237_v32 = vld [vmem:[#allocation5 + $0x18] sm:$0xff] }
  0x21   :  { %7985 = vmatpush.bf16.msra.mxu3 %v8194_v25  ;;  %980 = vmatpush.bf16.msra.mxu0 %v7608_v22  ;;  %307 = vst [vmem:[#allocation3 + $0x60] sm:$0xf] %v275_v38  ;;  %v285_v43 = vpack.c.bf16 %v253_v42, %v253_v42  ;;  %v286_v44 = vpack.c.bf16 %v222_v41, %v222_v41  ;;  %v233_v45 = vld [vmem:[#allocation2 + $0x1e7] sm:$0xff]  ;;  %v8231_v22 = vadd.s32 8, %v8174_v8  ;;  %v8235_v29 = vld [vmem:[#allocation5 + $0x10] sm:$0xff] }
  0x22   :  { %308 = vst [vmem:[#allocation3 + $0x6c] sm:$0xf] %v276_v39  ;;  %v234_v47 = vld [vmem:[#allocation2 + $0x1ef] sm:$0xff]  ;;  %v265_v48 = vsel %vm71_vm0, 0.0, %v233_v45  ;;  %v7625_v39 = vld [vmem:[#allocation8 + $0x160] sm:$0xff] }
  0x23   :  { %317 = vst [vmem:[#allocation3 + $0xd8] sm:$0xf] %v285_v43  ;;  %v297_v50 = vpack.c.bf16 %v265_v48, %v265_v48  ;;  %v298_v51 = vpack.c.bf16 %v234_v47, %v234_v47  ;;  %v213_v52 = vld [vmem:[#allocation2 + $0xa7] sm:$0xff]  ;;  %vm74_vm1 = vcmp.eq.s32.totalorder %v8231_v22, 15 }
  0x24   :  { %7975 = vmatpush.bf16.msra.mxu1 %v7607_v34  ;;  %7976 = vmatpush.bf16.msra.mxu2 %v7607_v34  ;;  %318 = vst [vmem:[#allocation3 + $0xe4] sm:$0xf] %v286_v44  ;;  %v245_v55 = vsel %vm71_vm0, 0.0, %v213_v52  ;;  %v6023_v57 = vld [vmem:[#allocation3 + $0xc0] sm:$0xf]  ;;  %v8221_v10 = vld [vmem:[#allocation5 + $0x8] sm:$0xff] }
  0x25   :  { %7986 = vmatpush.bf16.msra.mxu3 %v8202_v37  ;;  %981 = vmatpush.bf16.msra.mxu0 %v7607_v34  ;;  %329 = vst [vmem:[#allocation3 + $0x168] sm:$0xf] %v297_v50  ;;  %v277_v58 = vpack.c.bf16 %v245_v55, %v245_v55  ;;  %v7582_v60 = vld [vmem:[#allocation3 + $0xc8] sm:$0xf0] }
  0x26   :  { %v6095_v61 = vld [vmem:[#allocation3 + $0x150] sm:$0xf]  ;;  %330 = vst [vmem:[#allocation3 + $0x174] sm:$0xf] %v298_v51  ;;  %v6024_v6 = vor.u32 %v7582_v60, %v6023_v57  ;;  %v8227_v18 = vld [vmem:[#allocation5 + $0x68] sm:$0xff]  ;;  %v7624_v57 = vld [vmem:[#allocation8 + $0x158] sm:$0xff] }
  0x27   :  { %v7600_v62 = vld [vmem:[#allocation3 + $0x158] sm:$0xf0]  ;;  %182 = vst [vmem:[#allocation2 + $0xb0] sm:$0xff] %v8211_v54  ;;  %v7626_v27 = vld [vmem:[#allocation8 + $0x168] sm:$0xff] }
  0x28   :  { %7977 = vmatpush.bf16.msra.mxu1 %v7606_v46  ;;  %7978 = vmatpush.bf16.msra.mxu2 %v7606_v46  ;;  %v6263_v2 = vld [vmem:[#allocation3 + $0x60] sm:$0xf]  ;;  %309 = vst [vmem:[#allocation3 + $0x78] sm:$0xf] %v277_v58  ;;  %v6096_v7 = vor.u32 %v7600_v62, %v6095_v61  ;;  %v7684_v31 = vld [vmem:[#allocation8 + $0x68] sm:$0xff] }
  0x29   :  { %7987 = vmatpush.bf16.msra.mxu3 %v8209_v49  ;;  %982 = vmatpush.bf16.msra.mxu0 %v7606_v46  ;;  %v7642_v9 = vld [vmem:[#allocation3 + $0x68] sm:$0xf0]  ;;  %191 = vst [vmem:[#allocation2 + $0x148] sm:$0xff] %v95_v59 }
  0x2a   :  { %v6264_v14 = vor.u32 %v7642_v9, %v6263_v2  ;;  %192 = vst [vmem:[#allocation2 + $0x150] sm:$0xff] %v96_v0  ;;  %v6035_v43 = vld [vmem:[#allocation3 + $0xd8] sm:$0xf] }
  0x2b   :  { %171 = vst [vmem:[#allocation2 + $0x8] sm:$0xff] %v8219_v5  ;;  %v7585_v44 = vld [vmem:[#allocation3 + $0xe0] sm:$0xf0] }
  0x2c   :  { %7979 = vmatpush.bf16.msra.mxu1 %v7605_v53  ;;  %7980 = vmatpush.bf16.msra.mxu2 %v7605_v53  ;;  %172 = vst [vmem:[#allocation2 + $0x10] sm:$0xff] %v8221_v10  ;;  %v6107_v50 = vld [vmem:[#allocation3 + $0x168] sm:$0xf] }
  0x2d   :  { %7988 = vmatpush.bf16.msra.mxu3 %v8215_v56  ;;  %983 = vmatpush.bf16.msra.mxu0 %v7605_v53  ;;  %9504 = vst [vmem:[#allocation16_spill] sm:$0xff] %v8231_v22  ;;  %v7603_v55 = vld [vmem:[#allocation3 + $0x170] sm:$0xf0] }
  0x2e   :  { %183 = vst [vmem:[#allocation2 + $0xc8] sm:$0xff] %v8223_v15  ;;  %v214_v24 = vld [vmem:[#allocation2 + $0xaf] sm:$0xff]  ;;  %v6108_v9 = vor.u32 %v7603_v55, %v6107_v50 }
  0x2f   :  { %1024 = vmatmul.bf16.vlgmr.msra.gmra.mxu1 %v6024_v6  ;;  %1054 = vmatmul.bf16.vlgmr.msra.gmra.mxu2 %v6096_v7  ;;  %184 = vst [vmem:[#allocation2 + $0xd0] sm:$0xff] %v8227_v18  ;;  %v278_v28 = vpack.c.bf16 %v214_v24, %v214_v24  ;;  %v6275_v62 = vld [vmem:[#allocation3 + $0x78] sm:$0xf]  ;;  %v6036_v7 = vor.u32 %v7585_v44, %v6035_v43  ;;  %v7623_v24 = vld [vmem:[#allocation8 + $0x150] sm:$0xff]  ;;  %v99_v43 = vld [vmem:[#allocation5 + $0xc0] sm:$0xff] }
  0x30   :  { %1154 = vmatpush.bf16.msrb.mxu2 %v7628_v63  ;;  %1803 = vmatmul.bf16.vlgmr.msra.gmra.mxu3 %v6264_v14  ;;  %193 = vst [vmem:[#allocation2 + $0x168] sm:$0xff] %v97_v20  ;;  %v223_v30 = vld [vmem:[#allocation2 + $0x147] sm:$0xff] }
  0x31   :  { %1854 = vmatpush.bf16.msrb.mxu3 %v7686_v3  ;;  %1065 = vmatpush.bf16.msrb.mxu1 %v7620_v26  ;;  %194 = vst [vmem:[#allocation2 + $0x170] sm:$0xff] %v98_v23  ;;  %v224_v33 = vld [vmem:[#allocation2 + $0x14f] sm:$0xff]  ;;  %v255_v34 = vsel %vm71_vm0, 0.0, %v223_v30 }
  0x32   :  { %310 = vst [vmem:[#allocation3 + $0x84] sm:$0xf] %v278_v28  ;;  %v287_v35 = vpack.c.bf16 %v255_v34, %v255_v34  ;;  %v288_v36 = vpack.c.bf16 %v224_v33, %v224_v33  ;;  %v203_v38 = vld [vmem:[#allocation2 + $0x7] sm:$0xff]  ;;  %v7619_v33 = vld [vmem:[#allocation8 + $0x130] sm:$0xff] }
  0x33   :  { %173 = vst [vmem:[#allocation2 + $0x28] sm:$0xff] %v8235_v29  ;;  %v331_v40 = vld [vmem:[#allocation2 + $0x9] sm:$0xff]  ;;  %v332_v41 = vld [vmem:[#allocation2 + $0x11] sm:$0xff]  ;;  %v235_v42 = vsel %vm71_vm0, 0.0, %v203_v38  ;;  %v7683_v38 = vld [vmem:[#allocation8 + $0x60] sm:$0xff] }
  0x34   :  { %1155 = vmatpush.bf16.msrb.mxu2 %v7627_v17  ;;  %174 = vst [vmem:[#allocation2 + $0x30] sm:$0xff] %v8237_v32  ;;  %v364_v45 = vsel %vm74_vm1, 0.0, %v332_v41  ;;  %v395_v46 = vpack.c.bf16 %v331_v40, %v331_v40  ;;  %v204_v48 = vld [vmem:[#allocation2 + $0xf] sm:$0xff]  ;;  %v267_v60 = vpack.c.bf16 %v235_v42, %v235_v42 }
  0x35   :  { %1855 = vmatpush.bf16.msrb.mxu3 %v7685_v19  ;;  %319 = vst [vmem:[#allocation3 + $0xf0] sm:$0xf] %v287_v35  ;;  %v215_v47 = vld [vmem:[#allocation2 + $0xc7] sm:$0xff]  ;;  %v396_v51 = vpack.c.bf16 %v364_v45, %v364_v45  ;;  %v268_v63 = vpack.c.bf16 %v204_v48, %v204_v48  ;;  %v8256_v34 = vld [vmem:[#allocation5 + $0x70] sm:$0xff]  ;;  %v8258_v35 = vld [vmem:[#allocation5 + $0x78] sm:$0xff]  ;;  %1066 = vmatpush.bf16.msrb.mxu1 %v7619_v33 }
  0x36   :  { %320 = vst [vmem:[#allocation3 + $0xfc] sm:$0xf] %v288_v36  ;;  %v216_v52 = vld [vmem:[#allocation2 + $0xcf] sm:$0xff]  ;;  %v247_v53 = vsel %vm71_vm0, 0.0, %v215_v47  ;;  %v8262_v48 = vld [vmem:[#allocation5 + $0x20] sm:$0xff] }
  0x37   :  { %427 = vst [vmem:[#allocation3 + $0x8] sm:$0xf] %v395_v46  ;;  %v279_v58 = vpack.c.bf16 %v247_v53, %v247_v53  ;;  %v280_v59 = vpack.c.bf16 %v216_v52, %v216_v52  ;;  %v225_v61 = vld [vmem:[#allocation2 + $0x167] sm:$0xff] }
  0x38   :  { %1156 = vmatpush.bf16.msrb.mxu2 %v7626_v27  ;;  %428 = vst [vmem:[#allocation3 + $0x14] sm:$0xf] %v396_v51  ;;  %v226_v0 = vld [vmem:[#allocation2 + $0x16f] sm:$0xff]  ;;  %v257_v2 = vsel %vm71_vm0, 0.0, %v225_v61  ;;  %v7621_v46 = vld [vmem:[#allocation8 + $0x140] sm:$0xff] }
  0x39   :  { %1856 = vmatpush.bf16.msrb.mxu3 %v7684_v31  ;;  %v7645_v3 = vld [vmem:[#allocation3 + $0x80] sm:$0xf0]  ;;  %311 = vst [vmem:[#allocation3 + $0x90] sm:$0xf] %v279_v58  ;;  %v289_v6 = vpack.c.bf16 %v257_v2, %v257_v2  ;;  %v290_v14 = vpack.c.bf16 %v226_v0, %v226_v0  ;;  %v7618_v41 = vld [vmem:[#allocation8 + $0x128] sm:$0xff] }
  0x3a   :  { %312 = vst [vmem:[#allocation3 + $0x9c] sm:$0xf] %v280_v59  ;;  %v205_v17 = vld [vmem:[#allocation2 + $0x27] sm:$0xff]  ;;  %v6276_v19 = vor.u32 %v7645_v3, %v6275_v62  ;;  %1067 = vmatpush.bf16.msrb.mxu1 %v7618_v41  ;;  %v101_v62 = vld [vmem:[#allocation5 + $0xd0] sm:$0xff] }
  0x3b   :  { %299 = vst [vmem:[#allocation3] sm:$0xf] %v267_v60  ;;  %v333_v20 = vld [vmem:[#allocation2 + $0x29] sm:$0xff]  ;;  %v334_v23 = vld [vmem:[#allocation2 + $0x31] sm:$0xff]  ;;  %v237_v28 = vsel %vm71_vm0, 0.0, %v205_v17 }
  0x3c   :  { %1157 = vmatpush.bf16.msrb.mxu2 %v7625_v39  ;;  %300 = vst [vmem:[#allocation3 + $0xc] sm:$0xf] %v268_v63  ;;  %v366_v26 = vsel %vm74_vm1, 0.0, %v334_v23  ;;  %v397_v27 = vpack.c.bf16 %v333_v20, %v333_v20  ;;  %v206_v31 = vld [vmem:[#allocation2 + $0x2f] sm:$0xff]  ;;  %v269_v36 = vpack.c.bf16 %v237_v28, %v237_v28  ;;  %v8273_v17 = vld [vmem:[#allocation5 + $0x38] sm:$0xff] }
  0x3d   :  { %321 = vst [vmem:[#allocation3 + $0x108] sm:$0xf] %v289_v6  ;;  %v398_v30 = vpack.c.bf16 %v366_v26, %v366_v26  ;;  %v7622_v39 = vld [vmem:[#allocation8 + $0x148] sm:$0xff]  ;;  %v270_v40 = vpack.c.bf16 %v206_v31, %v206_v31  ;;  %1857 = vmatpush.bf16.msrb.mxu3 %v7683_v38  ;;  %v6047_v51 = vld [vmem:[#allocation3 + $0xf0] sm:$0xf]  ;;  %v102_v6 = vld [vmem:[#allocation5 + $0xd8] sm:$0xff] }
  0x3e   :  { %322 = vst [vmem:[#allocation3 + $0x114] sm:$0xf] %v290_v14  ;;  %v100_v45 = vld [vmem:[#allocation5 + $0xc8] sm:$0xff]  ;;  %v7588_v52 = vld [vmem:[#allocation3 + $0xf8] sm:$0xf0] }
  0x3f   :  { %1029 = vmatmul.bf16.gmra.mxu1 %v6036_v7  ;;  %1059 = vmatmul.bf16.gmra.mxu2 %v6108_v9  ;;  %429 = vst [vmem:[#allocation3 + $0x20] sm:$0xf] %v397_v27  ;;  %v8264_v50 = vld [vmem:[#allocation5 + $0x28] sm:$0xff]  ;;  %v7559_v55 = vld [vmem:[#allocation3 + $0x10] sm:$0xf0]  ;;  %v6048_v63 = vor.u32 %v7588_v52, %v6047_v51 }
  0x40   :  { %1158 = vmatpush.bf16.msrb.mxu2 %v7624_v57  ;;  %1808 = vmatmul.bf16.gmra.mxu3 %v6276_v19  ;;  %430 = vst [vmem:[#allocation3 + $0x2c] sm:$0xf] %v398_v30  ;;  %v5935_v53 = vld [vmem:[#allocation3 + $0x8] sm:$0xf]  ;;  %v6287_v57 = vld [vmem:[#allocation3 + $0x90] sm:$0xf] }
  0x41   :  { %185 = vst [vmem:[#allocation2 + $0xe8] sm:$0xff] %v8256_v34  ;;  %v7648_v58 = vld [vmem:[#allocation3 + $0x98] sm:$0xf0]  ;;  %v5936_v0 = vor.u32 %v7559_v55, %v5935_v53  ;;  %v8271_v9 = vld [vmem:[#allocation5 + $0x30] sm:$0xff] }
  0x42   :  { %v5927_v42 = vld [vmem:[#allocation3] sm:$0xf]  ;;  %186 = vst [vmem:[#allocation2 + $0xf0] sm:$0xff] %v8258_v35  ;;  %v6288_v7 = vor.u32 %v7648_v58, %v6287_v57 }
  0x43   :  { %v7558_v44 = vld [vmem:[#allocation3 + $0x8] sm:$0xf0]  ;;  %301 = vst [vmem:[#allocation3 + $0x18] sm:$0xf] %v269_v36 }
  0x44   :  { %1159 = vmatpush.bf16.msrb.mxu2 %v7623_v24  ;;  %v5928_v47 = vor.u32 %v7558_v44, %v5927_v42  ;;  %302 = vst [vmem:[#allocation3 + $0x24] sm:$0xf] %v270_v40  ;;  %v6059_v51 = vld [vmem:[#allocation3 + $0x108] sm:$0xf] }
  0x45   :  { %195 = vst [vmem:[#allocation2 + $0x188] sm:$0xff] %v99_v43  ;;  %v7591_v52 = vld [vmem:[#allocation3 + $0x110] sm:$0xf0] }
  0x46   :  { %984 = vmatmul.bf16.vlgmr.msra.gmra.mxu0 %v5928_v47  ;;  %196 = vst [vmem:[#allocation2 + $0x190] sm:$0xff] %v100_v45  ;;  %v5947_v53 = vld [vmem:[#allocation3 + $0x20] sm:$0xf] }
  0x47   :  { %175 = vst [vmem:[#allocation2 + $0x48] sm:$0xff] %v8262_v48  ;;  %v7562_v57 = vld [vmem:[#allocation3 + $0x28] sm:$0xf0] }
  0x48   :  { %1160 = vmatpush.bf16.msrb.mxu2 %v7622_v39  ;;  %v217_v59 = vld [vmem:[#allocation2 + $0xe7] sm:$0xff]  ;;  %176 = vst [vmem:[#allocation2 + $0x50] sm:$0xff] %v8264_v50 }
  0x49   :  { %v218_v60 = vld [vmem:[#allocation2 + $0xef] sm:$0xff]  ;;  %v249_v61 = vsel %vm71_vm0, 0.0, %v217_v59  ;;  %197 = vst [vmem:[#allocation2 + $0x1a8] sm:$0xff] %v101_v62  ;;  %v7617_v39 = vld [vmem:[#allocation8 + $0x120] sm:$0xff] }
  0x4a   :  { %v281_v2 = vpack.c.bf16 %v249_v61, %v249_v61  ;;  %v282_v3 = vpack.c.bf16 %v218_v60, %v218_v60  ;;  %198 = vst [vmem:[#allocation2 + $0x1b0] sm:$0xff] %v102_v6  ;;  %v5939_v20 = vld [vmem:[#allocation3 + $0x18] sm:$0xf]  ;;  %1068 = vmatpush.bf16.msrb.mxu1 %v7617_v39  ;;  %v7654_v39 = vld [vmem:[#allocation3 + $0xc8] sm:$0xf0] }
  0x4b   :  { %v7561_v23 = vld [vmem:[#allocation3 + $0x20] sm:$0xf0]  ;;  %177 = vst [vmem:[#allocation2 + $0x68] sm:$0xff] %v8271_v9 }
  0x4c   :  { %1161 = vmatpush.bf16.msrb.mxu2 %v7621_v46  ;;  %313 = vst [vmem:[#allocation3 + $0xa8] sm:$0xf] %v281_v2  ;;  %v227_v14 = vld [vmem:[#allocation2 + $0x187] sm:$0xff]  ;;  %v5940_v43 = vor.u32 %v7561_v23, %v5939_v20  ;;  %v7682_v20 = vld [vmem:[#allocation8 + $0x58] sm:$0xff]  ;;  %v107_v23 = vpack.c.bf16 %v8219_v5, %v8219_v5 }
  0x4d   :  { %314 = vst [vmem:[#allocation3 + $0xb4] sm:$0xf] %v282_v3  ;;  %v228_v19 = vld [vmem:[#allocation2 + $0x18f] sm:$0xff]  ;;  %1858 = vmatpush.bf16.msrb.mxu3 %v7682_v20 }
  0x4e   :  { %v292_v26 = vpack.c.bf16 %v228_v19, %v228_v19  ;;  %v207_v27 = vld [vmem:[#allocation2 + $0x47] sm:$0xff]  ;;  %178 = vst [vmem:[#allocation2 + $0x70] sm:$0xff] %v8273_v17  ;;  %v7616_v19 = vld [vmem:[#allocation8 + $0x118] sm:$0xff] }
  0x4f   :  { %1034 = vmatmul.bf16.gmra.mxu1 %v6048_v63  ;;  %1162 = vmatmul.bf16.vlgmr.msrb.gmra.mxu2 %v5936_v0  ;;  %v335_v28 = vld [vmem:[#allocation2 + $0x49] sm:$0xff]  ;;  %v336_v30 = vld [vmem:[#allocation2 + $0x51] sm:$0xff]  ;;  %v239_v33 = vsel %vm71_vm0, 0.0, %v207_v27  ;;  %v6060_v0 = vor.u32 %v7591_v52, %v6059_v51  ;;  %139 = vst [vmem:[#allocation3 + $0x4] sm:$0xf] %v107_v23 }
  0x50   :  { %1775 = vmatpush.bf16.msra.mxu2 %v8169_v1  ;;  %v259_v1 = vsel %vm71_vm0, 0.0, %v227_v14  ;;  %1813 = vmatmul.bf16.gmra.mxu3 %v6288_v7  ;;  %v208_v31 = vld [vmem:[#allocation2 + $0x4f] sm:$0xff]  ;;  %v399_v36 = vpack.c.bf16 %v335_v28, %v335_v28  ;;  %v271_v38 = vpack.c.bf16 %v239_v33, %v239_v33  ;;  %324 = vst [vmem:[#allocation3 + $0x12c] sm:$0xf] %v292_v26  ;;  %v229_v42 = vld [vmem:[#allocation2 + $0x1a7] sm:$0xff] }
  0x51   :  { %v291_v24 = vpack.c.bf16 %v259_v1, %v259_v1  ;;  %v272_v41 = vpack.c.bf16 %v208_v31, %v208_v31  ;;  %v230_v44 = vld [vmem:[#allocation2 + $0x1af] sm:$0xff]  ;;  %v261_v45 = vsel %vm71_vm0, 0.0, %v229_v42  ;;  %1069 = vmatpush.bf16.msrb.mxu1 %v7616_v19 }
  0x52   :  { %431 = vst [vmem:[#allocation3 + $0x38] sm:$0xf] %v399_v36  ;;  %v293_v46 = vpack.c.bf16 %v261_v45, %v261_v45  ;;  %v294_v47 = vpack.c.bf16 %v230_v44, %v230_v44  ;;  %v209_v63 = vld [vmem:[#allocation2 + $0x67] sm:$0xff]  ;;  %v7615_v26 = vld [vmem:[#allocation8 + $0x110] sm:$0xff] }
  0x53   :  { %323 = vst [vmem:[#allocation3 + $0x120] sm:$0xf] %v291_v24  ;;  %v6299_v60 = vld [vmem:[#allocation3 + $0xa8] sm:$0xf]  ;;  %v241_v3 = vsel %vm71_vm0, 0.0, %v209_v63  ;;  %v108_v24 = vpack.c.bf16 %v8221_v10, %v8221_v10  ;;  %v340_v27 = vld [vmem:[#allocation2 + $0x91] sm:$0xff] }
  0x54   :  { %1776 = vmatpush.bf16.msra.mxu2 %v8172_v4  ;;  %v368_v4 = vsel %vm74_vm1, 0.0, %v336_v30  ;;  %303 = vst [vmem:[#allocation3 + $0x30] sm:$0xf] %v271_v38  ;;  %v7651_v61 = vld [vmem:[#allocation3 + $0xb0] sm:$0xf0]  ;;  %v273_v7 = vpack.c.bf16 %v241_v3, %v241_v3  ;;  %v339_v28 = vld [vmem:[#allocation2 + $0x89] sm:$0xff] }
  0x55   :  { %v400_v40 = vpack.c.bf16 %v368_v4, %v368_v4  ;;  %304 = vst [vmem:[#allocation3 + $0x3c] sm:$0xf] %v272_v41  ;;  %v338_v55 = vld [vmem:[#allocation2 + $0x71] sm:$0xff]  ;;  %v6300_v6 = vor.u32 %v7651_v61, %v6299_v60  ;;  %v372_v30 = vsel %vm74_vm1, 0.0, %v340_v27  ;;  %v403_v31 = vpack.c.bf16 %v339_v28, %v339_v28  ;;  %1070 = vmatpush.bf16.msrb.mxu1 %v7615_v26  ;;  %v7614_v5 = vld [vmem:[#allocation8 + $0x108] sm:$0xff] }
  0x56   :  { %989 = vmatmul.bf16.gmra.mxu0 %v5940_v43  ;;  %325 = vst [vmem:[#allocation3 + $0x138] sm:$0xf] %v293_v46  ;;  %v370_v58 = vsel %vm74_vm1, 0.0, %v338_v55  ;;  %v210_v2 = vld [vmem:[#allocation2 + $0x6f] sm:$0xff]  ;;  %v404_v33 = vpack.c.bf16 %v372_v30, %v372_v30  ;;  %v109_v46 = vpack.c.bf16 %v8235_v29, %v8235_v29  ;;  %v6323_v61 = vld [vmem:[#allocation3 + $0xd8] sm:$0xf] }
  0x57   :  { %432 = vst [vmem:[#allocation3 + $0x44] sm:$0xf] %v400_v40  ;;  %v402_v62 = vpack.c.bf16 %v370_v58, %v370_v58  ;;  %v274_v14 = vpack.c.bf16 %v210_v2, %v210_v2  ;;  %v7594_v4 = vld [vmem:[#allocation3 + $0x128] sm:$0xf0]  ;;  %v7613_v40 = vld [vmem:[#allocation8 + $0x100] sm:$0xff]  ;;  %v342_v51 = vld [vmem:[#allocation2 + $0xb1] sm:$0xff] }
  0x58   :  { %1777 = vmatpush.bf16.msra.mxu2 %v8177_v11  ;;  %v337_v11 = vld [vmem:[#allocation2 + $0x69] sm:$0xff]  ;;  %326 = vst [vmem:[#allocation3 + $0x144] sm:$0xf] %v294_v47  ;;  %v110_v47 = vpack.c.bf16 %v8237_v32, %v8237_v32  ;;  %v7657_v32 = vld [vmem:[#allocation3 + $0xe0] sm:$0xf0] }
  0x59   :  { %v401_v59 = vpack.c.bf16 %v337_v11, %v337_v11  ;;  %434 = vst [vmem:[#allocation3 + $0x5c] sm:$0xf] %v402_v62  ;;  %v5959_v36 = vld [vmem:[#allocation3 + $0x38] sm:$0xf]  ;;  %1071 = vmatpush.bf16.msrb.mxu1 %v7614_v5  ;;  %v374_v11 = vsel %vm74_vm1, 0.0, %v342_v51  ;;  %v7680_v3 = vld [vmem:[#allocation8 + $0x48] sm:$0xff] }
  0x5a   :  { %305 = vst [vmem:[#allocation3 + $0x48] sm:$0xf] %v273_v7  ;;  %v6071_v10 = vld [vmem:[#allocation3 + $0x120] sm:$0xf]  ;;  %v7570_v2 = vld [vmem:[#allocation3 + $0x68] sm:$0xf0] }
  0x5b   :  { %433 = vst [vmem:[#allocation3 + $0x50] sm:$0xf] %v401_v59  ;;  %v5951_v1 = vld [vmem:[#allocation3 + $0x30] sm:$0xf]  ;;  %v6072_v41 = vor.u32 %v7594_v4, %v6071_v10  ;;  %v7660_v30 = vld [vmem:[#allocation3 + $0xf8] sm:$0xf0] }
  0x5c   :  { %1778 = vmatpush.bf16.msra.mxu2 %v8183_v16  ;;  %v5948_v16 = vor.u32 %v7562_v57, %v5947_v53  ;;  %306 = vst [vmem:[#allocation3 + $0x54] sm:$0xf] %v274_v14  ;;  %v341_v53 = vld [vmem:[#allocation2 + $0xa9] sm:$0xff]  ;;  %v406_v57 = vpack.c.bf16 %v374_v11, %v374_v11  ;;  %v346_v10 = vld [vmem:[#allocation2 + $0xf1] sm:$0xff] }
  0x5d   :  { %140 = vst [vmem:[#allocation3 + $0x10] sm:$0xf] %v108_v24  ;;  %1072 = vmatpush.bf16.msrb.mxu1 %v7613_v40  ;;  %v405_v55 = vpack.c.bf16 %v341_v53, %v341_v53  ;;  %v6083_v58 = vld [vmem:[#allocation3 + $0x138] sm:$0xf]  ;;  %v343_v14 = vld [vmem:[#allocation2 + $0xc9] sm:$0xff]  ;;  %v114_v40 = vpack.c.bf16 %v8273_v17, %v8273_v17  ;;  %v7679_v53 = vld [vmem:[#allocation8 + $0x40] sm:$0xff] }
  0x5e   :  { %435 = vst [vmem:[#allocation3 + $0x68] sm:$0xf] %v403_v31  ;;  %v7565_v38 = vld [vmem:[#allocation3 + $0x40] sm:$0xf0]  ;;  %v407_v20 = vpack.c.bf16 %v343_v14, %v343_v14  ;;  %v6335_v28 = vld [vmem:[#allocation3 + $0xf0] sm:$0xf] }
  0x5f   :  { %1039 = vmatmul.bf16.gmra.mxu1 %v6060_v0  ;;  %1167 = vmatmul.bf16.gmra.mxu2 %v5948_v16  ;;  %436 = vst [vmem:[#allocation3 + $0x74] sm:$0xf] %v404_v33  ;;  %v5960_v42 = vor.u32 %v7565_v38, %v5959_v36  ;;  %v7597_v59 = vld [vmem:[#allocation3 + $0x140] sm:$0xf0]  ;;  %v6324_v0 = vor.u32 %v7657_v32, %v6323_v61  ;;  %v5975_v16 = vld [vmem:[#allocation3 + $0x60] sm:$0xf] }
  0x60   :  { %1779 = vmatpush.bf16.msra.mxu2 %v8194_v25  ;;  %1818 = vmatmul.bf16.gmra.mxu3 %v6300_v6  ;;  %v7564_v25 = vld [vmem:[#allocation3 + $0x38] sm:$0xf0]  ;;  %141 = vst [vmem:[#allocation3 + $0x1c] sm:$0xf] %v109_v46  ;;  %v6084_v62 = vor.u32 %v7597_v59, %v6083_v58  ;;  %v344_v6 = vld [vmem:[#allocation2 + $0xd1] sm:$0xff]  ;;  %v5976_v7 = vor.u32 %v7570_v2, %v5975_v16  ;;  %v345_v38 = vld [vmem:[#allocation2 + $0xe9] sm:$0xff] }
  0x61   :  { %v5963_v44 = vld [vmem:[#allocation3 + $0x48] sm:$0xf]  ;;  %142 = vst [vmem:[#allocation3 + $0x28] sm:$0xf] %v110_v47  ;;  %v7568_v60 = vld [vmem:[#allocation3 + $0x58] sm:$0xf0]  ;;  %v6336_v5 = vor.u32 %v7660_v30, %v6335_v28 }
  0x62   :  { %437 = vst [vmem:[#allocation3 + $0x80] sm:$0xf] %v405_v55  ;;  %v5971_v29 = vld [vmem:[#allocation3 + $0x50] sm:$0xf]  ;;  %v376_v19 = vsel %vm74_vm1, 0.0, %v344_v6  ;;  %v7744_v36 = vld [vmem:[#allocation8 + $0x1b8] sm:$0xff] }
  0x63   :  { %v7567_v45 = vld [vmem:[#allocation3 + $0x50] sm:$0xf0]  ;;  %438 = vst [vmem:[#allocation3 + $0x8c] sm:$0xf] %v406_v57  ;;  %v5972_v63 = vor.u32 %v7568_v60, %v5971_v29  ;;  %v408_v23 = vpack.c.bf16 %v376_v19, %v376_v19  ;;  %v7557_v24 = vld [vmem:[#allocation3 + $0x4] sm:$0xf]  ;;  %2569 = vmatpush.bf16.msra.mxu1 %v7744_v36  ;;  %v117_v36 = vpack.c.bf16 %v8189_v21, %v8189_v21 }
  0x64   :  { %1780 = vmatpush.bf16.msra.mxu2 %v8202_v37  ;;  %v5952_v37 = vor.u32 %v7564_v25, %v5951_v1  ;;  %v5964_v52 = vor.u32 %v7567_v45, %v5963_v44  ;;  %v111_v1 = vpack.c.bf16 %v8262_v48, %v8262_v48  ;;  %v112_v25 = vpack.c.bf16 %v8264_v50, %v8264_v50  ;;  %v5929_v26 = vld [vmem:[#allocation3 + $0xc] sm:$0xf0]  ;;  %v5987_v48 = vld [vmem:[#allocation3 + $0x78] sm:$0xf]  ;;  %v7573_v50 = vld [vmem:[#allocation3 + $0x80] sm:$0xf0] }
  0x65   :  { %v5983_v27 = vld [vmem:[#allocation3 + $0x68] sm:$0xf]  ;;  %439 = vst [vmem:[#allocation3 + $0x98] sm:$0xf] %v407_v20  ;;  %v5932_v31 = vor.u32 %v7557_v24, %v5929_v26  ;;  %v5988_v4 = vor.u32 %v7573_v50, %v5987_v48  ;;  %v7663_v51 = vld [vmem:[#allocation3 + $0x110] sm:$0xf0] }
  0x66   :  { %994 = vmatmul.bf16.gmra.mxu0 %v5952_v37  ;;  %143 = vst [vmem:[#allocation3 + $0x34] sm:$0xf] %v111_v1  ;;  %v7571_v37 = vld [vmem:[#allocation3 + $0x70] sm:$0xf0]  ;;  %v6347_v47 = vld [vmem:[#allocation3 + $0x108] sm:$0xf] }
  0x67   :  { %144 = vst [vmem:[#allocation3 + $0x40] sm:$0xf] %v112_v25  ;;  %v5984_v33 = vor.u32 %v7571_v37, %v5983_v27  ;;  %v7560_v44 = vld [vmem:[#allocation3 + $0x1c] sm:$0xf]  ;;  %v7693_v17 = vld [vmem:[#allocation8 + $0xb0] sm:$0xff]  ;;  %v6348_v11 = vor.u32 %v7663_v51, %v6347_v47  ;;  %v7692_v55 = vld [vmem:[#allocation8 + $0xa8] sm:$0xff] }
  0x68   :  { %1781 = vmatpush.bf16.msra.mxu2 %v8209_v49  ;;  %v6311_v49 = vld [vmem:[#allocation3 + $0xc0] sm:$0xf]  ;;  %440 = vst [vmem:[#allocation3 + $0xa4] sm:$0xf] %v408_v23  ;;  %v5941_v45 = vld [vmem:[#allocation3 + $0x24] sm:$0xf0] }
  0x69   :  { %v6312_v43 = vor.u32 %v7654_v39, %v6311_v49  ;;  %v378_v49 = vsel %vm74_vm1, 0.0, %v346_v10  ;;  %v113_v39 = vpack.c.bf16 %v8271_v9, %v8271_v9  ;;  %146 = vst [vmem:[#allocation3 + $0x58] sm:$0xf] %v114_v40  ;;  %v5944_v9 = vor.u32 %v7560_v44, %v5941_v45  ;;  %v5999_v57 = vld [vmem:[#allocation3 + $0x90] sm:$0xf]  ;;  %v7691_v60 = vld [vmem:[#allocation8 + $0xa0] sm:$0xff] }
  0x6a   :  { %v7574_v46 = vld [vmem:[#allocation3 + $0x88] sm:$0xf0]  ;;  %v7576_v58 = vld [vmem:[#allocation3 + $0x98] sm:$0xf0]  ;;  %v348_v59 = vld [vmem:[#allocation2 + $0x111] sm:$0xff] }
  0x6b   :  { %145 = vst [vmem:[#allocation3 + $0x4c] sm:$0xf] %v113_v39  ;;  %v6000_v29 = vor.u32 %v7576_v58, %v5999_v57  ;;  %v347_v61 = vld [vmem:[#allocation2 + $0x109] sm:$0xff]  ;;  %v380_v32 = vsel %vm74_vm1, 0.0, %v348_v59  ;;  %v7690_v16 = vld [vmem:[#allocation8 + $0x98] sm:$0xff]  ;;  %v7687_v48 = vld [vmem:[#allocation8 + $0x80] sm:$0xff] }
  0x6c   :  { %1782 = vmatpush.bf16.msra.mxu2 %v8215_v56  ;;  %v7681_v56 = vld [vmem:[#allocation8 + $0x50] sm:$0xff]  ;;  %v412_v2 = vpack.c.bf16 %v380_v32, %v380_v32  ;;  %v6359_v19 = vld [vmem:[#allocation3 + $0x120] sm:$0xf]  ;;  %v7666_v1 = vld [vmem:[#allocation3 + $0x128] sm:$0xf0] }
  0x6d   :  { %1859 = vmatpush.bf16.msrb.mxu3 %v7681_v56  ;;  %v5995_v56 = vld [vmem:[#allocation3 + $0x80] sm:$0xf]  ;;  %v7689_v20 = vld [vmem:[#allocation8 + $0x90] sm:$0xff]  ;;  %v6360_v23 = vor.u32 %v7666_v1, %v6359_v19  ;;  %v7688_v24 = vld [vmem:[#allocation8 + $0x88] sm:$0xff]  ;;  %149 = vst [vmem:[#allocation3 + $0x7c] sm:$0xf] %v117_v36  ;;  %v122_v36 = vpack.c.bf16 %v8258_v35, %v8258_v35 }
  0x6e   :  { %v5953_v6 = vld [vmem:[#allocation3 + $0x3c] sm:$0xf0]  ;;  %444 = vst [vmem:[#allocation3 + $0xd4] sm:$0xf] %v412_v2  ;;  %v6011_v26 = vld [vmem:[#allocation3 + $0xa8] sm:$0xf] }
  0x6f   :  { %1044 = vmatmul.bf16.gmra.mxu1 %v6072_v41  ;;  %1172 = vmatmul.bf16.gmra.mxu2 %v5960_v42  ;;  %v409_v41 = vpack.c.bf16 %v345_v38, %v345_v38  ;;  %v7694_v42 = vld [vmem:[#allocation8 + $0xb8] sm:$0xff]  ;;  %v7577_v14 = vld [vmem:[#allocation3 + $0xa0] sm:$0xf0]  ;;  %v7579_v27 = vld [vmem:[#allocation3 + $0xb0] sm:$0xf0]  ;;  %v118_v38 = vpack.c.bf16 %v8211_v54, %v8211_v54 }
  0x70   :  { %1823 = vmatmul.bf16.gmra.mxu3 %v6312_v43  ;;  %v410_v43 = vpack.c.bf16 %v378_v49, %v378_v49  ;;  %1933 = vmatpush.bf16.msrb.mxu0 %v7694_v42  ;;  %v7760_v37 = vld [vmem:[#allocation8 + $0x238] sm:$0xff]  ;;  %v349_v50 = vld [vmem:[#allocation2 + $0x129] sm:$0xff]  ;;  %v7669_v45 = vld [vmem:[#allocation3 + $0x140] sm:$0xf0]  ;;  %154 = vst [vmem:[#allocation3 + $0xb8] sm:$0xf] %v122_v36 }
  0x71   :  { %1860 = vmatpush.bf16.msrb.mxu3 %v7680_v3  ;;  %441 = vst [vmem:[#allocation3 + $0xb0] sm:$0xf] %v409_v41  ;;  %v7563_v3 = vld [vmem:[#allocation3 + $0x34] sm:$0xf]  ;;  %v413_v49 = vpack.c.bf16 %v349_v50, %v349_v50  ;;  %v5965_v41 = vld [vmem:[#allocation3 + $0x54] sm:$0xf0] }
  0x72   :  { %442 = vst [vmem:[#allocation3 + $0xbc] sm:$0xf] %v410_v43  ;;  %v350_v30 = vld [vmem:[#allocation2 + $0x131] sm:$0xff]  ;;  %v7566_v40 = vld [vmem:[#allocation3 + $0x4c] sm:$0xf] }
  0x73   :  { %v382_v10 = vsel %vm74_vm1, 0.0, %v350_v30  ;;  %150 = vst [vmem:[#allocation3 + $0x88] sm:$0xf] %v118_v38  ;;  %v6371_v44 = vld [vmem:[#allocation3 + $0x138] sm:$0xf]  ;;  %v5968_v54 = vor.u32 %v7566_v40, %v5965_v41  ;;  %v351_v57 = vld [vmem:[#allocation2 + $0x149] sm:$0xff] }
  0x74   :  { %1934 = vmatpush.bf16.msrb.mxu0 %v7693_v17  ;;  %v414_v39 = vpack.c.bf16 %v382_v10, %v382_v10  ;;  %445 = vst [vmem:[#allocation3 + $0xe0] sm:$0xf] %v413_v49  ;;  %v6372_v51 = vor.u32 %v7669_v45, %v6371_v44  ;;  %v352_v17 = vld [vmem:[#allocation2 + $0x151] sm:$0xff]  ;;  %v415_v32 = vpack.c.bf16 %v351_v57, %v351_v57  ;;  %v7742_v30 = vld [vmem:[#allocation8 + $0x1a8] sm:$0xff] }
  0x75   :  { %1861 = vmatpush.bf16.msrb.mxu3 %v7679_v53  ;;  %v384_v58 = vsel %vm74_vm1, 0.0, %v352_v17  ;;  %v7583_v2 = vld [vmem:[#allocation3 + $0xd0] sm:$0xf0]  ;;  %v121_v10 = vpack.c.bf16 %v8256_v34, %v8256_v34  ;;  %v6229_v44 = vld [vmem:[#allocation3 + $0x24] sm:$0xf0] }
  0x76   :  { %999 = vmatmul.bf16.gmra.mxu0 %v5964_v52  ;;  %v5996_v52 = vor.u32 %v7574_v46, %v5995_v56  ;;  %446 = vst [vmem:[#allocation3 + $0xec] sm:$0xf] %v414_v39  ;;  %v7572_v39 = vld [vmem:[#allocation3 + $0x7c] sm:$0xf]  ;;  %v7637_v17 = vld [vmem:[#allocation3 + $0x40] sm:$0xf0] }
  0x77   :  { %447 = vst [vmem:[#allocation3 + $0xf8] sm:$0xf] %v415_v32  ;;  %v356_v57 = vld [vmem:[#allocation2 + $0x191] sm:$0xff] }
  0x78   :  { %1935 = vmatpush.bf16.msrb.mxu0 %v7692_v55  ;;  %v6019_v42 = vld [vmem:[#allocation3 + $0xb0] sm:$0xf]  ;;  %153 = vst [vmem:[#allocation3 + $0xac] sm:$0xf] %v121_v10  ;;  %v388_v32 = vsel %vm74_vm1, 0.0, %v356_v57  ;;  %v8001_v57 = vld [vmem:[#allocation2 + $0x128] sm:$0xff] }
  0x79   :  { %2727 = vmatpush.bf16.msra.mxu3 %v7760_v37  ;;  %v7580_v43 = vld [vmem:[#allocation3 + $0xb8] sm:$0xf0] }
  0x7a   :  { %v6020_v46 = vor.u32 %v7580_v43, %v6019_v42  ;;  %v5989_v40 = vld [vmem:[#allocation3 + $0x84] sm:$0xf0]  ;;  %v7632_v43 = vld [vmem:[#allocation3 + $0x1c] sm:$0xf] }
  0x7b   :  { %v6043_v41 = vld [vmem:[#allocation3 + $0xe0] sm:$0xf] }
  0x7c   :  { %1936 = vmatpush.bf16.msrb.mxu0 %v7691_v60  ;;  %v119_v60 = vpack.c.bf16 %v8223_v15, %v8223_v15 }
  0x7d   :  { %v7586_v42 = vld [vmem:[#allocation3 + $0xe8] sm:$0xf0] }
  0x7e   :  { %151 = vst [vmem:[#allocation3 + $0x94] sm:$0xf] %v119_v60  ;;  %v6044_v35 = vor.u32 %v7586_v42, %v6043_v41  ;;  %v358_v42 = vld [vmem:[#allocation2 + $0x1b1] sm:$0xff] }
  0x7f   :  { %1049 = vmatmul.bf16.gmra.mxu1 %v6084_v62  ;;  %1177 = vmatmul.bf16.gmra.mxu2 %v5972_v63  ;;  %v115_v62 = vpack.c.bf16 %v8179_v12, %v8179_v12  ;;  %v116_v63 = vpack.c.bf16 %v8181_v13, %v8181_v13  ;;  %v5956_v12 = vor.u32 %v7563_v3, %v5953_v6  ;;  %v7629_v3 = vld [vmem:[#allocation3 + $0x4] sm:$0xf]  ;;  %v6217_v6 = vld [vmem:[#allocation3 + $0xc] sm:$0xf0] }
  0x80   :  { %1828 = vmatmul.bf16.gmra.mxu3 %v6324_v0  ;;  %v411_v0 = vpack.c.bf16 %v347_v61, %v347_v61  ;;  %1937 = vmatpush.bf16.msrb.mxu0 %v7690_v16  ;;  %v120_v61 = vpack.c.bf16 %v8227_v18, %v8227_v18  ;;  %v7759_v18 = vld [vmem:[#allocation8 + $0x230] sm:$0xff] }
  0x81   :  { %147 = vst [vmem:[#allocation3 + $0x64] sm:$0xf] %v115_v62  ;;  %v416_v62 = vpack.c.bf16 %v384_v58, %v384_v58  ;;  %2728 = vmatpush.bf16.msra.mxu3 %v7759_v18 }
  0x82   :  { %148 = vst [vmem:[#allocation3 + $0x70] sm:$0xf] %v116_v63 }
  0x83   :  { %443 = vst [vmem:[#allocation3 + $0xc8] sm:$0xf] %v411_v0 }
  0x84   :  { %1938 = vmatpush.bf16.msrb.mxu0 %v7689_v20  ;;  %152 = vst [vmem:[#allocation3 + $0xa0] sm:$0xf] %v120_v61  ;;  %v6235_v20 = vld [vmem:[#allocation3 + $0x20] sm:$0xf]  ;;  %v355_v61 = vld [vmem:[#allocation2 + $0x189] sm:$0xff] }
  0x85   :  { %448 = vst [vmem:[#allocation3 + $0x104] sm:$0xf] %v416_v62  ;;  %v7575_v18 = vld [vmem:[#allocation3 + $0x94] sm:$0xf] }
  0x86   :  { %1004 = vmatmul.bf16.gmra.mxu0 %v5976_v7  ;;  %v6007_v7 = vld [vmem:[#allocation3 + $0x98] sm:$0xf] }
  0x87   :  { %v6008_v25 = vor.u32 %v7577_v14, %v6007_v7 }
  0x88   :  { %1939 = vmatpush.bf16.msrb.mxu0 %v7688_v24  ;;  %v7569_v63 = vld [vmem:[#allocation3 + $0x64] sm:$0xf] }
  0x89   :  { %v5977_v0 = vld [vmem:[#allocation3 + $0x6c] sm:$0xf0] }
  0x8a   :  { %v6031_v16 = vld [vmem:[#allocation3 + $0xc8] sm:$0xf]  ;;  %v5980_v15 = vor.u32 %v7569_v63, %v5977_v0 }
  0x8b   :  { %v6032_v19 = vor.u32 %v7583_v2, %v6031_v16  ;;  %v7999_v0 = vld [vmem:[#allocation2 + $0x108] sm:$0xff]  ;;  %v8000_v2 = vld [vmem:[#allocation2 + $0x110] sm:$0xff] }
  0x8c   :  { %1940 = vmatpush.bf16.msrb.mxu0 %v7687_v48  ;;  %v123_v16 = vpack.c.bf16 %v7999_v0, %v7999_v0 }
  0x8e   :  { %155 = vst [vmem:[#allocation3 + $0xc4] sm:$0xf] %v123_v16 }
  0x8f   :  { %1073 = vmatmul.bf16.vlgmr.msrb.gmra.mxu1 %v5932_v31  ;;  %1182 = vmatmul.bf16.gmra.mxu2 %v5984_v33  ;;  %v6012_v33 = vor.u32 %v7579_v27, %v6011_v26  ;;  %v354_v26 = vld [vmem:[#allocation2 + $0x171] sm:$0xff] }
  0x90   :  { %1833 = vmatmul.bf16.gmra.mxu3 %v6336_v5  ;;  %v7743_v5 = vld [vmem:[#allocation8 + $0x1b0] sm:$0xff] }
  0x91   :  { %2570 = vmatpush.bf16.msra.mxu1 %v7743_v5  ;;  %v386_v5 = vsel %vm74_vm1, 0.0, %v354_v26  ;;  %v7635_v26 = vld [vmem:[#allocation3 + $0x34] sm:$0xf] }
  0x92   :  { %v418_v49 = vpack.c.bf16 %v386_v5, %v386_v5 }
  0x94   :  { %450 = vst [vmem:[#allocation3 + $0x11c] sm:$0xf] %v418_v49 }
  0x95   :  { %2571 = vmatpush.bf16.msra.mxu1 %v7742_v30 }
  0x96   :  { %1009 = vmatmul.bf16.gmra.mxu0 %v5988_v4 }
  0x9f   :  { %1078 = vmatmul.bf16.gmra.mxu1 %v5944_v9  ;;  %1187 = vmatmul.bf16.gmra.mxu2 %v5996_v52  ;;  %v6223_v9 = vld [vmem:[#allocation3 + $0x8] sm:$0xf]  ;;  %v7631_v52 = vld [vmem:[#allocation3 + $0x10] sm:$0xf0] }
  0xa0   :  { %1838 = vmatmul.bf16.gmra.mxu3 %v6348_v11  ;;  %v6224_v55 = vor.u32 %v7631_v52, %v6223_v9  ;;  %v6247_v52 = vld [vmem:[#allocation3 + $0x38] sm:$0xf] }
  0xa1   :  { %v6248_v60 = vor.u32 %v7637_v17, %v6247_v52 }
  0xa6   :  { %1014 = vmatmul.bf16.gmra.mxu0 %v6000_v29 }
  0xac   :  { %v8326_v13 = vpop.f32.mrf.mxu1 }
  0xaf   :  { %1083 = vmatmul.bf16.gmra.mxu1 %v5956_v12  ;;  %1192 = vmatmul.bf16.gmra.mxu2 %v6008_v25  ;;  %v6220_v12 = vor.u32 %v7629_v3, %v6217_v6  ;;  %v124_v3 = vpack.c.bf16 %v8000_v2, %v8000_v2  ;;  %v419_v6 = vpack.c.bf16 %v355_v61, %v355_v61  ;;  %v8002_v61 = vld [vmem:[#allocation2 + $0x130] sm:$0xff]  ;;  %v7578_v2 = vld [vmem:[#allocation3 + $0xac] sm:$0xf] }
  0xb0   :  { %1843 = vmatmul.bf16.gmra.mxu3 %v6360_v23  ;;  %v7634_v23 = vld [vmem:[#allocation3 + $0x28] sm:$0xf0] }
  0xb1   :  { %v6236_v37 = vor.u32 %v7634_v23, %v6235_v20  ;;  %156 = vst [vmem:[#allocation3 + $0xd0] sm:$0xf] %v124_v3  ;;  %v6055_v20 = vld [vmem:[#allocation3 + $0xf8] sm:$0xf]  ;;  %v7589_v23 = vld [vmem:[#allocation3 + $0x100] sm:$0xf0] }
  0xb2   :  { %v8328_v28 = vpop.f32.mrf.mxu2  ;;  %451 = vst [vmem:[#allocation3 + $0x128] sm:$0xf] %v419_v6  ;;  %v6056_v10 = vor.u32 %v7589_v23, %v6055_v20  ;;  %v6013_v3 = vld [vmem:[#allocation3 + $0xb4] sm:$0xf0] }
  0xb3   :  { %9505 = vst [vmem:[#allocation17_spill] sm:$0xff] %v8328_v28  ;;  %v8330_v31 = vpop.f32.mrf.mxu3  ;;  %v6016_v23 = vor.u32 %v7578_v2, %v6013_v3  ;;  %v7814_v28 = vld [vmem:[#allocation10 + $0xe8] sm:$0xff] }
  0xb4   :  { %v8334_v4 = vpop.f32.mrf.mxu1 }
  0xb6   :  { %1019 = vmatmul.bf16.gmra.mxu0 %v6012_v33  ;;  %v353_v33 = vld [vmem:[#allocation2 + $0x169] sm:$0xff] }
  0xb7   :  { %v417_v38 = vpack.c.bf16 %v353_v33, %v353_v33 }
  0xb9   :  { %449 = vst [vmem:[#allocation3 + $0x110] sm:$0xf] %v417_v38 }
  0xba   :  { %v8340_v56 = vpop.f32.mrf.mxu2 }
  0xbb   :  { %9506 = vst [vmem:[#allocation18_spill] sm:$0xff] %v8340_v56  ;;  %v8342_v21 = vpop.f32.mrf.mxu3  ;;  %v7658_v56 = vld [vmem:[#allocation3 + $0xe8] sm:$0xf0] }
  0xbc   :  { %v8344_v47 = vpop.f32.mrf.mxu1 }
  0xbf   :  { %1088 = vmatmul.bf16.gmra.mxu1 %v5968_v54  ;;  %1197 = vmatmul.bf16.gmra.mxu2 %v6020_v46  ;;  %v5992_v54 = vor.u32 %v7572_v39, %v5989_v40  ;;  %v6259_v39 = vld [vmem:[#allocation3 + $0x50] sm:$0xf]  ;;  %v7640_v40 = vld [vmem:[#allocation3 + $0x58] sm:$0xf0] }
  0xc0   :  { %1848 = vmatmul.bf16.gmra.mxu3 %v6372_v51  ;;  %v6232_v51 = vor.u32 %v7632_v43, %v6229_v44  ;;  %v6260_v44 = vor.u32 %v7640_v40, %v6259_v39  ;;  %v6067_v6 = vld [vmem:[#allocation3 + $0x110] sm:$0xf]  ;;  %v7643_v39 = vld [vmem:[#allocation3 + $0x70] sm:$0xf0] }
  0xc2   :  { %v8346_v53 = vpop.f32.mrf.mxu2 }
  0xc3   :  { %9507 = vst [vmem:[#allocation19_spill] sm:$0xff] %v8346_v53  ;;  %v8348_v11 = vpop.f32.mrf.mxu3  ;;  %v8354_v29 = vpop.f32.mrf.mxu0  ;;  %v7644_v53 = vld [vmem:[#allocation3 + $0x7c] sm:$0xf] }
  0xc4   :  { %v8352_v59 = vpop.f32.mrf.mxu1 }
  0xc6   :  { %1941 = vmatmul.bf16.vlgmr.msrb.gmra.mxu0 %v6224_v55 }
  0xca   :  { %v8360_v7 = vpop.f32.mrf.mxu2 }
  0xcb   :  { %9508 = vst [vmem:[#allocation20_spill] sm:$0xff] %v8360_v7  ;;  %v8362_v14 = vpop.f32.mrf.mxu3  ;;  %v8366_v25 = vpop.f32.mrf.mxu0 }
  0xcc   :  { %v8364_v1 = vpop.f32.mrf.mxu1 }
  0xcf   :  { %1093 = vmatmul.bf16.gmra.mxu1 %v5980_v15  ;;  %1202 = vmatmul.bf16.gmra.mxu2 %v6032_v19  ;;  %v7758_v15 = vld [vmem:[#allocation8 + $0x228] sm:$0xff]  ;;  %v420_v19 = vpack.c.bf16 %v388_v32, %v388_v32  ;;  %v126_v32 = vpack.c.bf16 %v8002_v61, %v8002_v61 }
  0xd0   :  { %1862 = vmatmul.bf16.vlgmr.msrb.gmra.mxu3 %v6220_v12  ;;  %v6001_v12 = vld [vmem:[#allocation3 + $0x9c] sm:$0xf0] }
  0xd1   :  { %2729 = vmatpush.bf16.msra.mxu3 %v7758_v15  ;;  %452 = vst [vmem:[#allocation3 + $0x134] sm:$0xf] %v420_v19  ;;  %v6004_v5 = vor.u32 %v7575_v18, %v6001_v12  ;;  %v7592_v15 = vld [vmem:[#allocation3 + $0x118] sm:$0xf0]  ;;  %v7638_v19 = vld [vmem:[#allocation3 + $0x4c] sm:$0xf] }
  0xd2   :  { %v8368_v24 = vpop.f32.mrf.mxu2  ;;  %158 = vst [vmem:[#allocation3 + $0xe8] sm:$0xf] %v126_v32  ;;  %v6253_v18 = vld [vmem:[#allocation3 + $0x54] sm:$0xf0]  ;;  %v8003_v32 = vld [vmem:[#allocation2 + $0x148] sm:$0xff] }
  0xd3   :  { %v8370_v27 = vpop.f32.mrf.mxu3  ;;  %v8376_v50 = vpop.f32.mrf.mxu0 }
  0xd4   :  { %v8374_v48 = vpop.f32.mrf.mxu1 }
  0xd6   :  { %1946 = vmatmul.bf16.gmra.mxu0 %v6236_v37  ;;  %v6241_v37 = vld [vmem:[#allocation3 + $0x3c] sm:$0xf0] }
  0xd7   :  { %v6244_v38 = vor.u32 %v7635_v26, %v6241_v37  ;;  %v6068_v26 = vor.u32 %v7592_v15, %v6067_v6  ;;  %v8439_v15 = vld [vmem:[%s9495_s2] ss:$0 sm:$0xff] }
  0xda   :  { %v8382_v45 = vpop.f32.mrf.mxu2 }
  0xdb   :  { %v8384_v34 = vpop.f32.mrf.mxu3  ;;  %v8388_v9 = vpop.f32.mrf.mxu0 }
  0xdc   :  { %v8386_v46 = vpop.f32.mrf.mxu1 }
  0xdf   :  { %1098 = vmatmul.bf16.gmra.mxu1 %v5992_v54  ;;  %1207 = vmatmul.bf16.gmra.mxu2 %v6044_v35  ;;  %v7741_v54 = vld [vmem:[#allocation8 + $0x1a0] sm:$0xff]  ;;  %v357_v35 = vld [vmem:[#allocation2 + $0x1a9] sm:$0xff] }
  0xe0   :  { %1867 = vmatmul.bf16.gmra.mxu3 %v6232_v51  ;;  %v390_v51 = vsel %vm74_vm1, 0.0, %v358_v42  ;;  %v421_v0 = vpack.c.bf16 %v357_v35, %v357_v35  ;;  %2572 = vmatpush.bf16.msra.mxu1 %v7741_v54  ;;  %v360_v42 = vld [vmem:[#allocation2 + $0x1d1] sm:$0xff]  ;;  %v7757_v35 = vld [vmem:[#allocation8 + $0x220] sm:$0xff] }
  0xe1   :  { %v422_v16 = vpack.c.bf16 %v390_v51, %v390_v51  ;;  %v359_v51 = vld [vmem:[#allocation2 + $0x1c9] sm:$0xff]  ;;  %2730 = vmatpush.bf16.msra.mxu3 %v7757_v35 }
  0xe2   :  { %v8390_v55 = vpop.f32.mrf.mxu2  ;;  %453 = vst [vmem:[#allocation3 + $0x140] sm:$0xf] %v421_v0  ;;  %v127_v0 = vpack.c.bf16 %v8003_v32, %v8003_v32  ;;  %v423_v3 = vpack.c.bf16 %v359_v51, %v359_v51 }
  0xe3   :  { %v8392_v58 = vpop.f32.mrf.mxu3  ;;  %v8398_v63 = vpop.f32.mrf.mxu0  ;;  %454 = vst [vmem:[#allocation3 + $0x14c] sm:$0xf] %v422_v16  ;;  %v8004_v16 = vld [vmem:[#allocation2 + $0x150] sm:$0xff] }
  0xe4   :  { %v8396_v62 = vpop.f32.mrf.mxu1  ;;  %v128_v2 = vpack.c.bf16 %v8004_v16, %v8004_v16  ;;  %159 = vst [vmem:[#allocation3 + $0xf4] sm:$0xf] %v127_v0 }
  0xe5   :  { %455 = vst [vmem:[#allocation3 + $0x158] sm:$0xf] %v423_v3  ;;  %v7646_v3 = vld [vmem:[#allocation3 + $0x88] sm:$0xf0] }
  0xe6   :  { %1951 = vmatmul.bf16.gmra.mxu0 %v6248_v60  ;;  %v125_v60 = vpack.c.bf16 %v8001_v57, %v8001_v57  ;;  %v392_v57 = vsel %vm74_vm1, 0.0, %v360_v42  ;;  %160 = vst [vmem:[#allocation3 + $0x100] sm:$0xf] %v128_v2 }
  0xe7   :  { %v424_v6 = vpack.c.bf16 %v392_v57, %v392_v57 }
  0xe8   :  { %157 = vst [vmem:[#allocation3 + $0xdc] sm:$0xf] %v125_v60 }
  0xe9   :  { %456 = vst [vmem:[#allocation3 + $0x164] sm:$0xf] %v424_v6  ;;  %v988_v6 = vadd.f32 %v8439_v15, %v8366_v25 }
  0xea   :  { %v8400_v30 = vpop.f32.mrf.mxu2  ;;  %v7598_v22 = vld [vmem:[#allocation3 + $0x148] sm:$0xf0] }
  0xeb   :  { %v8402_v33 = vpop.f32.mrf.mxu3  ;;  %v8406_v49 = vpop.f32.mrf.mxu0 }
  0xec   :  { %v8404_v36 = vpop.f32.mrf.mxu1 }
  0xef   :  { %1103 = vmatmul.bf16.gmra.mxu1 %v6004_v5  ;;  %1212 = vmatmul.bf16.gmra.mxu2 %v6056_v10  ;;  %v6256_v5 = vor.u32 %v7638_v19, %v6253_v18  ;;  %v7581_v19 = vld [vmem:[#allocation3 + $0xc4] sm:$0xf]  ;;  %v6025_v18 = vld [vmem:[#allocation3 + $0xcc] sm:$0xf0] }
  0xf0   :  { %1872 = vmatmul.bf16.gmra.mxu3 %v6244_v38  ;;  %v6271_v38 = vld [vmem:[#allocation3 + $0x68] sm:$0xf]  ;;  %v6028_v51 = vor.u32 %v7581_v19, %v6025_v18  ;;  %v362_v19 = vld [vmem:[#allocation2 + $0x1f1] sm:$0xff] }
  0xf1   :  { %v6272_v54 = vor.u32 %v7643_v39, %v6271_v38  ;;  %v7641_v38 = vld [vmem:[#allocation3 + $0x64] sm:$0xf]  ;;  %v6265_v39 = vld [vmem:[#allocation3 + $0x6c] sm:$0xf0] }
  0xf2   :  { %v8408_v41 = vpop.f32.mrf.mxu2  ;;  %v6268_v0 = vor.u32 %v7641_v38, %v6265_v39  ;;  %v361_v38 = vld [vmem:[#allocation2 + $0x1e9] sm:$0xff] }
  0xf3   :  { %v8410_v43 = vpop.f32.mrf.mxu3  ;;  %v8416_v17 = vpop.f32.mrf.mxu0 }
  0xf4   :  { %v8414_v52 = vpop.f32.mrf.mxu1 }
  0xf6   :  { %1956 = vmatmul.bf16.gmra.mxu0 %v6260_v44 }
  0xfa   :  { %v8418_v12 = vpop.f32.mrf.mxu2 }
  0xfb   :  { %v8420_v20 = vpop.f32.mrf.mxu3  ;;  %v8424_v10 = vpop.f32.mrf.mxu0 }
  0xfc   :  { %v8422_v37 = vpop.f32.mrf.mxu1 }
  0xff   :  { %1108 = vmatmul.bf16.gmra.mxu1 %v6016_v23  ;;  %1217 = vmatmul.bf16.gmra.mxu2 %v6068_v26  ;;  %v6079_v23 = vld [vmem:[#allocation3 + $0x128] sm:$0xf]  ;;  %v7595_v26 = vld [vmem:[#allocation3 + $0x130] sm:$0xf0] }
 0x100   :  { %1877 = vmatmul.bf16.gmra.mxu3 %v6256_v5  ;;  %v986_v5 = vadd.f32 %v8439_v15, %v8354_v29  ;;  %v6080_v57 = vor.u32 %v7595_v26, %v6079_v23  ;;  %v6283_v29 = vld [vmem:[#allocation3 + $0x80] sm:$0xf]  ;;  %v7740_v26 = vld [vmem:[#allocation8 + $0x198] sm:$0xff] }
 0x101   :  { %v6284_v23 = vor.u32 %v7646_v3, %v6283_v29  ;;  %2573 = vmatpush.bf16.msra.mxu1 %v7740_v26  ;;  %v7584_v29 = vld [vmem:[#allocation3 + $0xdc] sm:$0xf]  ;;  %v6037_v3 = vld [vmem:[#allocation3 + $0xe4] sm:$0xf0] }
 0x102   :  { %v8426_v40 = vpop.f32.mrf.mxu2 }
 0x103   :  { %v8428_v44 = vpop.f32.mrf.mxu3  ;;  %v8434_v61 = vpop.f32.mrf.mxu0 }
 0x104   :  { %v8432_v60 = vpop.f32.mrf.mxu1 }
 0x106   :  { %1961 = vmatmul.bf16.gmra.mxu0 %v6272_v54 }
 0x10a   :  { %v8443_v42 = vpop.f32.mrf.mxu2 }
 0x10b   :  { %v8445_v35 = vpop.f32.mrf.mxu3  ;;  %v8447_v16 = vpop.f32.mrf.mxu0 }
 0x10c   :  { %9509 = vst [vmem:[#allocation21_spill] sm:$0xff] %v8445_v35  ;;  %v1074_v32 = vpop.f32.mrf.mxu1  ;;  %v7633_v35 = vld [vmem:[#allocation3 + $0x20] sm:$0xf0] }
 0x10d   :  { %v1075_v54 = vadd.f32 %v1074_v32, %v986_v5  ;;  %v8006_v32 = vld [vmem:[#allocation2 + $0x170] sm:$0xff] }
 0x10f   :  { %v8450_v2 = vadd.f32 %v8368_v24, %v1075_v54  ;;  %1113 = vmatmul.bf16.gmra.mxu1 %v6028_v51  ;;  %1222 = vmatmul.bf16.gmra.mxu2 %v6080_v57  ;;  %v394_v24 = vsel %vm74_vm1, 0.0, %v362_v19  ;;  %v8005_v51 = vld [vmem:[#allocation2 + $0x168] sm:$0xff]  ;;  %v425_v54 = vpack.c.bf16 %v361_v38, %v361_v38  ;;  %v6091_v19 = vld [vmem:[#allocation3 + $0x140] sm:$0xf]  ;;  %v6040_v38 = vor.u32 %v7584_v29, %v6037_v3 }
 0x110   :  { %1882 = vmatmul.bf16.gmra.mxu3 %v6268_v0  ;;  %v129_v57 = vpack.c.bf16 %v8005_v51, %v8005_v51  ;;  %v130_v0 = vpack.c.bf16 %v8006_v32, %v8006_v32  ;;  %v991_v51 = vadd.f32 %v8439_v15, %v8376_v50  ;;  %v6277_v32 = vld [vmem:[#allocation3 + $0x84] sm:$0xf0]  ;;  %v6295_v50 = vld [vmem:[#allocation3 + $0x98] sm:$0xf] }
 0x111   :  { %9510 = vst [vmem:[#allocation22_spill] sm:$0xff] %v8450_v2  ;;  %v426_v2 = vpack.c.bf16 %v394_v24, %v394_v24 }
 0x112   :  { %v8454_v8 = vpop.f32.mrf.mxu2  ;;  %161 = vst [vmem:[#allocation3 + $0x10c] sm:$0xf] %v129_v57 }
 0x113   :  { %v8456_v18 = vpop.f32.mrf.mxu3  ;;  %v8460_v39 = vpop.f32.mrf.mxu0  ;;  %162 = vst [vmem:[#allocation3 + $0x118] sm:$0xf] %v130_v0 }
 0x114   :  { %9511 = vst [vmem:[#allocation23_spill] sm:$0xff] %v8456_v18  ;;  %v1076_v5 = vpop.f32.mrf.mxu1 }
 0x115   :  { %v1077_v25 = vadd.f32 %v1076_v5, %v988_v6  ;;  %457 = vst [vmem:[#allocation3 + $0x170] sm:$0xf] %v425_v54  ;;  %v6280_v5 = vor.u32 %v7644_v53, %v6277_v32  ;;  %v7649_v54 = vld [vmem:[#allocation3 + $0xa0] sm:$0xf0] }
 0x116   :  { %1966 = vmatmul.bf16.gmra.mxu0 %v6284_v23  ;;  %458 = vst [vmem:[#allocation3 + $0x17c] sm:$0xf] %v426_v2  ;;  %v7756_v2 = vld [vmem:[#allocation8 + $0x218] sm:$0xff]  ;;  %v6296_v53 = vor.u32 %v7649_v54, %v6295_v50  ;;  %v996_v50 = vadd.f32 %v8439_v15, %v8398_v63  ;;  %v7647_v54 = vld [vmem:[#allocation3 + $0x94] sm:$0xf] }
 0x117   :  { %v8463_v7 = vadd.f32 %v8382_v45, %v1077_v25  ;;  %v6092_v45 = vor.u32 %v7598_v22, %v6091_v19  ;;  %v993_v25 = vadd.f32 %v8439_v15, %v8388_v9  ;;  %2731 = vmatpush.bf16.msra.mxu3 %v7756_v2  ;;  %v6049_v9 = vld [vmem:[#allocation3 + $0xfc] sm:$0xf0]  ;;  %v6307_v63 = vld [vmem:[#allocation3 + $0xb0] sm:$0xf] }
 0x118   :  { %v6289_v2 = vld [vmem:[#allocation3 + $0x9c] sm:$0xf0] }
 0x119   :  { %9512 = vst [vmem:[#allocation24_spill] sm:$0xff] %v8463_v7 }
 0x11a   :  { %v8467_v6 = vpop.f32.mrf.mxu2 }
 0x11b   :  { %v8469_v26 = vpop.f32.mrf.mxu3  ;;  %v8471_v57 = vpop.f32.mrf.mxu0 }
 0x11c   :  { %9513 = vst [vmem:[#allocation25_spill] sm:$0xff] %v8469_v26  ;;  %v1079_v24 = vpop.f32.mrf.mxu1  ;;  %v7655_v26 = vld [vmem:[#allocation3 + $0xd0] sm:$0xf0] }
 0x11d   :  { %v1080_v23 = vadd.f32 %v1079_v24, %v991_v51  ;;  %v8008_v51 = vld [vmem:[#allocation2 + $0x190] sm:$0xff] }
 0x11e   :  { %v132_v32 = vpack.c.bf16 %v8008_v51, %v8008_v51  ;;  %v7587_v24 = vld [vmem:[#allocation3 + $0xf4] sm:$0xf] }
 0x11f   :  { %v8474_v0 = vadd.f32 %v8390_v55, %v1080_v23  ;;  %1118 = vmatmul.bf16.gmra.mxu1 %v6040_v38  ;;  %1227 = vmatmul.bf16.gmra.mxu2 %v6092_v45  ;;  %v8007_v55 = vld [vmem:[#allocation2 + $0x188] sm:$0xff]  ;;  %v7601_v23 = vld [vmem:[#allocation3 + $0x160] sm:$0xf0] }
 0x120   :  { %1887 = vmatmul.bf16.gmra.mxu3 %v6280_v5  ;;  %v131_v19 = vpack.c.bf16 %v8007_v55, %v8007_v55  ;;  %164 = vst [vmem:[#allocation3 + $0x130] sm:$0xf] %v132_v32  ;;  %v6103_v5 = vld [vmem:[#allocation3 + $0x158] sm:$0xf] }
 0x121   :  { %9514 = vst [vmem:[#allocation26_spill] sm:$0xff] %v8474_v0 }
 0x122   :  { %v8478_v7 = vpop.f32.mrf.mxu2  ;;  %163 = vst [vmem:[#allocation3 + $0x124] sm:$0xf] %v131_v19 }
 0x123   :  { %v8480_v22 = vpop.f32.mrf.mxu3  ;;  %v8482_v3 = vpop.f32.mrf.mxu0 }
 0x124   :  { %9515 = vst [vmem:[#allocation27_spill] sm:$0xff] %v8480_v22  ;;  %v1081_v29 = vpop.f32.mrf.mxu1 }
 0x125   :  { %v1082_v38 = vadd.f32 %v1081_v29, %v993_v25  ;;  %v6052_v25 = vor.u32 %v7587_v24, %v6049_v9  ;;  %v6104_v29 = vor.u32 %v7601_v23, %v6103_v5  ;;  %v7739_v5 = vld [vmem:[#allocation8 + $0x190] sm:$0xff] }
 0x126   :  { %1971 = vmatmul.bf16.gmra.mxu0 %v6296_v53  ;;  %2574 = vmatpush.bf16.msra.mxu1 %v7739_v5 }
 0x127   :  { %v8485_v45 = vadd.f32 %v8400_v30, %v1082_v38  ;;  %v6292_v30 = vor.u32 %v7647_v54, %v6289_v2  ;;  %v7652_v38 = vld [vmem:[#allocation3 + $0xb8] sm:$0xf0]  ;;  %v8010_v2 = vld [vmem:[#allocation2 + $0x1b0] sm:$0xff] }
 0x128   :  { %v6308_v9 = vor.u32 %v7652_v38, %v6307_v63  ;;  %v7604_v63 = vld [vmem:[#allocation3 + $0x178] sm:$0xf0]  ;;  %v1001_v38 = vadd.f32 %v8439_v15, %v8416_v17  ;;  %v6319_v17 = vld [vmem:[#allocation3 + $0xc8] sm:$0xf] }
 0x129   :  { %9516 = vst [vmem:[#allocation28_spill] sm:$0xff] %v8485_v45  ;;  %v998_v45 = vadd.f32 %v8439_v15, %v8406_v49  ;;  %v7590_v49 = vld [vmem:[#allocation3 + $0x10c] sm:$0xf] }
 0x12a   :  { %v8489_v0 = vpop.f32.mrf.mxu2 }
 0x12b   :  { %v8491_v55 = vpop.f32.mrf.mxu3  ;;  %v8493_v51 = vpop.f32.mrf.mxu0 }
 0x12c   :  { %9517 = vst [vmem:[#allocation29_spill] sm:$0xff] %v8491_v55  ;;  %v1084_v19 = vpop.f32.mrf.mxu1  ;;  %v6301_v55 = vld [vmem:[#allocation3 + $0xb4] sm:$0xf0] }
 0x12d   :  { %v1085_v53 = vadd.f32 %v1084_v19, %v996_v50  ;;  %v8009_v50 = vld [vmem:[#allocation2 + $0x1a8] sm:$0xff] }
 0x12f   :  { %v8496_v32 = vadd.f32 %v8408_v41, %v1085_v53  ;;  %1123 = vmatmul.bf16.gmra.mxu1 %v6052_v25  ;;  %1232 = vmatmul.bf16.gmra.mxu2 %v6104_v29  ;;  %v133_v41 = vpack.c.bf16 %v8009_v50, %v8009_v50  ;;  %v134_v25 = vpack.c.bf16 %v8010_v2, %v8010_v2  ;;  %v6115_v53 = vld [vmem:[#allocation3 + $0x170] sm:$0xf] }
 0x130   :  { %1892 = vmatmul.bf16.gmra.mxu3 %v6292_v30  ;;  %v6061_v30 = vld [vmem:[#allocation3 + $0x114] sm:$0xf0]  ;;  %v6116_v5 = vor.u32 %v7604_v63, %v6115_v53  ;;  %v8011_v63 = vld [vmem:[#allocation2 + $0x1c8] sm:$0xff] }
 0x131   :  { %165 = vst [vmem:[#allocation3 + $0x13c] sm:$0xf] %v133_v41 }
 0x132   :  { %v8500_v22 = vpop.f32.mrf.mxu2  ;;  %166 = vst [vmem:[#allocation3 + $0x148] sm:$0xf] %v134_v25 }
 0x133   :  { %v8502_v24 = vpop.f32.mrf.mxu3  ;;  %v8504_v54 = vpop.f32.mrf.mxu0 }
 0x134   :  { %9518 = vst [vmem:[#allocation30_spill] sm:$0xff] %v8502_v24  ;;  %v1086_v23 = vpop.f32.mrf.mxu1  ;;  %v7650_v24 = vld [vmem:[#allocation3 + $0xac] sm:$0xf] }
 0x135   :  { %v1087_v29 = vadd.f32 %v1086_v23, %v998_v45  ;;  %v6064_v45 = vor.u32 %v7590_v49, %v6061_v30  ;;  %v7755_v23 = vld [vmem:[#allocation8 + $0x210] sm:$0xff]  ;;  %v6304_v41 = vor.u32 %v7650_v24, %v6301_v55  ;;  %v6320_v55 = vor.u32 %v7655_v26, %v6319_v17  ;;  %v7653_v17 = vld [vmem:[#allocation3 + $0xc4] sm:$0xf] }
 0x136   :  { %1976 = vmatmul.bf16.gmra.mxu0 %v6308_v9  ;;  %2732 = vmatpush.bf16.msra.mxu3 %v7755_v23  ;;  %v1006_v26 = vadd.f32 %v8439_v15, %v8434_v61  ;;  %v6331_v61 = vld [vmem:[#allocation3 + $0xe0] sm:$0xf] }
 0x137   :  { %v8507_v19 = vadd.f32 %v8418_v12, %v1087_v29 }
 0x13a   :  { %v8511_v50 = vpop.f32.mrf.mxu2 }
 0x13b   :  { %v8513_v2 = vpop.f32.mrf.mxu3  ;;  %v8515_v29 = vpop.f32.mrf.mxu0 }
 0x13c   :  { %9519 = vst [vmem:[#allocation31_spill] sm:$0xff] %v8513_v2  ;;  %v1089_v12 = vpop.f32.mrf.mxu1  ;;  %v1003_v2 = vadd.f32 %v8439_v15, %v8424_v10  ;;  %v6073_v10 = vld [vmem:[#allocation3 + $0x12c] sm:$0xf0] }
 0x13d   :  { %v1090_v9 = vadd.f32 %v1089_v12, %v1001_v38  ;;  %v135_v38 = vpack.c.bf16 %v8011_v63, %v8011_v63  ;;  %v7593_v12 = vld [vmem:[#allocation3 + $0x124] sm:$0xf] }
 0x13f   :  { %v8518_v25 = vadd.f32 %v8426_v40, %v1090_v9  ;;  %1128 = vmatmul.bf16.gmra.mxu1 %v6064_v45  ;;  %1237 = vmatmul.bf16.gmra.mxu2 %v6116_v5  ;;  %v8012_v40 = vld [vmem:[#allocation2 + $0x1d0] sm:$0xff]  ;;  %167 = vst [vmem:[#allocation3 + $0x154] sm:$0xf] %v135_v38  ;;  %v7630_v9 = vld [vmem:[#allocation3 + $0x8] sm:$0xf0] }
 0x140   :  { %1897 = vmatmul.bf16.gmra.mxu3 %v6304_v41  ;;  %v136_v23 = vpack.c.bf16 %v8012_v40, %v8012_v40  ;;  %v6215_v41 = vld [vmem:[#allocation3] sm:$0xf] }
 0x141   :  { %9520 = vst [vmem:[#allocation32_spill] sm:$0xff] %v8518_v25 }
 0x142   :  { %v8522_v49 = vpop.f32.mrf.mxu2  ;;  %168 = vst [vmem:[#allocation3 + $0x160] sm:$0xf] %v136_v23 }
 0x143   :  { %v8524_v30 = vpop.f32.mrf.mxu3  ;;  %v8526_v53 = vpop.f32.mrf.mxu0 }
 0x144   :  { %9521 = vst [vmem:[#allocation33_spill] sm:$0xff] %v8524_v30  ;;  %v1091_v24 = vpop.f32.mrf.mxu1  ;;  %v6313_v30 = vld [vmem:[#allocation3 + $0xcc] sm:$0xf0] }
 0x145   :  { %v1092_v45 = vadd.f32 %v1091_v24, %v1003_v2  ;;  %v6076_v2 = vor.u32 %v7593_v12, %v6073_v10  ;;  %v6216_v24 = vor.u32 %v7630_v9, %v6215_v41  ;;  %v7738_v41 = vld [vmem:[#allocation8 + $0x188] sm:$0xff]  ;;  %v7751_v9 = vld [vmem:[#allocation8 + $0x1f0] sm:$0xff] }
 0x146   :  { %1981 = vmatmul.bf16.gmra.mxu0 %v6320_v55  ;;  %2575 = vmatpush.bf16.msra.mxu1 %v7738_v41 }
 0x147   :  { %v8529_v5 = vadd.f32 %v8443_v42, %v1092_v45  ;;  %v6316_v42 = vor.u32 %v7653_v17, %v6313_v30  ;;  %v7752_v45 = vld [vmem:[#allocation8 + $0x1f8] sm:$0xff]  ;;  %v6332_v30 = vor.u32 %v7658_v56, %v6331_v61  ;;  %v8013_v17 = vld [vmem:[#allocation2 + $0x1e8] sm:$0xff] }
 0x148   :  { %2648 = vmatpush.bf16.msrb.mxu2 %v7752_v45  ;;  %v7816_v45 = vld [vmem:[#allocation10 + $0xf8] sm:$0xff]  ;;  %v7754_v56 = vld [vmem:[#allocation8 + $0x208] sm:$0xff] }
 0x149   :  { %9522 = vst [vmem:[#allocation34_spill] sm:$0xff] %v8529_v5  ;;  %v1008_v5 = vadd.f32 %v8439_v15, %v8447_v16  ;;  %v7750_v61 = vld [vmem:[#allocation8 + $0x1e8] sm:$0xff]  ;;  %3859 = vmatpush.bf16.msra.mxu0 %v7816_v45  ;;  %2733 = vmatpush.bf16.msra.mxu3 %v7754_v56  ;;  %v7748_v45 = vld [vmem:[#allocation8 + $0x1d8] sm:$0xff] }
 0x14a   :  { %v8533_v18 = vpop.f32.mrf.mxu2  ;;  %v6343_v56 = vld [vmem:[#allocation3 + $0xf8] sm:$0xf] }
 0x14b   :  { %v8535_v63 = vpop.f32.mrf.mxu3  ;;  %v8537_v40 = vpop.f32.mrf.mxu0 }
 0x14c   :  { %9523 = vst [vmem:[#allocation35_spill] sm:$0xff] %v8535_v63  ;;  %v1094_v38 = vpop.f32.mrf.mxu1  ;;  %2649 = vmatpush.bf16.msrb.mxu2 %v7751_v9  ;;  %v6085_v63 = vld [vmem:[#allocation3 + $0x144] sm:$0xf0] }
 0x14d   :  { %v1095_v55 = vadd.f32 %v1094_v38, %v1006_v26 }
 0x14f   :  { %v8540_v23 = vadd.f32 %v8454_v8, %v1095_v55  ;;  %1133 = vmatmul.bf16.gmra.mxu1 %v6076_v2  ;;  %1783 = vmatmul.bf16.vlgmr.msra.gmra.mxu2 %v6216_v24  ;;  %v137_v2 = vpack.c.bf16 %v8013_v17, %v8013_v17  ;;  %v8014_v24 = vld [vmem:[#allocation2 + $0x1f0] sm:$0xff]  ;;  %v7596_v55 = vld [vmem:[#allocation3 + $0x13c] sm:$0xf]  ;;  %v1011_v17 = vadd.f32 %v8439_v15, %v8460_v39 }
 0x150   :  { %1902 = vmatmul.bf16.gmra.mxu3 %v6316_v42  ;;  %v138_v38 = vpack.c.bf16 %v8014_v24, %v8014_v24  ;;  %v7656_v24 = vld [vmem:[#allocation3 + $0xdc] sm:$0xf]  ;;  %2650 = vmatpush.bf16.msrb.mxu2 %v7750_v61  ;;  %v7661_v61 = vld [vmem:[#allocation3 + $0x100] sm:$0xf0] }
 0x151   :  { %9524 = vst [vmem:[#allocation36_spill] sm:$0xff] %v8540_v23  ;;  %v6227_v23 = vld [vmem:[#allocation3 + $0x18] sm:$0xf] }
 0x152   :  { %v8544_v12 = vpop.f32.mrf.mxu2  ;;  %169 = vst [vmem:[#allocation3 + $0x16c] sm:$0xf] %v137_v2  ;;  %v6228_v9 = vor.u32 %v7633_v35, %v6227_v23 }
 0x153   :  { %v8546_v10 = vpop.f32.mrf.mxu3  ;;  %v8548_v8 = vpop.f32.mrf.mxu0  ;;  %170 = vst [vmem:[#allocation3 + $0x178] sm:$0xf] %v138_v38 }
 0x154   :  { %v1096_v26 = vpop.f32.mrf.mxu1 }
 0x155   :  { %v1097_v42 = vadd.f32 %v1096_v26, %v1008_v5  ;;  %v6325_v5 = vld [vmem:[#allocation3 + $0xe4] sm:$0xf0]  ;;  %v7749_v26 = vld [vmem:[#allocation8 + $0x1e0] sm:$0xff] }
 0x156   :  { %1986 = vmatmul.bf16.gmra.mxu0 %v6332_v30  ;;  %v6088_v30 = vor.u32 %v7596_v55, %v6085_v63  ;;  %v6328_v38 = vor.u32 %v7656_v24, %v6325_v5  ;;  %2651 = vmatpush.bf16.msrb.mxu2 %v7749_v26  ;;  %v1013_v63 = vadd.f32 %v8439_v15, %v8471_v57  ;;  %v6097_v26 = vld [vmem:[#allocation3 + $0x15c] sm:$0xf0]  ;;  %v6239_v57 = vld [vmem:[#allocation3 + $0x30] sm:$0xf] }
 0x157   :  { %v8551_v16 = vadd.f32 %v8467_v6, %v1097_v42  ;;  %v6344_v55 = vor.u32 %v7661_v61, %v6343_v56  ;;  %v6337_v56 = vld [vmem:[#allocation3 + $0xfc] sm:$0xf0] }
 0x159   :  { %9525 = vst [vmem:[#allocation37_spill] sm:$0xff] %v8551_v16 }
 0x15a   :  { %v8555_v41 = vpop.f32.mrf.mxu2  ;;  %2652 = vmatpush.bf16.msrb.mxu2 %v7748_v45  ;;  %v7659_v45 = vld [vmem:[#allocation3 + $0xf4] sm:$0xf] }
 0x15b   :  { %v8557_v6 = vpop.f32.mrf.mxu3  ;;  %v8559_v42 = vpop.f32.mrf.mxu0 }
 0x15c   :  { %v1099_v2 = vpop.f32.mrf.mxu1  ;;  %9526 = vst [vmem:[#allocation38_spill] sm:$0xff] %v8559_v42  ;;  %v7664_v42 = vld [vmem:[#allocation3 + $0x118] sm:$0xf0] }
 0x15d   :  { %v1100_v16 = vadd.f32 %v1099_v2, %v1011_v17  ;;  %v7747_v17 = vld [vmem:[#allocation8 + $0x1d0] sm:$0xff]  ;;  %v7636_v2 = vld [vmem:[#allocation3 + $0x38] sm:$0xf0] }
 0x15e   :  { %2653 = vmatpush.bf16.msrb.mxu2 %v7747_v17  ;;  %v6240_v17 = vor.u32 %v7636_v2, %v6239_v57 }
 0x15f   :  { %v8562_v39 = vadd.f32 %v8478_v7, %v1100_v16  ;;  %1138 = vmatmul.bf16.gmra.mxu1 %v6088_v30  ;;  %1788 = vmatmul.bf16.gmra.mxu2 %v6228_v9  ;;  %v7599_v30 = vld [vmem:[#allocation3 + $0x154] sm:$0xf]  ;;  %v7746_v9 = vld [vmem:[#allocation8 + $0x1c8] sm:$0xff] }
 0x160   :  { %1907 = vmatmul.bf16.gmra.mxu3 %v6328_v38  ;;  %v1016_v38 = vadd.f32 %v8439_v15, %v8482_v3 }
 0x161   :  { %9527 = vst [vmem:[#allocation39_spill] sm:$0xff] %v8562_v39 }
 0x162   :  { %v8566_v35 = vpop.f32.mrf.mxu2  ;;  %2654 = vmatpush.bf16.msrb.mxu2 %v7746_v9  ;;  %v6355_v9 = vld [vmem:[#allocation3 + $0x110] sm:$0xf] }
 0x163   :  { %v8568_v23 = vpop.f32.mrf.mxu3  ;;  %v8570_v5 = vpop.f32.mrf.mxu0  ;;  %v6356_v2 = vor.u32 %v7664_v42, %v6355_v9  ;;  %v7662_v42 = vld [vmem:[#allocation3 + $0x10c] sm:$0xf] }
 0x164   :  { %v1101_v24 = vpop.f32.mrf.mxu1  ;;  %9528 = vst [vmem:[#allocation40_spill] sm:$0xff] %v8570_v5 }
 0x165   :  { %v1102_v7 = vadd.f32 %v1101_v24, %v1013_v63  ;;  %v6100_v63 = vor.u32 %v7599_v30, %v6097_v26  ;;  %v7745_v24 = vld [vmem:[#allocation8 + $0x1c0] sm:$0xff]  ;;  %v1018_v30 = vadd.f32 %v8439_v15, %v8493_v51  ;;  %v6251_v51 = vld [vmem:[#allocation3 + $0x48] sm:$0xf] }
 0x166   :  { %1991 = vmatmul.bf16.gmra.mxu0 %v6344_v55  ;;  %v6340_v55 = vor.u32 %v7659_v45, %v6337_v56  ;;  %2655 = vmatpush.bf16.msrb.mxu2 %v7745_v24  ;;  %v7815_v56 = vld [vmem:[#allocation10 + $0xf0] sm:$0xff] }
 0x167   :  { %v8573_v16 = vadd.f32 %v8489_v0, %v1102_v7  ;;  %v7737_v0 = vld [vmem:[#allocation8 + $0x180] sm:$0xff]  ;;  %3860 = vmatpush.bf16.msra.mxu0 %v7815_v56  ;;  %v7639_v24 = vld [vmem:[#allocation3 + $0x50] sm:$0xf0] }
 0x168   :  { %2576 = vmatpush.bf16.msra.mxu1 %v7737_v0  ;;  %v7753_v0 = vld [vmem:[#allocation8 + $0x200] sm:$0xff] }
 0x169   :  { %9529 = vst [vmem:[#allocation41_spill] sm:$0xff] %v8573_v16  ;;  %2734 = vmatpush.bf16.msra.mxu3 %v7753_v0 }
 0x16a   :  { %v8577_v61 = vpop.f32.mrf.mxu2 }
 0x16b   :  { %v8579_v39 = vpop.f32.mrf.mxu3  ;;  %v8581_v16 = vpop.f32.mrf.mxu0  ;;  %3861 = vmatpush.bf16.msra.mxu0 %v7814_v28  ;;  %v7699_v28 = vld [vmem:[#allocation3 + $0x50] sm:$0xf0] }
 0x16c   :  { %9530 = vst [vmem:[#allocation42_spill] sm:$0xff] %v8579_v39  ;;  %v1104_v7 = vpop.f32.mrf.mxu1 }
 0x16d   :  { %9531 = vst [vmem:[#allocation43_spill] sm:$0xff] %v8581_v16  ;;  %v1105_v5 = vadd.f32 %v1104_v7, %v1016_v38  ;;  %v1021_v7 = vadd.f32 %v8439_v15, %v8504_v54  ;;  %v6367_v54 = vld [vmem:[#allocation3 + $0x128] sm:$0xf]  ;;  %v7667_v16 = vld [vmem:[#allocation3 + $0x130] sm:$0xf0] }
 0x16f   :  { %v8584_v3 = vadd.f32 %v8500_v22, %v1105_v5  ;;  %1143 = vmatmul.bf16.gmra.mxu1 %v6100_v63  ;;  %1793 = vmatmul.bf16.gmra.mxu2 %v6240_v17  ;;  %v7602_v63 = vld [vmem:[#allocation3 + $0x16c] sm:$0xf]  ;;  %v6109_v17 = vld [vmem:[#allocation3 + $0x174] sm:$0xf0] }
 0x170   :  { %1912 = vmatmul.bf16.gmra.mxu3 %v6340_v55  ;;  %v6349_v55 = vld [vmem:[#allocation3 + $0x114] sm:$0xf0] }
 0x171   :  { %v6352_v0 = vor.u32 %v7662_v42, %v6349_v55  ;;  %v7696_v55 = vld [vmem:[#allocation3 + $0x38] sm:$0xf0] }
 0x172   :  { %v8588_v26 = vpop.f32.mrf.mxu2 }
 0x173   :  { %v8590_v57 = vpop.f32.mrf.mxu3  ;;  %v8592_v38 = vpop.f32.mrf.mxu0 }
 0x174   :  { %9532 = vst [vmem:[#allocation44_spill] sm:$0xff] %v8590_v57  ;;  %v1106_v45 = vpop.f32.mrf.mxu1  ;;  %v1023_v57 = vadd.f32 %v8439_v15, %v8515_v29  ;;  %v1026_v29 = vadd.f32 %v8439_v15, %v8326_v13  ;;  %v1028_v13 = vadd.f32 %v8439_v15, %v8334_v4  ;;  %v7668_v4 = vld [vmem:[#allocation3 + $0x13c] sm:$0xf] }
 0x175   :  { %9533 = vst [vmem:[#allocation45_spill] sm:$0xff] %v8592_v38  ;;  %v1107_v22 = vadd.f32 %v1106_v45, %v1018_v30  ;;  %v6112_v30 = vor.u32 %v7602_v63, %v6109_v17  ;;  %v6252_v45 = vor.u32 %v7639_v24, %v6251_v51  ;;  %v6368_v17 = vor.u32 %v7667_v16, %v6367_v54 }
 0x176   :  { %1996 = vmatmul.bf16.gmra.mxu0 %v6356_v2 }
 0x177   :  { %v8595_v5 = vadd.f32 %v8511_v50, %v1107_v22 }
 0x17a   :  { %v8599_v9 = vpop.f32.mrf.mxu2 }
 0x17b   :  { %v8601_v38 = vpop.f32.mrf.mxu3  ;;  %v8603_v50 = vpop.f32.mrf.mxu0 }
 0x17c   :  { %9534 = vst [vmem:[#allocation46_spill] sm:$0xff] %v8601_v38  ;;  %v1109_v56 = vpop.f32.mrf.mxu1  ;;  %v7670_v38 = vld [vmem:[#allocation3 + $0x148] sm:$0xf0] }
 0x17d   :  { %9535 = vst [vmem:[#allocation47_spill] sm:$0xff] %v8603_v50  ;;  %v1110_v22 = vadd.f32 %v1109_v56, %v1021_v7  ;;  %v7665_v56 = vld [vmem:[#allocation3 + $0x124] sm:$0xf] }
 0x17f   :  { %v8606_v2 = vadd.f32 %v8522_v49, %v1110_v22  ;;  %1148 = vmatmul.bf16.gmra.mxu1 %v6112_v30  ;;  %1798 = vmatmul.bf16.gmra.mxu2 %v6252_v45  ;;  %v6479_v49 = vld [vmem:[#allocation3 + $0x30] sm:$0xf]  ;;  %v7695_v30 = vld [vmem:[#allocation3 + $0x34] sm:$0xf]  ;;  %v6481_v45 = vld [vmem:[#allocation3 + $0x3c] sm:$0xf0] }
 0x180   :  { %1917 = vmatmul.bf16.gmra.mxu3 %v6352_v0  ;;  %v6361_v0 = vld [vmem:[#allocation3 + $0x12c] sm:$0xf0]  ;;  %v6480_v16 = vor.u32 %v7696_v55, %v6479_v49  ;;  %v6484_v54 = vor.u32 %v7695_v30, %v6481_v45 }
 0x182   :  { %v8610_v39 = vpop.f32.mrf.mxu2 }
 0x183   :  { %v8612_v63 = vpop.f32.mrf.mxu3  ;;  %v1962_v24 = vpop.f32.mrf.mxu0 }
 0x184   :  { %9536 = vst [vmem:[#allocation48_spill] sm:$0xff] %v8612_v63  ;;  %v1111_v51 = vpop.f32.mrf.mxu1  ;;  %v6379_v63 = vld [vmem:[#allocation3 + $0x140] sm:$0xf] }
 0x185   :  { %v1112_v42 = vadd.f32 %v1111_v51, %v1023_v57  ;;  %v6364_v51 = vor.u32 %v7665_v56, %v6361_v0  ;;  %v6380_v55 = vor.u32 %v7670_v38, %v6379_v63 }
 0x186   :  { %2001 = vmatmul.bf16.gmra.mxu0 %v6368_v17 }
 0x187   :  { %v8615_v7 = vadd.f32 %v8533_v18, %v1112_v42 }
 0x18a   :  { %v8617_v22 = vpop.f32.mrf.mxu2 }
 0x18b   :  { %v8621_v50 = vpop.f32.mrf.mxu3  ;;  %v1964_v18 = vpop.f32.mrf.mxu0 }
 0x18c   :  { %v1114_v57 = vpop.f32.mrf.mxu1 }
 0x18d   :  { %v1115_v42 = vadd.f32 %v1114_v57, %v1026_v29  ;;  %v7698_v57 = vld [vmem:[#allocation3 + $0x4c] sm:$0xf] }
 0x18f   :  { %v8624_v17 = vadd.f32 %v8544_v12, %v1115_v42  ;;  %2577 = vmatmul.bf16.vlgmr.msra.gmra.mxu1 %v6480_v16  ;;  %2656 = vmatmul.bf16.vlgmr.msrb.gmra.mxu2 %v6484_v54  ;;  %v6491_v16 = vld [vmem:[#allocation3 + $0x48] sm:$0xf] }
 0x190   :  { %1922 = vmatmul.bf16.gmra.mxu3 %v6364_v51  ;;  %v6493_v51 = vld [vmem:[#allocation3 + $0x54] sm:$0xf0]  ;;  %v6373_v42 = vld [vmem:[#allocation3 + $0x144] sm:$0xf0] }
 0x192   :  { %v8626_v25 = vpop.f32.mrf.mxu2 }
 0x193   :  { %v1883_v49 = vpop.f32.mrf.mxu3  ;;  %v1967_v56 = vpop.f32.mrf.mxu0 }
 0x194   :  { %v1884_v30 = vadd.f32 %v1883_v49, %v8330_v31  ;;  %v1116_v45 = vpop.f32.mrf.mxu1  ;;  %v1031_v31 = vadd.f32 %v8439_v15, %v8344_v47 }
 0x195   :  { %v1117_v12 = vadd.f32 %v1116_v45, %v1028_v13  ;;  %v6496_v13 = vor.u32 %v7698_v57, %v6493_v51 }
 0x196   :  { %v1963_v0 = vadd.f32 %v1962_v24, %v1884_v30  ;;  %2006 = vmatmul.bf16.gmra.mxu0 %v6380_v55  ;;  %v6492_v24 = vor.u32 %v7699_v28, %v6491_v16  ;;  %v6376_v55 = vor.u32 %v7668_v4, %v6373_v42  ;;  %v1033_v16 = vadd.f32 %v8439_v15, %v8352_v59  ;;  %v6503_v42 = vld [vmem:[#allocation3 + $0x60] sm:$0xf] }
 0x197   :  { %v8632_v29 = vadd.f32 %v8555_v41, %v1117_v12 }
 0x198   :  { %v8635_v54 = vadd.f32 %v1963_v0, %v8584_v3 }
 0x19a   :  { %v8637_v38 = vpop.f32.mrf.mxu2 }
 0x19b   :  { %v1885_v63 = vpop.f32.mrf.mxu3  ;;  %v1969_v30 = vpop.f32.mrf.mxu0 }
 0x19c   :  { %v1886_v41 = vadd.f32 %v1885_v63, %v8342_v21  ;;  %v1119_v49 = vpop.f32.mrf.mxu1  ;;  %v7701_v63 = vld [vmem:[#allocation3 + $0x64] sm:$0xf] }
 0x19d   :  { %v1120_v3 = vadd.f32 %v1119_v49, %v1031_v31  ;;  %v7702_v31 = vld [vmem:[#allocation3 + $0x68] sm:$0xf0] }
 0x19e   :  { %v1965_v45 = vadd.f32 %v1964_v18, %v1886_v41  ;;  %v7697_v41 = vld [vmem:[#allocation3 + $0x40] sm:$0xf0] }
 0x19f   :  { %v8643_v12 = vadd.f32 %v8566_v35, %v1120_v3  ;;  %2582 = vmatmul.bf16.gmra.mxu1 %v6492_v24  ;;  %2661 = vmatmul.bf16.gmra.mxu2 %v6496_v13  ;;  %v6505_v24 = vld [vmem:[#allocation3 + $0x6c] sm:$0xf0]  ;;  %v6487_v13 = vld [vmem:[#allocation3 + $0x38] sm:$0xf] }
 0x1a0   :  { %v8646_v0 = vadd.f32 %v1965_v45, %v8595_v5  ;;  %1927 = vmatmul.bf16.gmra.mxu3 %v6376_v55  ;;  %v6504_v55 = vor.u32 %v7702_v31, %v6503_v42  ;;  %v6488_v45 = vor.u32 %v7697_v41, %v6487_v13  ;;  %v6515_v13 = vld [vmem:[#allocation3 + $0x78] sm:$0xf]  ;;  %v7705_v41 = vld [vmem:[#allocation3 + $0x80] sm:$0xf0] }
 0x1a2   :  { %v8648_v47 = vpop.f32.mrf.mxu2 }
 0x1a3   :  { %v1888_v21 = vpop.f32.mrf.mxu3  ;;  %v1972_v51 = vpop.f32.mrf.mxu0 }
 0x1a4   :  { %v1889_v28 = vadd.f32 %v1888_v21, %v8348_v11  ;;  %v1121_v57 = vpop.f32.mrf.mxu1  ;;  %v1036_v11 = vadd.f32 %v8439_v15, %v8364_v1 }
 0x1a5   :  { %v1122_v18 = vadd.f32 %v1121_v57, %v1033_v16 }
 0x1a6   :  { %v1968_v4 = vadd.f32 %v1967_v56, %v1889_v28  ;;  %v6508_v56 = vor.u32 %v7701_v63, %v6505_v24 }
 0x1a7   :  { %v8654_v35 = vadd.f32 %v8577_v61, %v1122_v18 }
 0x1a8   :  { %v8657_v5 = vadd.f32 %v1968_v4, %v8606_v2  ;;  %v7813_v2 = vld [vmem:[#allocation10 + $0xe0] sm:$0xff] }
 0x1a9   :  { %3862 = vmatpush.bf16.msra.mxu0 %v7813_v2 }
 0x1aa   :  { %v8659_v59 = vpop.f32.mrf.mxu2 }
 0x1ab   :  { %v1890_v49 = vpop.f32.mrf.mxu3  ;;  %v1974_v16 = vpop.f32.mrf.mxu0 }
 0x1ac   :  { %v1891_v61 = vadd.f32 %v1890_v49, %v8362_v14  ;;  %v1124_v3 = vpop.f32.mrf.mxu1  ;;  %v1038_v14 = vadd.f32 %v8439_v15, %v8374_v48  ;;  %v6517_v49 = vld [vmem:[#allocation3 + $0x84] sm:$0xf0] }
 0x1ad   :  { %v1125_v21 = vadd.f32 %v1124_v3, %v1036_v11  ;;  %v7704_v11 = vld [vmem:[#allocation3 + $0x7c] sm:$0xf]  ;;  %v6516_v3 = vor.u32 %v7705_v41, %v6515_v13  ;;  %v6527_v41 = vld [vmem:[#allocation3 + $0x90] sm:$0xf] }
 0x1ae   :  { %v1970_v28 = vadd.f32 %v1969_v30, %v1891_v61 }
 0x1af   :  { %v8665_v57 = vadd.f32 %v8588_v26, %v1125_v21  ;;  %2587 = vmatmul.bf16.gmra.mxu1 %v6504_v55  ;;  %2666 = vmatmul.bf16.gmra.mxu2 %v6508_v56  ;;  %v6499_v55 = vld [vmem:[#allocation3 + $0x50] sm:$0xf]  ;;  %v7700_v56 = vld [vmem:[#allocation3 + $0x58] sm:$0xf0] }
 0x1b0   :  { %v8668_v18 = vadd.f32 %v1970_v28, %v8615_v7  ;;  %2735 = vmatmul.bf16.vlgmr.msra.gmra.mxu3 %v6488_v45  ;;  %v6500_v2 = vor.u32 %v7700_v56, %v6499_v55  ;;  %v6529_v55 = vld [vmem:[#allocation3 + $0x9c] sm:$0xf0]  ;;  %v7812_v56 = vld [vmem:[#allocation10 + $0xd8] sm:$0xff] }
 0x1b1   :  { %3863 = vmatpush.bf16.msra.mxu0 %v7812_v56  ;;  %v6541_v56 = vld [vmem:[#allocation3 + $0xb4] sm:$0xf0] }
 0x1b2   :  { %v8670_v1 = vpop.f32.mrf.mxu2 }
 0x1b3   :  { %v1893_v4 = vpop.f32.mrf.mxu3  ;;  %v1977_v30 = vpop.f32.mrf.mxu0 }
 0x1b4   :  { %v1894_v42 = vadd.f32 %v1893_v4, %v8370_v27  ;;  %v1126_v31 = vpop.f32.mrf.mxu1  ;;  %v1041_v27 = vadd.f32 %v8439_v15, %v8386_v46 }
 0x1b5   :  { %v1127_v63 = vadd.f32 %v1126_v31, %v1038_v14 }
 0x1b6   :  { %v1973_v24 = vadd.f32 %v1972_v51, %v1894_v42  ;;  %v6520_v51 = vor.u32 %v7704_v11, %v6517_v49  ;;  %v1043_v42 = vadd.f32 %v8439_v15, %v8396_v62  ;;  %v7708_v11 = vld [vmem:[#allocation3 + $0x98] sm:$0xf0]  ;;  %v7707_v49 = vld [vmem:[#allocation3 + $0x94] sm:$0xf] }
 0x1b7   :  { %v8676_v26 = vadd.f32 %v8599_v9, %v1127_v63  ;;  %v7703_v62 = vld [vmem:[#allocation3 + $0x70] sm:$0xf0] }
 0x1b8   :  { %v8679_v7 = vadd.f32 %v1973_v24, %v8624_v17 }
 0x1ba   :  { %v8681_v48 = vpop.f32.mrf.mxu2 }
 0x1bb   :  { %v1895_v61 = vpop.f32.mrf.mxu3  ;;  %v1979_v21 = vpop.f32.mrf.mxu0 }
 0x1bc   :  { %v1896_v9 = vadd.f32 %v1895_v61, %v8384_v34  ;;  %v1129_v45 = vpop.f32.mrf.mxu1 }
 0x1bd   :  { %v1130_v17 = vadd.f32 %v1129_v45, %v1041_v27  ;;  %v6511_v27 = vld [vmem:[#allocation3 + $0x68] sm:$0xf] }
 0x1be   :  { %v1975_v28 = vadd.f32 %v1974_v16, %v1896_v9  ;;  %v6512_v45 = vor.u32 %v7703_v62, %v6511_v27  ;;  %v7706_v27 = vld [vmem:[#allocation3 + $0x88] sm:$0xf0] }
 0x1bf   :  { %v8687_v14 = vadd.f32 %v8610_v39, %v1130_v17  ;;  %2592 = vmatmul.bf16.gmra.mxu1 %v6516_v3  ;;  %2671 = vmatmul.bf16.gmra.mxu2 %v6520_v51  ;;  %v6528_v3 = vor.u32 %v7708_v11, %v6527_v41 }
 0x1c0   :  { %v8690_v4 = vadd.f32 %v1975_v28, %v8632_v29  ;;  %2740 = vmatmul.bf16.gmra.mxu3 %v6500_v2 }
 0x1c2   :  { %v8692_v46 = vpop.f32.mrf.mxu2 }
 0x1c3   :  { %v1898_v34 = vpop.f32.mrf.mxu3  ;;  %v1982_v24 = vpop.f32.mrf.mxu0 }
 0x1c4   :  { %v1899_v31 = vadd.f32 %v1898_v34, %v8392_v58  ;;  %v1131_v63 = vpop.f32.mrf.mxu1  ;;  %v1046_v58 = vadd.f32 %v8439_v15, %v8404_v36  ;;  %v1048_v34 = vadd.f32 %v8439_v15, %v8414_v52 }
 0x1c5   :  { %v1132_v16 = vadd.f32 %v1131_v63, %v1043_v42 }
 0x1c6   :  { %v1978_v13 = vadd.f32 %v1977_v30, %v1899_v31 }
 0x1c7   :  { %v8698_v39 = vadd.f32 %v8617_v22, %v1132_v16  ;;  %v6532_v22 = vor.u32 %v7707_v49, %v6529_v55  ;;  %v7710_v55 = vld [vmem:[#allocation3 + $0xac] sm:$0xf] }
 0x1c8   :  { %v8701_v29 = vadd.f32 %v1978_v13, %v8643_v12 }
 0x1ca   :  { %v8703_v61 = vpop.f32.mrf.mxu2 }
 0x1cb   :  { %v1900_v30 = vpop.f32.mrf.mxu3  ;;  %v1984_v12 = vpop.f32.mrf.mxu0 }
 0x1cc   :  { %v1901_v51 = vadd.f32 %v1900_v30, %v8402_v33  ;;  %v1134_v9 = vpop.f32.mrf.mxu1  ;;  %v6544_v30 = vor.u32 %v7710_v55, %v6541_v56  ;;  %v9539_v55 = vld [vmem:[#allocation42_spill] sm:$0xff] }
 0x1cd   :  { %v1135_v2 = vadd.f32 %v1134_v9, %v1046_v58 }
 0x1ce   :  { %v1980_v17 = vadd.f32 %v1979_v21, %v1901_v51 }
 0x1cf   :  { %v8709_v28 = vadd.f32 %v8626_v25, %v1135_v2  ;;  %2597 = vmatmul.bf16.gmra.mxu1 %v6528_v3  ;;  %2676 = vmatmul.bf16.gmra.mxu2 %v6532_v22 }
 0x1d0   :  { %v8712_v42 = vadd.f32 %v1980_v17, %v8654_v35  ;;  %2745 = vmatmul.bf16.gmra.mxu3 %v6512_v45  ;;  %v6539_v35 = vld [vmem:[#allocation3 + $0xa8] sm:$0xf]  ;;  %v1053_v17 = vadd.f32 %v8439_v15, %v8432_v60 }
 0x1d2   :  { %v1784_v36 = vpop.f32.mrf.mxu2 }
 0x1d3   :  { %v1864_v33 = vadd.f32 %v8546_v10, %v1784_v36  ;;  %v1903_v31 = vpop.f32.mrf.mxu3  ;;  %v1987_v21 = vpop.f32.mrf.mxu0  ;;  %v7711_v10 = vld [vmem:[#allocation3 + $0xb0] sm:$0xf0] }
 0x1d4   :  { %v1904_v63 = vadd.f32 %v1903_v31, %v8410_v43  ;;  %v1136_v16 = vpop.f32.mrf.mxu1  ;;  %v6523_v43 = vld [vmem:[#allocation3 + $0x80] sm:$0xf]  ;;  %v6540_v58 = vor.u32 %v7711_v10, %v6539_v35 }
 0x1d5   :  { %v1943_v25 = vadd.f32 %v8526_v53, %v1864_v33  ;;  %v1137_v13 = vadd.f32 %v1136_v16, %v1048_v34  ;;  %v1051_v53 = vadd.f32 %v8439_v15, %v8422_v37  ;;  %v6524_v22 = vor.u32 %v7706_v27, %v6523_v43  ;;  %v7714_v15 = vld [vmem:[#allocation3 + $0xc8] sm:$0xf0] }
 0x1d6   :  { %v1983_v41 = vadd.f32 %v1982_v24, %v1904_v63 }
 0x1d7   :  { %v8720_v11 = vadd.f32 %v8637_v38, %v1137_v13  ;;  %v8723_v49 = vadd.f32 %v1943_v25, %v8496_v32  ;;  %v9537_v25 = vld [vmem:[#allocation32_spill] sm:$0xff] }
 0x1d8   :  { %v8726_v52 = vadd.f32 %v1983_v41, %v8665_v57  ;;  %v6535_v41 = vld [vmem:[#allocation3 + $0x98] sm:$0xf] }
 0x1da   :  { %v1786_v62 = vpop.f32.mrf.mxu2 }
 0x1db   :  { %v1866_v24 = vadd.f32 %v8557_v6, %v1786_v62  ;;  %v1905_v38 = vpop.f32.mrf.mxu3  ;;  %v1989_v57 = vpop.f32.mrf.mxu0 }
 0x1dc   :  { %v1906_v32 = vadd.f32 %v1905_v38, %v8420_v20  ;;  %v1139_v3 = vpop.f32.mrf.mxu1 }
 0x1dd   :  { %v1945_v51 = vadd.f32 %v8537_v40, %v1866_v24  ;;  %v1140_v9 = vadd.f32 %v1139_v3, %v1051_v53  ;;  %v9540_v53 = vld [vmem:[#allocation21_spill] sm:$0xff] }
 0x1de   :  { %v1985_v45 = vadd.f32 %v1984_v12, %v1906_v32 }
 0x1df   :  { %v8734_v2 = vadd.f32 %v8648_v47, %v1140_v9  ;;  %2602 = vmatmul.bf16.gmra.mxu1 %v6540_v58  ;;  %2681 = vmatmul.bf16.gmra.mxu2 %v6544_v30  ;;  %v8740_v6 = vadd.f32 %v1945_v51, %v8507_v19  ;;  %v6551_v19 = vld [vmem:[#allocation3 + $0xc0] sm:$0xf]  ;;  %v9541_v58 = vld [vmem:[#allocation38_spill] sm:$0xff] }
 0x1e0   :  { %v8737_v37 = vadd.f32 %v1985_v45, %v8676_v26  ;;  %2750 = vmatmul.bf16.gmra.mxu3 %v6524_v22  ;;  %v7811_v26 = vld [vmem:[#allocation10 + $0xd0] sm:$0xff]  ;;  %v6552_v27 = vor.u32 %v7714_v15, %v6551_v19  ;;  %v9542_v45 = vld [vmem:[#allocation34_spill] sm:$0xff] }
 0x1e1   :  { %3864 = vmatpush.bf16.msra.mxu0 %v7811_v26  ;;  %v9546_v26 = vld [vmem:[#allocation40_spill] sm:$0xff]  ;;  %v6563_v15 = vld [vmem:[#allocation3 + $0xd8] sm:$0xf] }
 0x1e2   :  { %v1789_v20 = vpop.f32.mrf.mxu2 }
 0x1e3   :  { %v1869_v40 = vadd.f32 %v8568_v23, %v1789_v20  ;;  %v1908_v36 = vpop.f32.mrf.mxu3  ;;  %v1992_v31 = vpop.f32.mrf.mxu0  ;;  %v6553_v23 = vld [vmem:[#allocation3 + $0xcc] sm:$0xf0] }
 0x1e4   :  { %v1909_v12 = vadd.f32 %v1908_v36, %v8428_v44  ;;  %v1141_v47 = vpop.f32.mrf.mxu1  ;;  %v7713_v44 = vld [vmem:[#allocation3 + $0xc4] sm:$0xf] }
 0x1e5   :  { %v1948_v34 = vadd.f32 %v8548_v8, %v1869_v40  ;;  %v1142_v33 = vadd.f32 %v1141_v47, %v1053_v17  ;;  %v7709_v8 = vld [vmem:[#allocation3 + $0xa0] sm:$0xf0]  ;;  %v6556_v62 = vor.u32 %v7713_v44, %v6553_v23  ;;  %v9543_v40 = vld [vmem:[#allocation18_spill] sm:$0xff]  ;;  %v9547_v44 = vld [vmem:[#allocation36_spill] sm:$0xff] }
 0x1e6   :  { %v1988_v63 = vadd.f32 %v1987_v21, %v1909_v12  ;;  %v8015_v21 = vld [vmem:[%s9495_s2] ss:$0 sm:$0xff]  ;;  %v6536_v38 = vor.u32 %v7709_v8, %v6535_v41  ;;  %v9544_v12 = vld [vmem:[#allocation44_spill] sm:$0xff]  ;;  %v7717_v8 = vld [vmem:[#allocation3 + $0xe0] sm:$0xf0] }
 0x1e7   :  { %v8748_v16 = vadd.f32 %v8659_v59, %v1142_v33  ;;  %v8751_v13 = vadd.f32 %v1948_v34, %v9537_v25  ;;  %v9538_v59 = vld [vmem:[#allocation17_spill] sm:$0xff]  ;;  %v1058_v36 = vadd.f32 %v8015_v21, %v9543_v40 }
 0x1e8   :  { %v8754_v60 = vadd.f32 %v1988_v63, %v8687_v14  ;;  %v1056_v10 = vadd.f32 %v8015_v21, %v9538_v59  ;;  %v6565_v59 = vld [vmem:[#allocation3 + $0xe4] sm:$0xf0] }
 0x1ea   :  { %v1791_v35 = vpop.f32.mrf.mxu2 }
 0x1eb   :  { %v1871_v56 = vadd.f32 %v9539_v55, %v1791_v35  ;;  %v1910_v43 = vpop.f32.mrf.mxu3  ;;  %v1994_v51 = vpop.f32.mrf.mxu0  ;;  %v7716_v35 = vld [vmem:[#allocation3 + $0xdc] sm:$0xf] }
 0x1ec   :  { %v1911_v14 = vadd.f32 %v1910_v43, %v9540_v53  ;;  %v1144_v24 = vpop.f32.mrf.mxu1  ;;  %v7712_v55 = vld [vmem:[#allocation3 + $0xb8] sm:$0xf0] }
 0x1ed   :  { %v1950_v30 = vadd.f32 %v9541_v58, %v1871_v56  ;;  %v1145_v32 = vadd.f32 %v1144_v24, %v1056_v10  ;;  %v6547_v10 = vld [vmem:[#allocation3 + $0xb0] sm:$0xf]  ;;  %v6568_v24 = vor.u32 %v7716_v35, %v6565_v59  ;;  %v7810_v35 = vld [vmem:[#allocation10 + $0xc8] sm:$0xff] }
 0x1ee   :  { %v1990_v3 = vadd.f32 %v1989_v57, %v1911_v14  ;;  %v9545_v57 = vld [vmem:[#allocation23_spill] sm:$0xff]  ;;  %v6564_v14 = vor.u32 %v7717_v8, %v6563_v15  ;;  %v9557_v15 = vld [vmem:[#allocation45_spill] sm:$0xff]  ;;  %3865 = vmatpush.bf16.msra.mxu0 %v7810_v35 }
 0x1ef   :  { %v8764_v22 = vadd.f32 %v8670_v1, %v1145_v32  ;;  %2607 = vmatmul.bf16.gmra.mxu1 %v6552_v27  ;;  %2686 = vmatmul.bf16.gmra.mxu2 %v6556_v62  ;;  %v8770_v20 = vadd.f32 %v1950_v30, %v9542_v45  ;;  %v9548_v27 = vld [vmem:[#allocation19_spill] sm:$0xff]  ;;  %v6548_v32 = vor.u32 %v7712_v55, %v6547_v10  ;;  %v6575_v10 = vld [vmem:[#allocation3 + $0xf0] sm:$0xf] }
 0x1f0   :  { %v8767_v9 = vadd.f32 %v1990_v3, %v8698_v39  ;;  %2755 = vmatmul.bf16.gmra.mxu3 %v6536_v38  ;;  %v1061_v62 = vadd.f32 %v8015_v21, %v9548_v27  ;;  %v9550_v38 = vld [vmem:[#allocation25_spill] sm:$0xff]  ;;  %v9558_v55 = vld [vmem:[#allocation39_spill] sm:$0xff]  ;;  %v7720_v27 = vld [vmem:[#allocation3 + $0xf8] sm:$0xf0] }
 0x1f1   :  { %v6571_v35 = vld [vmem:[#allocation3 + $0xe0] sm:$0xf] }
 0x1f2   :  { %v1794_v17 = vpop.f32.mrf.mxu2 }
 0x1f3   :  { %v1874_v47 = vadd.f32 %v9544_v12, %v1794_v17  ;;  %v1913_v34 = vpop.f32.mrf.mxu3  ;;  %v1997_v56 = vpop.f32.mrf.mxu0  ;;  %v9553_v12 = vld [vmem:[#allocation37_spill] sm:$0xff] }
 0x1f4   :  { %v1914_v33 = vadd.f32 %v1913_v34, %v9545_v57  ;;  %v1146_v1 = vpop.f32.mrf.mxu1  ;;  %v9554_v57 = vld [vmem:[#allocation20_spill] sm:$0xff] }
 0x1f5   :  { %v1953_v63 = vadd.f32 %v9546_v26, %v1874_v47  ;;  %v1147_v19 = vadd.f32 %v1146_v1, %v1058_v36  ;;  %v9555_v1 = vld [vmem:[#allocation48_spill] sm:$0xff] }
 0x1f6   :  { %v1993_v25 = vadd.f32 %v1992_v31, %v1914_v33  ;;  %v9549_v31 = vld [vmem:[#allocation46_spill] sm:$0xff]  ;;  %v1063_v33 = vadd.f32 %v8015_v21, %v9554_v57 }
 0x1f7   :  { %v8777_v39 = vadd.f32 %v8681_v48, %v1147_v19  ;;  %v8780_v23 = vadd.f32 %v1953_v63, %v9547_v44 }
 0x1f8   :  { %v8783_v41 = vadd.f32 %v1993_v25, %v8709_v28  ;;  %v9551_v28 = vld [vmem:[#allocation43_spill] sm:$0xff] }
 0x1fa   :  { %v1796_v43 = vpop.f32.mrf.mxu2 }
 0x1fb   :  { %v1876_v53 = vadd.f32 %v9549_v31, %v1796_v43  ;;  %v1915_v48 = vpop.f32.mrf.mxu3  ;;  %v1999_v19 = vpop.f32.mrf.mxu0  ;;  %v6577_v31 = vld [vmem:[#allocation3 + $0xfc] sm:$0xf0] }
 0x1fc   :  { %v1916_v58 = vadd.f32 %v1915_v48, %v9550_v38  ;;  %v1149_v30 = vpop.f32.mrf.mxu1  ;;  %v7715_v48 = vld [vmem:[#allocation3 + $0xd0] sm:$0xf0]  ;;  %v6576_v38 = vor.u32 %v7720_v27, %v6575_v10 }
 0x1fd   :  { %v1955_v3 = vadd.f32 %v9551_v28, %v1876_v53  ;;  %v1150_v45 = vadd.f32 %v1149_v30, %v1061_v62  ;;  %v7719_v62 = vld [vmem:[#allocation3 + $0xf4] sm:$0xf]  ;;  %v6559_v53 = vld [vmem:[#allocation3 + $0xc8] sm:$0xf] }
 0x1fe   :  { %v1995_v17 = vadd.f32 %v1994_v51, %v1916_v58  ;;  %v9556_v51 = vld [vmem:[#allocation27_spill] sm:$0xff]  ;;  %v9560_v58 = vld [vmem:[#allocation29_spill] sm:$0xff]  ;;  %v6560_v28 = vor.u32 %v7715_v48, %v6559_v53 }
 0x1ff   :  { %v8790_v40 = vadd.f32 %v8692_v46, %v1150_v45  ;;  %2612 = vmatmul.bf16.gmra.mxu1 %v6564_v14  ;;  %2691 = vmatmul.bf16.gmra.mxu2 %v6568_v24  ;;  %v8796_v47 = vadd.f32 %v1955_v3, %v9553_v12  ;;  %v9561_v3 = vld [vmem:[#allocation47_spill] sm:$0xff]  ;;  %v9562_v12 = vld [vmem:[#allocation41_spill] sm:$0xff] }
 0x200   :  { %v8793_v36 = vadd.f32 %v1995_v17, %v8720_v11  ;;  %2760 = vmatmul.bf16.gmra.mxu3 %v6548_v32  ;;  %v9565_v53 = vld [vmem:[#allocation31_spill] sm:$0xff] }
 0x202   :  { %9552 = vst [vmem:[#allocation32_spill] sm:$0xff] %v8793_v36  ;;  %v1799_v34 = vpop.f32.mrf.mxu2  ;;  %v9571_v36 = vld [vmem:[#allocation24_spill] sm:$0xff] }
 0x203   :  { %v1879_v26 = vadd.f32 %v9555_v1, %v1799_v34  ;;  %v1918_v63 = vpop.f32.mrf.mxu3  ;;  %v9564_v1 = vld [vmem:[#allocation30_spill] sm:$0xff] }
 0x204   :  { %v1919_v25 = vadd.f32 %v1918_v63, %v9556_v51  ;;  %v1151_v46 = vpop.f32.mrf.mxu1 }
 0x205   :  { %v1958_v44 = vadd.f32 %v9557_v15, %v1879_v26  ;;  %v1152_v8 = vadd.f32 %v1151_v46, %v1063_v33  ;;  %v6587_v46 = vld [vmem:[#allocation3 + $0x108] sm:$0xf]  ;;  %v7723_v15 = vld [vmem:[#allocation3 + $0x110] sm:$0xf0] }
 0x206   :  { %v1998_v11 = vadd.f32 %v1997_v56, %v1919_v25  ;;  %v6588_v27 = vor.u32 %v7723_v15, %v6587_v46  ;;  %v6599_v15 = vld [vmem:[#allocation3 + $0x120] sm:$0xf] }
 0x207   :  { %v8803_v59 = vadd.f32 %v8703_v61, %v1152_v8  ;;  %v8806_v43 = vadd.f32 %v1958_v44, %v9558_v55  ;;  %v6580_v61 = vor.u32 %v7719_v62, %v6577_v31  ;;  %v7722_v44 = vld [vmem:[#allocation3 + $0x10c] sm:$0xf]  ;;  %v6589_v8 = vld [vmem:[#allocation3 + $0x114] sm:$0xf0] }
 0x208   :  { %v8809_v21 = vadd.f32 %v1998_v11, %v8734_v2  ;;  %v2002_v2 = vpop.f32.mrf.mxu0  ;;  %v7718_v11 = vld [vmem:[#allocation3 + $0xe8] sm:$0xf0]  ;;  %v6592_v62 = vor.u32 %v7722_v44, %v6589_v8 }
 0x209   :  { %v7726_v44 = vld [vmem:[#allocation3 + $0x128] sm:$0xf0] }
 0x20a   :  { %9559 = vst [vmem:[#allocation17_spill] sm:$0xff] %v8809_v21  ;;  %v1801_v14 = vpop.f32.mrf.mxu2 }
 0x20b   :  { %v1881_v24 = vadd.f32 %v8621_v50, %v1801_v14  ;;  %v1920_v56 = vpop.f32.mrf.mxu3 }
 0x20c   :  { %v1921_v30 = vadd.f32 %v1920_v56, %v9560_v58  ;;  %v8813_v32 = vpop.f32.mrf.mxu1 }
 0x20d   :  { %v1960_v45 = vadd.f32 %v9561_v3, %v1881_v24  ;;  %v6572_v24 = vor.u32 %v7718_v11, %v6571_v35  ;;  %v7725_v35 = vld [vmem:[#allocation3 + $0x124] sm:$0xf]  ;;  %v6601_v11 = vld [vmem:[#allocation3 + $0x12c] sm:$0xf0] }
 0x20e   :  { %v2000_v17 = vadd.f32 %v1999_v19, %v1921_v30 }
 0x20f   :  { %2617 = vmatmul.bf16.gmra.mxu1 %v6576_v38  ;;  %2696 = vmatmul.bf16.gmra.mxu2 %v6580_v61  ;;  %v8817_v34 = vadd.f32 %v1960_v45, %v9562_v12 }
 0x210   :  { %v8820_v57 = vadd.f32 %v2000_v17, %v8748_v16  ;;  %2765 = vmatmul.bf16.gmra.mxu3 %v6560_v28  ;;  %v2004_v25 = vpop.f32.mrf.mxu0 }
 0x212   :  { %9563 = vst [vmem:[#allocation42_spill] sm:$0xff] %v8820_v57  ;;  %v8822_v50 = vpop.f32.mrf.mxu2  ;;  %v8881_v57 = vld [vmem:[#allocation3 + $0x170] sm:$0xf0] }
 0x213   :  { %v1923_v33 = vpop.f32.mrf.mxu3 }
 0x214   :  { %v1924_v26 = vadd.f32 %v1923_v33, %v9564_v1  ;;  %v8825_v63 = vpop.f32.mrf.mxu1  ;;  %v8841_v1 = vld [vmem:[#allocation3 + $0x15c] sm:$0xf0] }
 0x216   :  { %v2003_v51 = vadd.f32 %v2002_v2, %v1924_v26  ;;  %v9566_v2 = vld [vmem:[#allocation33_spill] sm:$0xff] }
 0x218   :  { %v2036_v19 = vadd.f32 %v2003_v51, %v8764_v22  ;;  %v8833_v22 = vld [vmem:[#allocation3 + $0x154] sm:$0xf]  ;;  %v2007_v58 = vpop.f32.mrf.mxu0  ;;  %v8843_v51 = vld [vmem:[#allocation3 + $0x150] sm:$0xf] }
 0x21a   :  { %vm2922_vm2 = vcmp.ge.f32.partialorder %v2036_v19, 0.0  ;;  %v2954_v16 = vmul.f32 0.2, %v2036_v19  ;;  %v8828_v10 = vpop.f32.mrf.mxu2 }
 0x21b   :  { %v1925_v55 = vpop.f32.mrf.mxu3 }
 0x21c   :  { %v2986_v31 = vsel %vm2922_vm2, %v2036_v19, %v2954_v16  ;;  %v1926_v48 = vadd.f32 %v1925_v55, %v9565_v53  ;;  %v8831_v14 = vpop.f32.mrf.mxu1  ;;  %v6583_v16 = vld [vmem:[#allocation3 + $0xf8] sm:$0xf]  ;;  %v7721_v55 = vld [vmem:[#allocation3 + $0x100] sm:$0xf0] }
 0x21d   :  { %v3018_v56 = vpack.c.bf16 %v2986_v31, %v2986_v31  ;;  %3082 = vst [vmem:[#allocation2 + $0x1c8] sm:$0xff] %v2986_v31 }
 0x21e   :  { %v2005_v38 = vadd.f32 %v2004_v25, %v1926_v48  ;;  %v6600_v48 = vor.u32 %v7726_v44, %v6599_v15  ;;  %v8859_v44 = vld [vmem:[#allocation3 + $0x158] sm:$0xf] }
 0x21f   :  { %2622 = vmatmul.bf16.gmra.mxu1 %v6588_v27  ;;  %2701 = vmatmul.bf16.gmra.mxu2 %v6592_v62  ;;  %3050 = vst [vmem:[#allocation3 + $0x154] sm:$0xf] %v3018_v56  ;;  %v8850_v56 = vld [vmem:[#allocation3 + $0x158] sm:$0xf0] }
 0x220   :  { %v2037_v61 = vadd.f32 %v2005_v38, %v8777_v39  ;;  %2770 = vmatmul.bf16.gmra.mxu3 %v6572_v24  ;;  %v2009_v53 = vpop.f32.mrf.mxu0  ;;  %v6604_v24 = vor.u32 %v7725_v35, %v6601_v11  ;;  %v2658_v11 = vadd.f32 %v8822_v50, %v8813_v32  ;;  %v8870_v32 = vld [vmem:[#allocation3 + $0x174] sm:$0xf0] }
 0x222   :  { %vm2923_vm3 = vcmp.ge.f32.partialorder %v2037_v61, 0.0  ;;  %v2955_v30 = vmul.f32 0.2, %v2037_v61  ;;  %v8836_v28 = vpop.f32.mrf.mxu2 }
 0x223   :  { %v1928_v3 = vpop.f32.mrf.mxu3 }
 0x224   :  { %v2987_v45 = vsel %vm2923_vm3, %v2037_v61, %v2955_v30  ;;  %v1929_v17 = vadd.f32 %v1928_v3, %v9566_v2  ;;  %v8839_v12 = vpop.f32.mrf.mxu1  ;;  %v3114_v33 = vld [vmem:[#allocation2 + $0x1c7] sm:$0xff] }
 0x225   :  { %v3019_v26 = vpack.c.bf16 %v2987_v45, %v2987_v45  ;;  %3083 = vst [vmem:[#allocation2 + $0x1d0] sm:$0xff] %v2987_v45  ;;  %v3146_v25 = vsel %vm71_vm0, 0.0, %v3114_v33  ;;  %v9568_v61 = vld [vmem:[#allocation35_spill] sm:$0xff] }
 0x226   :  { %v2008_v46 = vadd.f32 %v2007_v58, %v1929_v17  ;;  %v3178_v19 = vpack.c.bf16 %v3146_v25, %v3146_v25 }
 0x227   :  { %3051 = vst [vmem:[#allocation3 + $0x160] sm:$0xf] %v3019_v26  ;;  %v8855_v26 = vld [vmem:[#allocation3 + $0x16c] sm:$0xf] }
 0x228   :  { %v2038_v8 = vadd.f32 %v2008_v46, %v8790_v40  ;;  %3210 = vst [vmem:[#allocation3 + $0x150] sm:$0xf] %v3178_v19  ;;  %v6584_v40 = vor.u32 %v7721_v55, %v6583_v16  ;;  %v8864_v55 = vld [vmem:[#allocation3 + $0x160] sm:$0xf0] }
 0x22a   :  { %vm2924_vm4 = vcmp.ge.f32.partialorder %v2038_v8, 0.0  ;;  %v2956_v27 = vmul.f32 0.2, %v2038_v8  ;;  %v8848_v62 = vpop.f32.mrf.mxu2 }
 0x22b   :  { %v1930_v31 = vpop.f32.mrf.mxu3 }
 0x22c   :  { %v2988_v38 = vsel %vm2924_vm4, %v2038_v8, %v2956_v27  ;;  %v1931_v58 = vadd.f32 %v1930_v31, %v9568_v61  ;;  %v8853_v30 = vpop.f32.mrf.mxu1  ;;  %v3115_v3 = vld [vmem:[#allocation2 + $0x1cf] sm:$0xff]  ;;  %v7809_v8 = vld [vmem:[#allocation10 + $0xc0] sm:$0xff] }
 0x22d   :  { %v3242_v45 = vld [vmem:[#allocation2 + $0x1c9] sm:$0xff]  ;;  %v3243_v2 = vld [vmem:[#allocation2 + $0x1d1] sm:$0xff]  ;;  %v3020_v17 = vpack.c.bf16 %v2988_v38, %v2988_v38  ;;  %3084 = vst [vmem:[#allocation2 + $0x1e8] sm:$0xff] %v2988_v38  ;;  %v3179_v33 = vpack.c.bf16 %v3115_v3, %v3115_v3  ;;  %3866 = vmatpush.bf16.msra.mxu0 %v7809_v8  ;;  %v7728_v8 = vld [vmem:[#allocation3 + $0x13c] sm:$0xf] }
 0x22e   :  { %v3275_v46 = vsel %vm74_vm1, 0.0, %v3243_v2  ;;  %v3306_v19 = vpack.c.bf16 %v3242_v45, %v3242_v45  ;;  %v2010_v15 = vadd.f32 %v2009_v53, %v1931_v58  ;;  %v7832_v53 = vld [vmem:[#allocation10 + $0x178] sm:$0xff] }
 0x22f   :  { %2627 = vmatmul.bf16.gmra.mxu1 %v6600_v48  ;;  %2706 = vmatmul.bf16.gmra.mxu2 %v6604_v24  ;;  %3211 = vst [vmem:[#allocation3 + $0x15c] sm:$0xf] %v3179_v33  ;;  %v3307_v35 = vpack.c.bf16 %v3275_v46, %v3275_v46  ;;  %v7824_v48 = vld [vmem:[#allocation10 + $0x138] sm:$0xff]  ;;  %v7729_v33 = vld [vmem:[#allocation3 + $0x140] sm:$0xf0]  ;;  %v7823_v46 = vld [vmem:[#allocation10 + $0x130] sm:$0xff] }
 0x230   :  { %v2039_v16 = vadd.f32 %v2010_v15, %v8803_v59  ;;  %2775 = vmatmul.bf16.gmra.mxu3 %v6584_v40  ;;  %3052 = vst [vmem:[#allocation3 + $0x16c] sm:$0xf] %v3020_v17  ;;  %4037 = vmatpush.bf16.msra.mxu2 %v7832_v53  ;;  %v8872_v40 = vld [vmem:[#allocation3 + $0x168] sm:$0xf]  ;;  %v9570_v45 = vld [vmem:[#allocation22_spill] sm:$0xff]  ;;  %v2660_v53 = vadd.f32 %v8828_v10, %v8825_v63 }
 0x231   :  { %3338 = vst [vmem:[#allocation3 + $0x158] sm:$0xf] %v3306_v19  ;;  %3948 = vmatpush.bf16.msrb.mxu1 %v7824_v48  ;;  %v6611_v17 = vld [vmem:[#allocation3 + $0x138] sm:$0xf]  ;;  %v7831_v19 = vld [vmem:[#allocation10 + $0x170] sm:$0xff] }
 0x232   :  { %vm2925_vm5 = vcmp.ge.f32.partialorder %v2039_v16, 0.0  ;;  %v2957_v27 = vmul.f32 0.2, %v2039_v16  ;;  %v8866_v31 = vpop.f32.mrf.mxu2  ;;  %3339 = vst [vmem:[#allocation3 + $0x164] sm:$0xf] %v3307_v35 }
 0x233   :  { %v2736_v24 = vpop.f32.mrf.mxu3  ;;  %v6613_v35 = vld [vmem:[#allocation3 + $0x144] sm:$0xf0] }
 0x234   :  { %v2989_v38 = vsel %vm2925_vm5, %v2039_v16, %v2957_v27  ;;  %v2737_v61 = vadd.f32 %v2736_v24, %v2658_v11  ;;  %v8868_v58 = vpop.f32.mrf.mxu1  ;;  %v3116_v59 = vld [vmem:[#allocation2 + $0x1e7] sm:$0xff]  ;;  %4038 = vmatpush.bf16.msra.mxu2 %v7831_v19  ;;  %v6595_v16 = vld [vmem:[#allocation3 + $0x110] sm:$0xf]  ;;  %v7724_v27 = vld [vmem:[#allocation3 + $0x118] sm:$0xf0] }
 0x235   :  { %v3021_v50 = vpack.c.bf16 %v2989_v38, %v2989_v38  ;;  %3085 = vst [vmem:[#allocation2 + $0x1f0] sm:$0xff] %v2989_v38  ;;  %v3148_v3 = vsel %vm71_vm0, 0.0, %v3116_v59  ;;  %3949 = vmatpush.bf16.msrb.mxu1 %v7823_v46  ;;  %v7822_v38 = vld [vmem:[#allocation10 + $0x128] sm:$0xff] }
 0x236   :  { %v2806_v2 = vadd.f32 %v2737_v61, %v9570_v45  ;;  %v3180_v15 = vpack.c.bf16 %v3148_v3, %v3148_v3  ;;  %v7830_v61 = vld [vmem:[#allocation10 + $0x168] sm:$0xff]  ;;  %v6612_v45 = vor.u32 %v7729_v33, %v6611_v17  ;;  %v7821_v33 = vld [vmem:[#allocation10 + $0x120] sm:$0xff] }
 0x237   :  { %3053 = vst [vmem:[#allocation3 + $0x178] sm:$0xf] %v3021_v50  ;;  %v6616_v50 = vor.u32 %v7728_v8, %v6613_v35  ;;  %v7829_v8 = vld [vmem:[#allocation10 + $0x160] sm:$0xff]  ;;  %v8888_v35 = vld [vmem:[#allocation3 + $0x170] sm:$0xf] }
 0x238   :  { %vm2894_vm6 = vcmp.ge.f32.partialorder %v2806_v2, 0.0  ;;  %v2926_v11 = vmul.f32 0.2, %v2806_v2  ;;  %3212 = vst [vmem:[#allocation3 + $0x168] sm:$0xf] %v3180_v15  ;;  %v6596_v15 = vor.u32 %v7724_v27, %v6595_v16  ;;  %4039 = vmatpush.bf16.msra.mxu2 %v7830_v61  ;;  %v2663_v27 = vadd.f32 %v8836_v28, %v8831_v14 }
 0x239   :  { %3950 = vmatpush.bf16.msrb.mxu1 %v7822_v38  ;;  %v8890_v16 = vld [vmem:[#allocation3 + $0x178] sm:$0xf0] }
 0x23a   :  { %v2958_v48 = vsel %vm2894_vm6, %v2806_v2, %v2926_v11  ;;  %v8879_v24 = vpop.f32.mrf.mxu2 }
 0x23b   :  { %v2990_v59 = vpack.c.bf16 %v2958_v48, %v2958_v48  ;;  %3054 = vst [vmem:[#allocation2 + $0x8] sm:$0xff] %v2958_v48  ;;  %v2738_v3 = vpop.f32.mrf.mxu3 }
 0x23c   :  { %v2739_v46 = vadd.f32 %v2738_v3, %v2660_v53  ;;  %v8883_v19 = vpop.f32.mrf.mxu1  ;;  %v3117_v21 = vld [vmem:[#allocation2 + $0x1ef] sm:$0xff]  ;;  %4040 = vmatpush.bf16.msra.mxu2 %v7829_v8  ;;  %v7828_v3 = vld [vmem:[#allocation10 + $0x158] sm:$0xff] }
 0x23d   :  { %v3244_v63 = vld [vmem:[#allocation2 + $0x1e9] sm:$0xff]  ;;  %v3245_v10 = vld [vmem:[#allocation2 + $0x1f1] sm:$0xff]  ;;  %3022 = vst [vmem:[#allocation3 + $0x4] sm:$0xf] %v2990_v59  ;;  %v3181_v2 = vpack.c.bf16 %v3117_v21, %v3117_v21  ;;  %3951 = vmatpush.bf16.msrb.mxu1 %v7821_v33 }
 0x23e   :  { %v3277_v11 = vsel %vm74_vm1, 0.0, %v3245_v10  ;;  %v3308_v48 = vpack.c.bf16 %v3244_v63, %v3244_v63  ;;  %v2807_v17 = vadd.f32 %v2739_v46, %v9571_v36  ;;  %v7820_v59 = vld [vmem:[#allocation10 + $0x118] sm:$0xff]  ;;  %v6607_v33 = vld [vmem:[#allocation3 + $0x128] sm:$0xf]  ;;  %v7727_v8 = vld [vmem:[#allocation3 + $0x130] sm:$0xf0] }
 0x23f   :  { %v3309_v53 = vpack.c.bf16 %v3277_v11, %v3277_v11  ;;  %2632 = vmatmul.bf16.gmra.mxu1 %v6612_v45  ;;  %2711 = vmatmul.bf16.gmra.mxu2 %v6616_v50  ;;  %3213 = vst [vmem:[#allocation3 + $0x174] sm:$0xf] %v3181_v2  ;;  %v7890_v2 = vld [vmem:[#allocation10 + $0x78] sm:$0xff]  ;;  %v7819_v11 = vld [vmem:[#allocation10 + $0x110] sm:$0xff] }
 0x240   :  { %vm2895_vm7 = vcmp.ge.f32.partialorder %v2807_v17, 0.0  ;;  %v2927_v21 = vmul.f32 0.2, %v2807_v17  ;;  %2780 = vmatmul.bf16.gmra.mxu3 %v6596_v15  ;;  %3340 = vst [vmem:[#allocation3 + $0x170] sm:$0xf] %v3308_v48  ;;  %4041 = vmatpush.bf16.msra.mxu2 %v7828_v3  ;;  %v9572_v15 = vld [vmem:[#allocation26_spill] sm:$0xff]  ;;  %v6624_v3 = vor.u32 %v8850_v56, %v8843_v51 }
 0x241   :  { %3341 = vst [vmem:[#allocation3 + $0x17c] sm:$0xf] %v3309_v53  ;;  %3952 = vmatpush.bf16.msrb.mxu1 %v7820_v59  ;;  %v7827_v48 = vld [vmem:[#allocation10 + $0x150] sm:$0xff]  ;;  %4737 = vmatpush.bf16.msrb.mxu0 %v7890_v2  ;;  %v2665_v53 = vadd.f32 %v8848_v62, %v8839_v12  ;;  %v7818_v12 = vld [vmem:[#allocation10 + $0x108] sm:$0xff] }
 0x242   :  { %v3086_v36 = vld [vmem:[#allocation2 + $0x7] sm:$0xff]  ;;  %v2959_v38 = vsel %vm2895_vm7, %v2807_v17, %v2927_v21  ;;  %v8894_v61 = vpop.f32.mrf.mxu2 }
 0x243   :  { %v3118_v45 = vsel %vm71_vm0, 0.0, %v3086_v36  ;;  %v2991_v50 = vpack.c.bf16 %v2959_v38, %v2959_v38  ;;  %3055 = vst [vmem:[#allocation2 + $0x10] sm:$0xff] %v2959_v38  ;;  %v2741_v46 = vpop.f32.mrf.mxu3  ;;  %v7826_v62 = vld [vmem:[#allocation10 + $0x148] sm:$0xff] }
 0x244   :  { %v3150_v14 = vpack.c.bf16 %v3118_v45, %v3118_v45  ;;  %v2742_v28 = vadd.f32 %v2741_v46, %v2663_v27  ;;  %v8898_v63 = vpop.f32.mrf.mxu1  ;;  %4042 = vmatpush.bf16.msra.mxu2 %v7827_v48  ;;  %v6608_v48 = vor.u32 %v7727_v8, %v6607_v33  ;;  %v9573_v51 = vld [vmem:[#allocation28_spill] sm:$0xff] }
 0x245   :  { %3023 = vst [vmem:[#allocation3 + $0x10] sm:$0xf] %v2991_v50  ;;  %3953 = vmatpush.bf16.msrb.mxu1 %v7819_v11 }
 0x246   :  { %3182 = vst [vmem:[#allocation3] sm:$0xf] %v3150_v14  ;;  %v2808_v10 = vadd.f32 %v2742_v28, %v9572_v15  ;;  %v6628_v28 = vor.u32 %v8833_v22, %v8841_v1  ;;  %v2668_v22 = vadd.f32 %v8866_v31, %v8853_v30 }
 0x248   :  { %vm2896_vm8 = vcmp.ge.f32.partialorder %v2808_v10, 0.0  ;;  %v2928_v17 = vmul.f32 0.2, %v2808_v10  ;;  %4043 = vmatpush.bf16.msra.mxu2 %v7826_v62 }
 0x249   :  { %3954 = vmatpush.bf16.msrb.mxu1 %v7818_v12  ;;  %v7881_v12 = vld [vmem:[#allocation10 + $0x30] sm:$0xff] }
 0x24a   :  { %v3087_v27 = vld [vmem:[#allocation2 + $0xf] sm:$0xff]  ;;  %v2960_v38 = vsel %vm2896_vm8, %v2808_v10, %v2928_v17  ;;  %v8903_v59 = vpop.f32.mrf.mxu2  ;;  %v7817_v17 = vld [vmem:[#allocation10 + $0x100] sm:$0xff] }
 0x24b   :  { %v3214_v21 = vld [vmem:[#allocation2 + $0x9] sm:$0xff]  ;;  %v3215_v36 = vld [vmem:[#allocation2 + $0x11] sm:$0xff]  ;;  %v3151_v45 = vpack.c.bf16 %v3087_v27, %v3087_v27  ;;  %3056 = vst [vmem:[#allocation2 + $0x28] sm:$0xff] %v2960_v38  ;;  %v2743_v14 = vpop.f32.mrf.mxu3  ;;  %v2992_v2 = vpack.c.bf16 %v2960_v38, %v2960_v38  ;;  %v7825_v27 = vld [vmem:[#allocation10 + $0x140] sm:$0xff] }
 0x24c   :  { %v3247_v50 = vsel %vm74_vm1, 0.0, %v3215_v36  ;;  %v3278_v46 = vpack.c.bf16 %v3214_v21, %v3214_v21  ;;  %v2744_v10 = vadd.f32 %v2743_v14, %v2665_v53  ;;  %v8911_v11 = vpop.f32.mrf.mxu1  ;;  %4044 = vmatpush.bf16.msra.mxu2 %v7825_v27  ;;  %v7882_v21 = vld [vmem:[#allocation10 + $0x38] sm:$0xff] }
 0x24d   :  { %v3279_v15 = vpack.c.bf16 %v3247_v50, %v3247_v50  ;;  %3183 = vst [vmem:[#allocation3 + $0xc] sm:$0xf] %v3151_v45  ;;  %3955 = vmatpush.bf16.msrb.mxu1 %v7817_v17  ;;  %v6743_v31 = vld [vmem:[#allocation3] sm:$0xf]  ;;  %4658 = vmatpush.bf16.msrb.mxu3 %v7882_v21  ;;  %v7880_v21 = vld [vmem:[#allocation10 + $0x28] sm:$0xff] }
 0x24e   :  { %3310 = vst [vmem:[#allocation3 + $0x8] sm:$0xf] %v3278_v46  ;;  %v2809_v56 = vadd.f32 %v2744_v10, %v9573_v51  ;;  %v2670_v10 = vadd.f32 %v8879_v24, %v8868_v58 }
 0x24f   :  { %3311 = vst [vmem:[#allocation3 + $0x14] sm:$0xf] %v3279_v15  ;;  %2637 = vmatmul.bf16.gmra.mxu1 %v6624_v3  ;;  %2716 = vmatmul.bf16.gmra.mxu2 %v6628_v28  ;;  %v6619_v15 = vld [vmem:[#allocation3 + $0x140] sm:$0xf] }
 0x250   :  { %3024 = vst [vmem:[#allocation3 + $0x1c] sm:$0xf] %v2992_v2  ;;  %vm2897_vm9 = vcmp.ge.f32.partialorder %v2809_v56, 0.0  ;;  %v2929_v1 = vmul.f32 0.2, %v2809_v56  ;;  %2785 = vmatmul.bf16.gmra.mxu3 %v6608_v48 }
 0x251   :  { %4659 = vmatpush.bf16.msrb.mxu3 %v7881_v12  ;;  %v7730_v2 = vld [vmem:[#allocation3 + $0x148] sm:$0xf0] }
 0x252   :  { %v3088_v33 = vld [vmem:[#allocation2 + $0x27] sm:$0xff]  ;;  %v2961_v8 = vsel %vm2897_vm9, %v2809_v56, %v2929_v1  ;;  %v8916_v53 = vpop.f32.mrf.mxu2 }
 0x253   :  { %v3120_v36 = vsel %vm71_vm0, 0.0, %v3088_v33  ;;  %v2993_v38 = vpack.c.bf16 %v2961_v8, %v2961_v8  ;;  %3057 = vst [vmem:[#allocation2 + $0x30] sm:$0xff] %v2961_v8  ;;  %v2746_v3 = vpop.f32.mrf.mxu3  ;;  %v6640_v33 = vor.u32 %v8855_v26, %v8870_v32  ;;  %v2673_v26 = vadd.f32 %v8894_v61, %v8883_v19 }
 0x254   :  { %v3152_v45 = vpack.c.bf16 %v3120_v36, %v3120_v36  ;;  %v2747_v50 = vadd.f32 %v2746_v3, %v2668_v22  ;;  %v8920_v30 = vpop.f32.mrf.mxu1  ;;  %v7762_v46 = vld [vmem:[#allocation3 + $0x8] sm:$0xf0]  ;;  %v6636_v22 = vor.u32 %v8881_v57, %v8872_v40  ;;  %v7879_v40 = vld [vmem:[#allocation10 + $0x20] sm:$0xff] }
 0x255   :  { %3025 = vst [vmem:[#allocation3 + $0x28] sm:$0xf] %v2993_v38  ;;  %v6744_v14 = vor.u32 %v7762_v46, %v6743_v31  ;;  %v6620_v38 = vor.u32 %v7730_v2, %v6619_v15  ;;  %4660 = vmatpush.bf16.msrb.mxu3 %v7880_v21 }
 0x256   :  { %3184 = vst [vmem:[#allocation3 + $0x18] sm:$0xf] %v3152_v45  ;;  %v2810_v28 = vadd.f32 %v2747_v50, %v8723_v49 }
 0x257   :  { %3867 = vmatmul.bf16.vlgmr.msra.gmra.mxu0 %v6744_v14  ;;  %v7878_v14 = vld [vmem:[#allocation10 + $0x18] sm:$0xff] }
 0x258   :  { %vm2898_vm10 = vcmp.ge.f32.partialorder %v2810_v28, 0.0  ;;  %v2930_v62 = vmul.f32 0.2, %v2810_v28 }
 0x259   :  { %4661 = vmatpush.bf16.msrb.mxu3 %v7879_v40  ;;  %v7876_v40 = vld [vmem:[#allocation10 + $0x8] sm:$0xff] }
 0x25a   :  { %v3089_v48 = vld [vmem:[#allocation2 + $0x2f] sm:$0xff]  ;;  %v2962_v17 = vsel %vm2898_vm10, %v2810_v28, %v2930_v62  ;;  %v8925_v27 = vpop.f32.mrf.mxu2 }
 0x25b   :  { %v3216_v51 = vld [vmem:[#allocation2 + $0x29] sm:$0xff]  ;;  %v3217_v56 = vld [vmem:[#allocation2 + $0x31] sm:$0xff]  ;;  %v2994_v49 = vpack.c.bf16 %v2962_v17, %v2962_v17  ;;  %3058 = vst [vmem:[#allocation2 + $0x48] sm:$0xff] %v2962_v17  ;;  %v2748_v1 = vpop.f32.mrf.mxu3  ;;  %v3153_v8 = vpack.c.bf16 %v3089_v48, %v3089_v48 }
 0x25c   :  { %v3249_v58 = vsel %vm74_vm1, 0.0, %v3217_v56  ;;  %v2749_v24 = vadd.f32 %v2748_v1, %v2670_v10  ;;  %v8933_v36 = vpop.f32.mrf.mxu1  ;;  %v3280_v3 = vpack.c.bf16 %v3216_v51, %v3216_v51  ;;  %v7889_v51 = vld [vmem:[#allocation10 + $0x70] sm:$0xff] }
 0x25d   :  { %v3281_v45 = vpack.c.bf16 %v3249_v58, %v3249_v58  ;;  %3026 = vst [vmem:[#allocation3 + $0x34] sm:$0xf] %v2994_v49  ;;  %v6755_v19 = vld [vmem:[#allocation3 + $0x18] sm:$0xf]  ;;  %4662 = vmatpush.bf16.msrb.mxu3 %v7878_v14  ;;  %v7877_v56 = vld [vmem:[#allocation10 + $0x10] sm:$0xff]  ;;  %4738 = vmatpush.bf16.msrb.mxu0 %v7889_v51 }
 0x25e   :  { %v2811_v57 = vadd.f32 %v2749_v24, %v8740_v6  ;;  %3185 = vst [vmem:[#allocation3 + $0x24] sm:$0xf] %v3153_v8  ;;  %v6751_v49 = vld [vmem:[#allocation3 + $0x8] sm:$0xf]  ;;  %v7763_v1 = vld [vmem:[#allocation3 + $0x10] sm:$0xf0] }
 0x25f   :  { %2642 = vmatmul.bf16.gmra.mxu1 %v6636_v22  ;;  %2721 = vmatmul.bf16.gmra.mxu2 %v6640_v33  ;;  %3312 = vst [vmem:[#allocation3 + $0x20] sm:$0xf] %v3280_v3  ;;  %v6745_v22 = vld [vmem:[#allocation3 + $0xc] sm:$0xf0]  ;;  %v2675_v33 = vadd.f32 %v8903_v59, %v8898_v63  ;;  %v6632_v63 = vor.u32 %v8864_v55, %v8859_v44  ;;  %v7761_v59 = vld [vmem:[#allocation3 + $0x4] sm:$0xf] }
 0x260   :  { %vm2899_vm11 = vcmp.ge.f32.partialorder %v2811_v57, 0.0  ;;  %v2931_v32 = vmul.f32 0.2, %v2811_v57  ;;  %2790 = vmatmul.bf16.gmra.mxu3 %v6620_v38  ;;  %3313 = vst [vmem:[#allocation3 + $0x2c] sm:$0xf] %v3281_v45  ;;  %v6748_v14 = vor.u32 %v7761_v59, %v6745_v22 }
 0x261   :  { %4663 = vmatpush.bf16.msrb.mxu3 %v7877_v56 }
 0x262   :  { %v3090_v50 = vld [vmem:[#allocation2 + $0x47] sm:$0xff]  ;;  %v2963_v31 = vsel %vm2899_vm11, %v2811_v57, %v2931_v32  ;;  %v8938_v46 = vpop.f32.mrf.mxu2 }
 0x263   :  { %v3122_v6 = vsel %vm71_vm0, 0.0, %v3090_v50  ;;  %v2995_v28 = vpack.c.bf16 %v2963_v31, %v2963_v31  ;;  %3059 = vst [vmem:[#allocation2 + $0x50] sm:$0xff] %v2963_v31  ;;  %v2751_v12 = vpop.f32.mrf.mxu3 }
 0x264   :  { %v3154_v62 = vpack.c.bf16 %v3122_v6, %v3122_v6  ;;  %v2752_v15 = vadd.f32 %v2751_v12, %v2673_v26  ;;  %v8942_v2 = vpop.f32.mrf.mxu1  ;;  %v6752_v6 = vor.u32 %v7763_v1, %v6751_v49  ;;  %v7875_v12 = vld [vmem:[#allocation10] sm:$0xff]  ;;  %v6757_v1 = vld [vmem:[#allocation3 + $0x24] sm:$0xf0] }
 0x265   :  { %3027 = vst [vmem:[#allocation3 + $0x40] sm:$0xf] %v2995_v28  ;;  %v7765_v61 = vld [vmem:[#allocation3 + $0x20] sm:$0xf0]  ;;  %4664 = vmatpush.bf16.msrb.mxu3 %v7876_v40 }
 0x266   :  { %3186 = vst [vmem:[#allocation3 + $0x30] sm:$0xf] %v3154_v62  ;;  %v2812_v10 = vadd.f32 %v2752_v15, %v8751_v13  ;;  %v6756_v48 = vor.u32 %v7765_v61, %v6755_v19  ;;  %v2678_v62 = vadd.f32 %v8916_v53, %v8911_v11 }
 0x268   :  { %vm2900_vm12 = vcmp.ge.f32.partialorder %v2812_v10, 0.0  ;;  %v2932_v17 = vmul.f32 0.2, %v2812_v10  ;;  %3872 = vmatmul.bf16.gmra.mxu0 %v6756_v48 }
 0x269   :  { %4665 = vmatpush.bf16.msrb.mxu3 %v7875_v12  ;;  %v2683_v12 = vadd.f32 %v8938_v46, %v8933_v36 }
 0x26a   :  { %v3091_v8 = vld [vmem:[#allocation2 + $0x4f] sm:$0xff]  ;;  %v2964_v24 = vsel %vm2900_vm12, %v2812_v10, %v2932_v17  ;;  %v8947_v38 = vpop.f32.mrf.mxu2 }
 0x26b   :  { %v3218_v21 = vld [vmem:[#allocation2 + $0x49] sm:$0xff]  ;;  %v3219_v58 = vld [vmem:[#allocation2 + $0x51] sm:$0xff]  ;;  %v3155_v13 = vpack.c.bf16 %v3091_v8, %v3091_v8  ;;  %3060 = vst [vmem:[#allocation2 + $0x68] sm:$0xff] %v2964_v24  ;;  %v2753_v57 = vpop.f32.mrf.mxu3  ;;  %v2996_v32 = vpack.c.bf16 %v2964_v24, %v2964_v24 }
 0x26c   :  { %v3251_v3 = vsel %vm74_vm1, 0.0, %v3219_v58  ;;  %v3282_v45 = vpack.c.bf16 %v3218_v21, %v3218_v21  ;;  %v2754_v50 = vadd.f32 %v2753_v57, %v2675_v33  ;;  %v8951_v31 = vpop.f32.mrf.mxu1  ;;  %v6763_v33 = vld [vmem:[#allocation3 + $0x20] sm:$0xf]  ;;  %v7766_v8 = vld [vmem:[#allocation3 + $0x28] sm:$0xf0]  ;;  %v2680_v21 = vadd.f32 %v8925_v27, %v8920_v30 }
 0x26d   :  { %v3283_v26 = vpack.c.bf16 %v3251_v3, %v3251_v3  ;;  %3187 = vst [vmem:[#allocation3 + $0x3c] sm:$0xf] %v3155_v13  ;;  %v6767_v11 = vld [vmem:[#allocation3 + $0x30] sm:$0xf]  ;;  %v6644_v30 = vor.u32 %v8890_v16, %v8888_v35  ;;  %v7764_v27 = vld [vmem:[#allocation3 + $0x1c] sm:$0xf] }
 0x26e   :  { %3314 = vst [vmem:[#allocation3 + $0x38] sm:$0xf] %v3282_v45  ;;  %v2813_v28 = vadd.f32 %v2754_v50, %v8770_v20 }
 0x26f   :  { %3315 = vst [vmem:[#allocation3 + $0x44] sm:$0xf] %v3283_v26  ;;  %3956 = vmatmul.bf16.vlgmr.msrb.gmra.mxu1 %v6748_v14  ;;  %4045 = vmatmul.bf16.vlgmr.msra.gmra.mxu2 %v6752_v6  ;;  %v6760_v14 = vor.u32 %v7764_v27, %v6757_v1  ;;  %v6764_v6 = vor.u32 %v7766_v8, %v6763_v33 }
 0x270   :  { %3028 = vst [vmem:[#allocation3 + $0x4c] sm:$0xf] %v2996_v32  ;;  %vm2901_vm13 = vcmp.ge.f32.partialorder %v2813_v28, 0.0  ;;  %v2933_v15 = vmul.f32 0.2, %v2813_v28  ;;  %2795 = vmatmul.bf16.gmra.mxu3 %v6632_v63  ;;  %v2685_v1 = vadd.f32 %v8947_v38, %v8942_v2 }
 0x271   :  { %v7767_v2 = vld [vmem:[#allocation3 + $0x34] sm:$0xf] }
 0x272   :  { %v3092_v44 = vld [vmem:[#allocation2 + $0x67] sm:$0xff]  ;;  %v2965_v55 = vsel %vm2901_vm13, %v2813_v28, %v2933_v15  ;;  %v8958_v19 = vpop.f32.mrf.mxu2 }
 0x273   :  { %v3124_v61 = vsel %vm71_vm0, 0.0, %v3092_v44  ;;  %v2997_v20 = vpack.c.bf16 %v2965_v55, %v2965_v55  ;;  %3061 = vst [vmem:[#allocation2 + $0x70] sm:$0xff] %v2965_v55  ;;  %v2756_v10 = vpop.f32.mrf.mxu3 }
 0x274   :  { %v3156_v48 = vpack.c.bf16 %v3124_v61, %v3124_v61  ;;  %v2757_v51 = vadd.f32 %v2756_v10, %v2678_v62  ;;  %v8962_v56 = vpop.f32.mrf.mxu1  ;;  %v7768_v53 = vld [vmem:[#allocation3 + $0x38] sm:$0xf0] }
 0x275   :  { %3029 = vst [vmem:[#allocation3 + $0x58] sm:$0xf] %v2997_v20  ;;  %v6768_v17 = vor.u32 %v7768_v53, %v6767_v11  ;;  %v7888_v11 = vld [vmem:[#allocation10 + $0x68] sm:$0xff] }
 0x276   :  { %3188 = vst [vmem:[#allocation3 + $0x48] sm:$0xf] %v3156_v48  ;;  %v2814_v22 = vadd.f32 %v2757_v51, %v8780_v23  ;;  %4739 = vmatpush.bf16.msrb.mxu0 %v7888_v11 }
 0x278   :  { %vm2902_vm14 = vcmp.ge.f32.partialorder %v2814_v22, 0.0  ;;  %v2934_v49 = vmul.f32 0.2, %v2814_v22  ;;  %3877 = vmatmul.bf16.gmra.mxu0 %v6768_v17  ;;  %v6769_v17 = vld [vmem:[#allocation3 + $0x3c] sm:$0xf0] }
 0x279   :  { %v6772_v38 = vor.u32 %v7767_v2, %v6769_v17 }
 0x27a   :  { %v3093_v58 = vld [vmem:[#allocation2 + $0x6f] sm:$0xff]  ;;  %v2966_v3 = vsel %vm2902_vm14, %v2814_v22, %v2934_v49  ;;  %v8967_v45 = vpop.f32.mrf.mxu2  ;;  %v6775_v22 = vld [vmem:[#allocation3 + $0x38] sm:$0xf]  ;;  %v7769_v49 = vld [vmem:[#allocation3 + $0x40] sm:$0xf0] }
 0x27b   :  { %v3220_v24 = vld [vmem:[#allocation2 + $0x69] sm:$0xff]  ;;  %v3221_v13 = vld [vmem:[#allocation2 + $0x71] sm:$0xff]  ;;  %v3157_v57 = vpack.c.bf16 %v3093_v58, %v3093_v58  ;;  %3062 = vst [vmem:[#allocation2 + $0x88] sm:$0xff] %v2966_v3  ;;  %v2758_v26 = vpop.f32.mrf.mxu3  ;;  %v2998_v50 = vpack.c.bf16 %v2966_v3, %v2966_v3 }
 0x27c   :  { %v3253_v40 = vsel %vm74_vm1, 0.0, %v3221_v13  ;;  %v3284_v23 = vpack.c.bf16 %v3220_v24, %v3220_v24  ;;  %v2759_v63 = vadd.f32 %v2758_v26, %v2680_v21  ;;  %v8971_v59 = vpop.f32.mrf.mxu1 }
 0x27d   :  { %v3285_v32 = vpack.c.bf16 %v3253_v40, %v3253_v40  ;;  %3189 = vst [vmem:[#allocation3 + $0x54] sm:$0xf] %v3157_v57  ;;  %v6779_v48 = vld [vmem:[#allocation3 + $0x48] sm:$0xf]  ;;  %v7834_v40 = vld [vmem:[#allocation3 + $0x8] sm:$0xf0] }
 0x27e   :  { %3316 = vst [vmem:[#allocation3 + $0x50] sm:$0xf] %v3284_v23  ;;  %v2815_v28 = vadd.f32 %v2759_v63, %v8796_v47  ;;  %v6776_v63 = vor.u32 %v7769_v49, %v6775_v22 }
 0x27f   :  { %3317 = vst [vmem:[#allocation3 + $0x5c] sm:$0xf] %v3285_v32  ;;  %3961 = vmatmul.bf16.gmra.mxu1 %v6760_v14  ;;  %4050 = vmatmul.bf16.gmra.mxu2 %v6764_v6  ;;  %v2688_v6 = vadd.f32 %v8958_v19, %v8951_v31 }
 0x280   :  { %3030 = vst [vmem:[#allocation3 + $0x64] sm:$0xf] %v2998_v50  ;;  %vm2903_vm15 = vcmp.ge.f32.partialorder %v2815_v28, 0.0  ;;  %v2935_v62 = vmul.f32 0.2, %v2815_v28  ;;  %2800 = vmatmul.bf16.gmra.mxu3 %v6644_v30 }
 0x281   :  { %v7031_v30 = vld [vmem:[#allocation3] sm:$0xf] }
 0x282   :  { %v3094_v15 = vld [vmem:[#allocation2 + $0x87] sm:$0xff]  ;;  %v2967_v44 = vsel %vm2903_vm15, %v2815_v28, %v2935_v62  ;;  %v8978_v35 = vpop.f32.mrf.mxu2  ;;  %v7032_v14 = vor.u32 %v7834_v40, %v7031_v30 }
 0x283   :  { %v3126_v16 = vsel %vm71_vm0, 0.0, %v3094_v15  ;;  %v2999_v55 = vpack.c.bf16 %v2967_v44, %v2967_v44  ;;  %3063 = vst [vmem:[#allocation2 + $0x90] sm:$0xff] %v2967_v44  ;;  %v2761_v47 = vpop.f32.mrf.mxu3 }
 0x284   :  { %v3158_v61 = vpack.c.bf16 %v3126_v16, %v3126_v16  ;;  %v2762_v20 = vadd.f32 %v2761_v47, %v2683_v12  ;;  %v8982_v10 = vpop.f32.mrf.mxu1  ;;  %v7771_v36 = vld [vmem:[#allocation3 + $0x50] sm:$0xf0] }
 0x285   :  { %3031 = vst [vmem:[#allocation3 + $0x70] sm:$0xf] %v2999_v55  ;;  %v6780_v46 = vor.u32 %v7771_v36, %v6779_v48 }
 0x286   :  { %3190 = vst [vmem:[#allocation3 + $0x60] sm:$0xf] %v3158_v61  ;;  %v2816_v51 = vadd.f32 %v2762_v20, %v8806_v43  ;;  %v7772_v11 = vld [vmem:[#allocation3 + $0x58] sm:$0xf0] }
 0x288   :  { %vm2904_vm2 = vcmp.ge.f32.partialorder %v2816_v51, 0.0  ;;  %v2936_v53 = vmul.f32 0.2, %v2816_v51  ;;  %3882 = vmatmul.bf16.gmra.mxu0 %v6780_v46  ;;  %v6781_v46 = vld [vmem:[#allocation3 + $0x54] sm:$0xf0] }
 0x28a   :  { %v3095_v33 = vld [vmem:[#allocation2 + $0x8f] sm:$0xff]  ;;  %v2968_v58 = vsel %vm2904_vm2, %v2816_v51, %v2936_v53  ;;  %v8987_v24 = vpop.f32.mrf.mxu2  ;;  %v2690_v53 = vadd.f32 %v8967_v45, %v8962_v56 }
 0x28b   :  { %v3222_v8 = vld [vmem:[#allocation2 + $0x89] sm:$0xff]  ;;  %v3223_v21 = vld [vmem:[#allocation2 + $0x91] sm:$0xff]  ;;  %v3159_v13 = vpack.c.bf16 %v3095_v33, %v3095_v33  ;;  %3064 = vst [vmem:[#allocation2 + $0xa8] sm:$0xff] %v2968_v58  ;;  %v2763_v57 = vpop.f32.mrf.mxu3  ;;  %v3000_v26 = vpack.c.bf16 %v2968_v58, %v2968_v58 }
 0x28c   :  { %v3255_v43 = vsel %vm74_vm1, 0.0, %v3223_v21  ;;  %v3286_v3 = vpack.c.bf16 %v3222_v8, %v3222_v8  ;;  %v2764_v32 = vadd.f32 %v2763_v57, %v2685_v1  ;;  %v8991_v50 = vpop.f32.mrf.mxu1  ;;  %v6787_v51 = vld [vmem:[#allocation3 + $0x50] sm:$0xf]  ;;  %v7770_v56 = vld [vmem:[#allocation3 + $0x4c] sm:$0xf] }
 0x28d   :  { %v3287_v23 = vpack.c.bf16 %v3255_v43, %v3255_v43  ;;  %3191 = vst [vmem:[#allocation3 + $0x6c] sm:$0xf] %v3159_v13  ;;  %v6791_v20 = vld [vmem:[#allocation3 + $0x60] sm:$0xf]  ;;  %v7837_v13 = vld [vmem:[#allocation3 + $0x20] sm:$0xf0]  ;;  %v6784_v45 = vor.u32 %v7770_v56, %v6781_v46 }
 0x28e   :  { %3318 = vst [vmem:[#allocation3 + $0x68] sm:$0xf] %v3286_v3  ;;  %v2817_v27 = vadd.f32 %v2764_v32, %v8817_v34 }
 0x28f   :  { %3319 = vst [vmem:[#allocation3 + $0x74] sm:$0xf] %v3287_v23  ;;  %3966 = vmatmul.bf16.gmra.mxu1 %v6772_v38  ;;  %4055 = vmatmul.bf16.gmra.mxu2 %v6776_v63  ;;  %v6788_v23 = vor.u32 %v7772_v11, %v6787_v51  ;;  %v2693_v38 = vadd.f32 %v8978_v35, %v8971_v59 }
 0x290   :  { %3032 = vst [vmem:[#allocation3 + $0x7c] sm:$0xf] %v3000_v26  ;;  %vm2905_vm3 = vcmp.ge.f32.partialorder %v2817_v27, 0.0  ;;  %v2937_v28 = vmul.f32 0.2, %v2817_v27  ;;  %4666 = vmatmul.bf16.vlgmr.msrb.gmra.mxu3 %v7032_v14 }
 0x291   :  { %v7043_v26 = vld [vmem:[#allocation3 + $0x18] sm:$0xf] }
 0x292   :  { %v3096_v12 = vld [vmem:[#allocation2 + $0xa7] sm:$0xff]  ;;  %v2969_v62 = vsel %vm2905_vm3, %v2817_v27, %v2937_v28  ;;  %v8996_v15 = vpop.f32.mrf.mxu2  ;;  %v7044_v2 = vor.u32 %v7837_v13, %v7043_v26 }
 0x293   :  { %v3128_v44 = vsel %vm71_vm0, 0.0, %v3096_v12  ;;  %v3001_v16 = vpack.c.bf16 %v2969_v62, %v2969_v62  ;;  %3065 = vst [vmem:[#allocation2 + $0xb0] sm:$0xff] %v2969_v62  ;;  %v2766_v34 = vpop.f32.mrf.mxu3  ;;  %v2698_v56 = vadd.f32 %v8996_v15, %v8991_v50 }
 0x294   :  { %v3160_v55 = vpack.c.bf16 %v3128_v44, %v3128_v44  ;;  %v2767_v47 = vadd.f32 %v2766_v34, %v2688_v6  ;;  %v9000_v61 = vpop.f32.mrf.mxu1  ;;  %v7774_v31 = vld [vmem:[#allocation3 + $0x68] sm:$0xf0] }
 0x295   :  { %3033 = vst [vmem:[#allocation3 + $0x88] sm:$0xf] %v3001_v16  ;;  %v6792_v19 = vor.u32 %v7774_v31, %v6791_v20  ;;  %v6793_v20 = vld [vmem:[#allocation3 + $0x6c] sm:$0xf0]  ;;  %v6799_v31 = vld [vmem:[#allocation3 + $0x68] sm:$0xf] }
 0x296   :  { %3192 = vst [vmem:[#allocation3 + $0x78] sm:$0xf] %v3160_v55  ;;  %v2818_v48 = vadd.f32 %v2767_v47, %v8635_v54  ;;  %v7887_v55 = vld [vmem:[#allocation10 + $0x60] sm:$0xff] }
 0x297   :  { %4740 = vmatpush.bf16.msrb.mxu0 %v7887_v55 }
 0x298   :  { %vm2906_vm4 = vcmp.ge.f32.partialorder %v2818_v48, 0.0  ;;  %v2938_v36 = vmul.f32 0.2, %v2818_v48  ;;  %3887 = vmatmul.bf16.gmra.mxu0 %v6792_v19  ;;  %v7775_v19 = vld [vmem:[#allocation3 + $0x70] sm:$0xf0] }
 0x299   :  { %v6800_v13 = vor.u32 %v7775_v19, %v6799_v31 }
 0x29a   :  { %v3097_v17 = vld [vmem:[#allocation2 + $0xaf] sm:$0xff]  ;;  %v2970_v1 = vsel %vm2906_vm4, %v2818_v48, %v2938_v36  ;;  %v9005_v33 = vpop.f32.mrf.mxu2  ;;  %v2695_v48 = vadd.f32 %v8987_v24, %v8982_v10  ;;  %v7773_v10 = vld [vmem:[#allocation3 + $0x64] sm:$0xf] }
 0x29b   :  { %v3224_v22 = vld [vmem:[#allocation2 + $0xa9] sm:$0xff]  ;;  %v3225_v49 = vld [vmem:[#allocation2 + $0xb1] sm:$0xff]  ;;  %v3161_v8 = vpack.c.bf16 %v3097_v17, %v3097_v17  ;;  %3066 = vst [vmem:[#allocation2 + $0xc8] sm:$0xff] %v2970_v1  ;;  %v2768_v58 = vpop.f32.mrf.mxu3  ;;  %v3002_v3 = vpack.c.bf16 %v2970_v1, %v2970_v1  ;;  %v7840_v1 = vld [vmem:[#allocation3 + $0x38] sm:$0xf0]  ;;  %v6796_v24 = vor.u32 %v7773_v10, %v6793_v20 }
 0x29c   :  { %v3257_v21 = vsel %vm74_vm1, 0.0, %v3225_v49  ;;  %v3288_v54 = vpack.c.bf16 %v3224_v22, %v3224_v22  ;;  %v2769_v57 = vadd.f32 %v2768_v58, %v2690_v53  ;;  %v9009_v40 = vpop.f32.mrf.mxu1 }
 0x29d   :  { %v3289_v43 = vpack.c.bf16 %v3257_v21, %v3257_v21  ;;  %3193 = vst [vmem:[#allocation3 + $0x84] sm:$0xf] %v3161_v8  ;;  %v6803_v16 = vld [vmem:[#allocation3 + $0x78] sm:$0xf] }
 0x29e   :  { %3320 = vst [vmem:[#allocation3 + $0x80] sm:$0xf] %v3288_v54  ;;  %v2819_v32 = vadd.f32 %v2769_v57, %v8646_v0 }
 0x29f   :  { %3321 = vst [vmem:[#allocation3 + $0x8c] sm:$0xf] %v3289_v43  ;;  %3971 = vmatmul.bf16.gmra.mxu1 %v6784_v45  ;;  %4060 = vmatmul.bf16.gmra.mxu2 %v6788_v23  ;;  %v7055_v43 = vld [vmem:[#allocation3 + $0x30] sm:$0xf] }
 0x2a0   :  { %3034 = vst [vmem:[#allocation3 + $0x94] sm:$0xf] %v3002_v3  ;;  %vm2907_vm5 = vcmp.ge.f32.partialorder %v2819_v32, 0.0  ;;  %v2939_v63 = vmul.f32 0.2, %v2819_v32  ;;  %4671 = vmatmul.bf16.gmra.mxu3 %v7044_v2  ;;  %v7056_v57 = vor.u32 %v7840_v1, %v7055_v43 }
 0x2a2   :  { %v3098_v30 = vld [vmem:[#allocation2 + $0xc7] sm:$0xff]  ;;  %v2971_v27 = vsel %vm2907_vm5, %v2819_v32, %v2939_v63  ;;  %v9014_v14 = vpop.f32.mrf.mxu2 }
 0x2a3   :  { %v3130_v6 = vsel %vm71_vm0, 0.0, %v3098_v30  ;;  %v3003_v28 = vpack.c.bf16 %v2971_v27, %v2971_v27  ;;  %3067 = vst [vmem:[#allocation2 + $0xd0] sm:$0xff] %v2971_v27  ;;  %v2771_v0 = vpop.f32.mrf.mxu3 }
 0x2a4   :  { %v3162_v12 = vpack.c.bf16 %v3130_v6, %v3130_v6  ;;  %v2772_v62 = vadd.f32 %v2771_v0, %v2693_v38  ;;  %v9018_v44 = vpop.f32.mrf.mxu1  ;;  %v7777_v59 = vld [vmem:[#allocation3 + $0x80] sm:$0xf0] }
 0x2a5   :  { %3035 = vst [vmem:[#allocation3 + $0xa0] sm:$0xf] %v3003_v28  ;;  %v6804_v35 = vor.u32 %v7777_v59, %v6803_v16  ;;  %v2700_v59 = vadd.f32 %v9005_v33, %v9000_v61  ;;  %v7776_v61 = vld [vmem:[#allocation3 + $0x7c] sm:$0xf] }
 0x2a6   :  { %3194 = vst [vmem:[#allocation3 + $0x90] sm:$0xf] %v3162_v12  ;;  %v2820_v34 = vadd.f32 %v2772_v62, %v8657_v5  ;;  %v6805_v12 = vld [vmem:[#allocation3 + $0x84] sm:$0xf0]  ;;  %v6811_v62 = vld [vmem:[#allocation3 + $0x80] sm:$0xf] }
 0x2a7   :  { %v7778_v16 = vld [vmem:[#allocation3 + $0x88] sm:$0xf0]  ;;  %v6808_v33 = vor.u32 %v7776_v61, %v6805_v12 }
 0x2a8   :  { %vm2908_vm6 = vcmp.ge.f32.partialorder %v2820_v34, 0.0  ;;  %v2940_v47 = vmul.f32 0.2, %v2820_v34  ;;  %3892 = vmatmul.bf16.gmra.mxu0 %v6804_v35 }
 0x2aa   :  { %v3099_v36 = vld [vmem:[#allocation2 + $0xcf] sm:$0xff]  ;;  %v2972_v11 = vsel %vm2908_vm6, %v2820_v34, %v2940_v47  ;;  %v9023_v53 = vpop.f32.mrf.mxu2 }
 0x2ab   :  { %v3226_v46 = vld [vmem:[#allocation2 + $0xc9] sm:$0xff]  ;;  %v3227_v51 = vld [vmem:[#allocation2 + $0xd1] sm:$0xff]  ;;  %v3163_v17 = vpack.c.bf16 %v3099_v36, %v3099_v36  ;;  %3068 = vst [vmem:[#allocation2 + $0xe8] sm:$0xff] %v2972_v11  ;;  %v2773_v49 = vpop.f32.mrf.mxu3  ;;  %v3004_v21 = vpack.c.bf16 %v2972_v11, %v2972_v11 }
 0x2ac   :  { %v3259_v5 = vsel %vm74_vm1, 0.0, %v3227_v51  ;;  %v3290_v22 = vpack.c.bf16 %v3226_v46, %v3226_v46  ;;  %v2774_v54 = vadd.f32 %v2773_v49, %v2695_v48  ;;  %v9027_v58 = vpop.f32.mrf.mxu1  ;;  %v7843_v36 = vld [vmem:[#allocation3 + $0x50] sm:$0xf0] }
 0x2ad   :  { %v3291_v8 = vpack.c.bf16 %v3259_v5, %v3259_v5  ;;  %3195 = vst [vmem:[#allocation3 + $0x9c] sm:$0xf] %v3163_v17  ;;  %v6815_v6 = vld [vmem:[#allocation3 + $0x90] sm:$0xf]  ;;  %v6812_v5 = vor.u32 %v7778_v16, %v6811_v62 }
 0x2ae   :  { %3322 = vst [vmem:[#allocation3 + $0x98] sm:$0xf] %v3290_v22  ;;  %v2821_v3 = vadd.f32 %v2774_v54, %v8668_v18  ;;  %v7067_v22 = vld [vmem:[#allocation3 + $0x48] sm:$0xf] }
 0x2af   :  { %3323 = vst [vmem:[#allocation3 + $0xa4] sm:$0xf] %v3291_v8  ;;  %3976 = vmatmul.bf16.gmra.mxu1 %v6796_v24  ;;  %4065 = vmatmul.bf16.gmra.mxu2 %v6800_v13  ;;  %v7068_v1 = vor.u32 %v7843_v36, %v7067_v22  ;;  %v2703_v8 = vadd.f32 %v9014_v14, %v9009_v40 }
 0x2b0   :  { %3036 = vst [vmem:[#allocation3 + $0xac] sm:$0xf] %v3004_v21  ;;  %vm2909_vm7 = vcmp.ge.f32.partialorder %v2821_v3, 0.0  ;;  %v2941_v45 = vmul.f32 0.2, %v2821_v3  ;;  %4676 = vmatmul.bf16.gmra.mxu3 %v7056_v57 }
 0x2b2   :  { %v3100_v23 = vld [vmem:[#allocation2 + $0xe7] sm:$0xff]  ;;  %v2973_v26 = vsel %vm2909_vm7, %v2821_v3, %v2941_v45  ;;  %v9032_v32 = vpop.f32.mrf.mxu2 }
 0x2b3   :  { %v3132_v2 = vsel %vm71_vm0, 0.0, %v3100_v23  ;;  %v3005_v38 = vpack.c.bf16 %v2973_v26, %v2973_v26  ;;  %3069 = vst [vmem:[#allocation2 + $0xf0] sm:$0xff] %v2973_v26  ;;  %v2776_v18 = vpop.f32.mrf.mxu3  ;;  %v7886_v26 = vld [vmem:[#allocation10 + $0x58] sm:$0xff]  ;;  %v2708_v36 = vadd.f32 %v9032_v32, %v9027_v58 }
 0x2b4   :  { %v3164_v63 = vpack.c.bf16 %v3132_v2, %v3132_v2  ;;  %v2777_v30 = vadd.f32 %v2776_v18, %v2698_v56  ;;  %v9036_v27 = vpop.f32.mrf.mxu1  ;;  %v7780_v50 = vld [vmem:[#allocation3 + $0x98] sm:$0xf0]  ;;  %4741 = vmatpush.bf16.msrb.mxu0 %v7886_v26 }
 0x2b5   :  { %3037 = vst [vmem:[#allocation3 + $0xb8] sm:$0xf] %v3005_v38  ;;  %v6816_v15 = vor.u32 %v7780_v50, %v6815_v6  ;;  %v6817_v38 = vld [vmem:[#allocation3 + $0x9c] sm:$0xf0]  ;;  %v6823_v18 = vld [vmem:[#allocation3 + $0x98] sm:$0xf] }
 0x2b6   :  { %3196 = vst [vmem:[#allocation3 + $0xa8] sm:$0xf] %v3164_v63  ;;  %v2822_v28 = vadd.f32 %v2777_v30, %v8679_v7  ;;  %v7781_v63 = vld [vmem:[#allocation3 + $0xa0] sm:$0xf0]  ;;  %v2705_v30 = vadd.f32 %v9023_v53, %v9018_v44  ;;  %v7779_v44 = vld [vmem:[#allocation3 + $0x94] sm:$0xf] }
 0x2b7   :  { %v6820_v53 = vor.u32 %v7779_v44, %v6817_v38 }
 0x2b8   :  { %vm2910_vm8 = vcmp.ge.f32.partialorder %v2822_v28, 0.0  ;;  %v2942_v0 = vmul.f32 0.2, %v2822_v28  ;;  %3897 = vmatmul.bf16.gmra.mxu0 %v6816_v15 }
 0x2ba   :  { %v3101_v35 = vld [vmem:[#allocation2 + $0xef] sm:$0xff]  ;;  %v2974_v47 = vsel %vm2910_vm8, %v2822_v28, %v2942_v0  ;;  %v9041_v20 = vpop.f32.mrf.mxu2 }
 0x2bb   :  { %v3228_v34 = vld [vmem:[#allocation2 + $0xe9] sm:$0xff]  ;;  %v3229_v55 = vld [vmem:[#allocation2 + $0xf1] sm:$0xff]  ;;  %v3165_v31 = vpack.c.bf16 %v3101_v35, %v3101_v35  ;;  %3070 = vst [vmem:[#allocation2 + $0x108] sm:$0xff] %v2974_v47  ;;  %v2778_v48 = vpop.f32.mrf.mxu3  ;;  %v3006_v51 = vpack.c.bf16 %v2974_v47, %v2974_v47 }
 0x2bc   :  { %v3261_v19 = vsel %vm74_vm1, 0.0, %v3229_v55  ;;  %v3292_v7 = vpack.c.bf16 %v3228_v34, %v3228_v34  ;;  %v2779_v11 = vadd.f32 %v2778_v48, %v2700_v59  ;;  %v9045_v17 = vpop.f32.mrf.mxu1  ;;  %v7846_v59 = vld [vmem:[#allocation3 + $0x68] sm:$0xf0] }
 0x2bd   :  { %v3293_v46 = vpack.c.bf16 %v3261_v19, %v3261_v19  ;;  %3197 = vst [vmem:[#allocation3 + $0xb4] sm:$0xf] %v3165_v31  ;;  %v6827_v45 = vld [vmem:[#allocation3 + $0xa8] sm:$0xf]  ;;  %v6824_v31 = vor.u32 %v7781_v63, %v6823_v18  ;;  %v7079_v19 = vld [vmem:[#allocation3 + $0x60] sm:$0xf] }
 0x2be   :  { %3324 = vst [vmem:[#allocation3 + $0xb0] sm:$0xf] %v3292_v7  ;;  %v2823_v49 = vadd.f32 %v2779_v11, %v8690_v4  ;;  %v7080_v48 = vor.u32 %v7846_v59, %v7079_v19  ;;  %v7849_v18 = vld [vmem:[#allocation3 + $0x80] sm:$0xf0] }
 0x2bf   :  { %3325 = vst [vmem:[#allocation3 + $0xbc] sm:$0xf] %v3293_v46  ;;  %3981 = vmatmul.bf16.gmra.mxu1 %v6808_v33  ;;  %4070 = vmatmul.bf16.gmra.mxu2 %v6812_v5 }
 0x2c0   :  { %3038 = vst [vmem:[#allocation3 + $0xc4] sm:$0xf] %v3006_v51  ;;  %vm2911_vm9 = vcmp.ge.f32.partialorder %v2823_v49, 0.0  ;;  %v2943_v21 = vmul.f32 0.2, %v2823_v49  ;;  %4681 = vmatmul.bf16.gmra.mxu3 %v7068_v1 }
 0x2c2   :  { %v3102_v54 = vld [vmem:[#allocation2 + $0x107] sm:$0xff]  ;;  %v2975_v10 = vsel %vm2911_vm9, %v2823_v49, %v2943_v21  ;;  %v9050_v24 = vpop.f32.mrf.mxu2 }
 0x2c3   :  { %v3134_v13 = vsel %vm71_vm0, 0.0, %v3102_v54  ;;  %v3007_v43 = vpack.c.bf16 %v2975_v10, %v2975_v10  ;;  %3071 = vst [vmem:[#allocation2 + $0x110] sm:$0xff] %v2975_v10  ;;  %v2781_v4 = vpop.f32.mrf.mxu3 }
 0x2c4   :  { %v3166_v3 = vpack.c.bf16 %v3134_v13, %v3134_v13  ;;  %v2782_v57 = vadd.f32 %v2781_v4, %v2703_v8  ;;  %v9054_v56 = vpop.f32.mrf.mxu1  ;;  %v7783_v40 = vld [vmem:[#allocation3 + $0xb0] sm:$0xf0]  ;;  %v6829_v13 = vld [vmem:[#allocation3 + $0xb4] sm:$0xf0] }
 0x2c5   :  { %3039 = vst [vmem:[#allocation3 + $0xd0] sm:$0xf] %v3007_v43  ;;  %v6828_v14 = vor.u32 %v7783_v40, %v6827_v45  ;;  %v6835_v43 = vld [vmem:[#allocation3 + $0xb0] sm:$0xf] }
 0x2c6   :  { %3198 = vst [vmem:[#allocation3 + $0xc0] sm:$0xf] %v3166_v3  ;;  %v2824_v23 = vadd.f32 %v2782_v57, %v8701_v29  ;;  %v7784_v4 = vld [vmem:[#allocation3 + $0xb8] sm:$0xf0]  ;;  %v2710_v3 = vadd.f32 %v9041_v20, %v9036_v27  ;;  %v7782_v20 = vld [vmem:[#allocation3 + $0xac] sm:$0xf] }
 0x2c8   :  { %vm2912_vm10 = vcmp.ge.f32.partialorder %v2824_v23, 0.0  ;;  %v2944_v2 = vmul.f32 0.2, %v2824_v23  ;;  %3902 = vmatmul.bf16.gmra.mxu0 %v6828_v14 }
 0x2ca   :  { %v3103_v6 = vld [vmem:[#allocation2 + $0x10f] sm:$0xff]  ;;  %v2976_v28 = vsel %vm2912_vm10, %v2824_v23, %v2944_v2  ;;  %v9059_v0 = vpop.f32.mrf.mxu2 }
 0x2cb   :  { %v3230_v50 = vld [vmem:[#allocation2 + $0x109] sm:$0xff]  ;;  %v3231_v15 = vld [vmem:[#allocation2 + $0x111] sm:$0xff]  ;;  %v3167_v12 = vpack.c.bf16 %v3103_v6, %v3103_v6  ;;  %3072 = vst [vmem:[#allocation2 + $0x128] sm:$0xff] %v2976_v28  ;;  %v2783_v16 = vpop.f32.mrf.mxu3  ;;  %v3008_v34 = vpack.c.bf16 %v2976_v28, %v2976_v28  ;;  %v6836_v28 = vor.u32 %v7784_v4, %v6835_v43 }
 0x2cc   :  { %v3263_v29 = vsel %vm74_vm1, 0.0, %v3231_v15  ;;  %v3294_v62 = vpack.c.bf16 %v3230_v50, %v3230_v50  ;;  %v2784_v55 = vadd.f32 %v2783_v16, %v2705_v30  ;;  %v9063_v47 = vpop.f32.mrf.mxu1  ;;  %v6832_v15 = vor.u32 %v7782_v20, %v6829_v13 }
 0x2cd   :  { %v3295_v35 = vpack.c.bf16 %v3263_v29, %v3263_v29  ;;  %3199 = vst [vmem:[#allocation3 + $0xcc] sm:$0xf] %v3167_v12  ;;  %v6839_v58 = vld [vmem:[#allocation3 + $0xc0] sm:$0xf]  ;;  %v7091_v12 = vld [vmem:[#allocation3 + $0x78] sm:$0xf]  ;;  %v2713_v16 = vadd.f32 %v9050_v24, %v9045_v17 }
 0x2ce   :  { %3326 = vst [vmem:[#allocation3 + $0xc8] sm:$0xf] %v3294_v62  ;;  %v2825_v7 = vadd.f32 %v2784_v55, %v8712_v42  ;;  %v7092_v62 = vor.u32 %v7849_v18, %v7091_v12 }
 0x2cf   :  { %3327 = vst [vmem:[#allocation3 + $0xd4] sm:$0xf] %v3295_v35  ;;  %3986 = vmatmul.bf16.gmra.mxu1 %v6820_v53  ;;  %4075 = vmatmul.bf16.gmra.mxu2 %v6824_v31 }
 0x2d0   :  { %3040 = vst [vmem:[#allocation3 + $0xdc] sm:$0xf] %v3008_v34  ;;  %vm2913_vm11 = vcmp.ge.f32.partialorder %v2825_v7, 0.0  ;;  %v2945_v46 = vmul.f32 0.2, %v2825_v7  ;;  %4686 = vmatmul.bf16.gmra.mxu3 %v7080_v48 }
 0x2d2   :  { %v3104_v51 = vld [vmem:[#allocation2 + $0x127] sm:$0xff]  ;;  %v2977_v11 = vsel %vm2913_vm11, %v2825_v7, %v2945_v46  ;;  %v9068_v61 = vpop.f32.mrf.mxu2 }
 0x2d3   :  { %v3136_v33 = vsel %vm71_vm0, 0.0, %v3104_v51  ;;  %v3009_v5 = vpack.c.bf16 %v2977_v11, %v2977_v11  ;;  %3073 = vst [vmem:[#allocation2 + $0x130] sm:$0xff] %v2977_v11  ;;  %v2786_v42 = vpop.f32.mrf.mxu3  ;;  %v7885_v51 = vld [vmem:[#allocation10 + $0x50] sm:$0xff]  ;;  %v9102_v11 = vld [vmem:[%s9497_s4] ss:$0 sm:$0xff] }
 0x2d4   :  { %v3168_v22 = vpack.c.bf16 %v3136_v33, %v3136_v33  ;;  %v2787_v49 = vadd.f32 %v2786_v42, %v2708_v36  ;;  %v9072_v1 = vpop.f32.mrf.mxu0  ;;  %v9074_v8 = vpop.f32.mrf.mxu1  ;;  %v7786_v32 = vld [vmem:[#allocation3 + $0xc8] sm:$0xf0]  ;;  %4742 = vmatpush.bf16.msrb.mxu0 %v7885_v51 }
 0x2d5   :  { %3041 = vst [vmem:[#allocation3 + $0xe8] sm:$0xf] %v3009_v5  ;;  %v6840_v21 = vor.u32 %v7786_v32, %v6839_v58  ;;  %v6841_v5 = vld [vmem:[#allocation3 + $0xcc] sm:$0xf0]  ;;  %v6847_v42 = vld [vmem:[#allocation3 + $0xc8] sm:$0xf] }
 0x2d6   :  { %3200 = vst [vmem:[#allocation3 + $0xd8] sm:$0xf] %v3168_v22  ;;  %v2826_v54 = vadd.f32 %v2787_v49, %v8726_v52  ;;  %v7787_v22 = vld [vmem:[#allocation3 + $0xd0] sm:$0xf0]  ;;  %v2715_v49 = vadd.f32 %v9059_v0, %v9054_v56 }
 0x2d8   :  { %vm2914_vm12 = vcmp.ge.f32.partialorder %v2826_v54, 0.0  ;;  %v2946_v10 = vmul.f32 0.2, %v2826_v54  ;;  %3907 = vmatmul.bf16.gmra.mxu0 %v6840_v21 }
 0x2da   :  { %v3105_v57 = vld [vmem:[#allocation2 + $0x12f] sm:$0xff]  ;;  %v2978_v14 = vsel %vm2914_vm12, %v2826_v54, %v2946_v10  ;;  %v9079_v23 = vpop.f32.mrf.mxu2  ;;  %v3869_v10 = vadd.f32 %v9102_v11, %v9072_v1 }
 0x2db   :  { %v3232_v45 = vld [vmem:[#allocation2 + $0x129] sm:$0xff]  ;;  %v3233_v40 = vld [vmem:[#allocation2 + $0x131] sm:$0xff]  ;;  %v3169_v26 = vpack.c.bf16 %v3105_v57, %v3105_v57  ;;  %3074 = vst [vmem:[#allocation2 + $0x148] sm:$0xff] %v2978_v14  ;;  %v2788_v38 = vpop.f32.mrf.mxu3  ;;  %v3010_v30 = vpack.c.bf16 %v2978_v14, %v2978_v14  ;;  %v7852_v57 = vld [vmem:[#allocation3 + $0x98] sm:$0xf0] }
 0x2dc   :  { %v3265_v2 = vsel %vm74_vm1, 0.0, %v3233_v40  ;;  %v3296_v52 = vpack.c.bf16 %v3232_v45, %v3232_v45  ;;  %v2789_v6 = vadd.f32 %v2788_v38, %v2710_v3  ;;  %v9083_v50 = vpop.f32.mrf.mxu0  ;;  %v9085_v27 = vpop.f32.mrf.mxu1  ;;  %v7785_v14 = vld [vmem:[#allocation3 + $0xc4] sm:$0xf]  ;;  %v6848_v38 = vor.u32 %v7787_v22, %v6847_v42  ;;  %v7103_v1 = vld [vmem:[#allocation3 + $0x90] sm:$0xf] }
 0x2dd   :  { %v3297_v63 = vpack.c.bf16 %v3265_v2, %v3265_v2  ;;  %3201 = vst [vmem:[#allocation3 + $0xe4] sm:$0xf] %v3169_v26  ;;  %v6851_v48 = vld [vmem:[#allocation3 + $0xd8] sm:$0xf]  ;;  %v3871_v12 = vadd.f32 %v9102_v11, %v9083_v50 }
 0x2de   :  { %3328 = vst [vmem:[#allocation3 + $0xe0] sm:$0xf] %v3296_v52  ;;  %v2827_v29 = vadd.f32 %v2789_v6, %v8737_v37  ;;  %v6844_v52 = vor.u32 %v7785_v14, %v6841_v5  ;;  %v7884_v14 = vld [vmem:[#allocation10 + $0x48] sm:$0xff] }
 0x2df   :  { %3329 = vst [vmem:[#allocation3 + $0xec] sm:$0xf] %v3297_v63  ;;  %3991 = vmatmul.bf16.gmra.mxu1 %v6832_v15  ;;  %4080 = vmatmul.bf16.gmra.mxu2 %v6836_v28  ;;  %v7104_v63 = vor.u32 %v7852_v57, %v7103_v1 }
 0x2e0   :  { %3042 = vst [vmem:[#allocation3 + $0xf4] sm:$0xf] %v3010_v30  ;;  %vm2915_vm13 = vcmp.ge.f32.partialorder %v2827_v29, 0.0  ;;  %v2947_v59 = vmul.f32 0.2, %v2827_v29  ;;  %4691 = vmatmul.bf16.gmra.mxu3 %v7092_v62  ;;  %v2718_v30 = vadd.f32 %v9068_v61, %v9063_v47  ;;  %4743 = vmatpush.bf16.msrb.mxu0 %v7884_v14 }
 0x2e2   :  { %v3106_v35 = vld [vmem:[#allocation2 + $0x147] sm:$0xff]  ;;  %v2979_v34 = vsel %vm2915_vm13, %v2827_v29, %v2947_v59  ;;  %v9090_v55 = vpop.f32.mrf.mxu2 }
 0x2e3   :  { %v3138_v44 = vsel %vm71_vm0, 0.0, %v3106_v35  ;;  %v3011_v53 = vpack.c.bf16 %v2979_v34, %v2979_v34  ;;  %3075 = vst [vmem:[#allocation2 + $0x150] sm:$0xff] %v2979_v34  ;;  %v2791_v37 = vpop.f32.mrf.mxu3 }
 0x2e4   :  { %v3170_v31 = vpack.c.bf16 %v3138_v44, %v3138_v44  ;;  %v2792_v19 = vadd.f32 %v2791_v37, %v2713_v16  ;;  %v9094_v7 = vpop.f32.mrf.mxu1  ;;  %v7789_v17 = vld [vmem:[#allocation3 + $0xe0] sm:$0xf0] }
 0x2e5   :  { %3043 = vst [vmem:[#allocation3 + $0x100] sm:$0xf] %v3011_v53  ;;  %v9096_v24 = vpop.f32.mrf.mxu0  ;;  %v6852_v36 = vor.u32 %v7789_v17, %v6851_v48  ;;  %v6859_v48 = vld [vmem:[#allocation3 + $0xe0] sm:$0xf] }
 0x2e6   :  { %3202 = vst [vmem:[#allocation3 + $0xf0] sm:$0xf] %v3170_v31  ;;  %v2828_v46 = vadd.f32 %v2792_v19, %v8754_v60  ;;  %v6853_v19 = vld [vmem:[#allocation3 + $0xe4] sm:$0xf0]  ;;  %v7790_v17 = vld [vmem:[#allocation3 + $0xe8] sm:$0xf0]  ;;  %v3874_v22 = vadd.f32 %v9102_v11, %v9096_v24 }
 0x2e7   :  { %v6860_v57 = vor.u32 %v7790_v17, %v6859_v48 }
 0x2e8   :  { %vm2916_vm14 = vcmp.ge.f32.partialorder %v2828_v46, 0.0  ;;  %v2948_v33 = vmul.f32 0.2, %v2828_v46  ;;  %3912 = vmatmul.bf16.gmra.mxu0 %v6852_v36  ;;  %v2720_v36 = vadd.f32 %v9079_v23, %v9074_v8 }
 0x2ea   :  { %v3107_v58 = vld [vmem:[#allocation2 + $0x14f] sm:$0xff]  ;;  %v2980_v60 = vsel %vm2916_vm14, %v2828_v46, %v2948_v33  ;;  %v9106_v54 = vpop.f32.mrf.mxu2 }
 0x2eb   :  { %v3234_v32 = vld [vmem:[#allocation2 + $0x149] sm:$0xff]  ;;  %v3235_v21 = vld [vmem:[#allocation2 + $0x151] sm:$0xff]  ;;  %v3171_v13 = vpack.c.bf16 %v3107_v58, %v3107_v58  ;;  %3076 = vst [vmem:[#allocation2 + $0x168] sm:$0xff] %v2980_v60  ;;  %v2793_v3 = vpop.f32.mrf.mxu3  ;;  %v3012_v40 = vpack.c.bf16 %v2980_v60, %v2980_v60 }
 0x2ec   :  { %v3267_v43 = vsel %vm74_vm1, 0.0, %v3235_v21  ;;  %v3298_v4 = vpack.c.bf16 %v3234_v32, %v3234_v32  ;;  %v2794_v56 = vadd.f32 %v2793_v3, %v2715_v49  ;;  %v3957_v0 = vpop.f32.mrf.mxu1  ;;  %v7855_v21 = vld [vmem:[#allocation3 + $0xb0] sm:$0xf0] }
 0x2ed   :  { %v3299_v45 = vpack.c.bf16 %v3267_v43, %v3267_v43  ;;  %3203 = vst [vmem:[#allocation3 + $0xfc] sm:$0xf] %v3171_v13  ;;  %v9112_v26 = vpop.f32.mrf.mxu0  ;;  %v3958_v2 = vadd.f32 %v3957_v0, %v3869_v10  ;;  %v6863_v35 = vld [vmem:[#allocation3 + $0xf0] sm:$0xf]  ;;  %v7788_v43 = vld [vmem:[#allocation3 + $0xdc] sm:$0xf] }
 0x2ee   :  { %3330 = vst [vmem:[#allocation3 + $0xf8] sm:$0xf] %v3298_v4  ;;  %v2829_v18 = vadd.f32 %v2794_v56, %v8767_v9  ;;  %v6856_v24 = vor.u32 %v7788_v43, %v6853_v19 }
 0x2ef   :  { %3331 = vst [vmem:[#allocation3 + $0x104] sm:$0xf] %v3299_v45  ;;  %3996 = vmatmul.bf16.gmra.mxu1 %v6844_v52  ;;  %4085 = vmatmul.bf16.gmra.mxu2 %v6848_v38  ;;  %v7115_v45 = vld [vmem:[#allocation3 + $0xa8] sm:$0xf] }
 0x2f0   :  { %3044 = vst [vmem:[#allocation3 + $0x10c] sm:$0xf] %v3012_v40  ;;  %vm2917_vm15 = vcmp.ge.f32.partialorder %v2829_v18, 0.0  ;;  %v2949_v6 = vmul.f32 0.2, %v2829_v18  ;;  %4696 = vmatmul.bf16.gmra.mxu3 %v7104_v63  ;;  %v9576_v40 = vld [vmem:[#allocation32_spill] sm:$0xff]  ;;  %v7116_v0 = vor.u32 %v7855_v21, %v7115_v45  ;;  %v3876_v63 = vadd.f32 %v9102_v11, %v9112_v26 }
 0x2f1   :  { %v9578_v26 = vld [vmem:[#allocation17_spill] sm:$0xff] }
 0x2f2   :  { %v3108_v20 = vld [vmem:[#allocation2 + $0x167] sm:$0xff]  ;;  %v2981_v15 = vsel %vm2917_vm15, %v2829_v18, %v2949_v6  ;;  %v4046_v28 = vpop.f32.mrf.mxu2 }
 0x2f3   :  { %v3140_v9 = vsel %vm71_vm0, 0.0, %v3108_v20  ;;  %v3013_v29 = vpack.c.bf16 %v2981_v15, %v2981_v15  ;;  %3077 = vst [vmem:[#allocation2 + $0x170] sm:$0xff] %v2981_v15  ;;  %v2796_v62 = vpop.f32.mrf.mxu3  ;;  %v9121_v16 = vadd.f32 %v4046_v28, %v3958_v2  ;;  %v2723_v2 = vadd.f32 %v9090_v55, %v9085_v27 }
 0x2f4   :  { %v3172_v59 = vpack.c.bf16 %v3140_v9, %v3140_v9  ;;  %v2797_v47 = vadd.f32 %v2796_v62, %v2718_v30  ;;  %v3959_v61 = vpop.f32.mrf.mxu1  ;;  %v7792_v34 = vld [vmem:[#allocation3 + $0xf8] sm:$0xf0] }
 0x2f5   :  { %9574 = vst [vmem:[#allocation21_spill] sm:$0xff] %v9121_v16  ;;  %v9123_v44 = vpop.f32.mrf.mxu0  ;;  %v3960_v53 = vadd.f32 %v3959_v61, %v3871_v12  ;;  %v6864_v37 = vor.u32 %v7792_v34, %v6863_v35  ;;  %v6865_v35 = vld [vmem:[#allocation3 + $0xfc] sm:$0xf0]  ;;  %v6871_v34 = vld [vmem:[#allocation3 + $0xf8] sm:$0xf] }
 0x2f6   :  { %3045 = vst [vmem:[#allocation3 + $0x118] sm:$0xf] %v3013_v29  ;;  %v2830_v50 = vadd.f32 %v2797_v47, %v8783_v41 }
 0x2f7   :  { %3204 = vst [vmem:[#allocation3 + $0x108] sm:$0xf] %v3172_v59 }
 0x2f8   :  { %vm2918_vm2 = vcmp.ge.f32.partialorder %v2830_v50, 0.0  ;;  %v2950_v31 = vmul.f32 0.2, %v2830_v50  ;;  %3917 = vmatmul.bf16.gmra.mxu0 %v6864_v37  ;;  %v2725_v37 = vadd.f32 %v9106_v54, %v9094_v7 }
 0x2fa   :  { %v3109_v46 = vld [vmem:[#allocation2 + $0x16f] sm:$0xff]  ;;  %v2982_v5 = vsel %vm2918_vm2, %v2830_v50, %v2950_v31  ;;  %v4048_v42 = vpop.f32.mrf.mxu2 }
 0x2fb   :  { %v3236_v51 = vld [vmem:[#allocation2 + $0x169] sm:$0xff]  ;;  %v3237_v33 = vld [vmem:[#allocation2 + $0x171] sm:$0xff]  ;;  %v3173_v49 = vpack.c.bf16 %v3109_v46, %v3109_v46  ;;  %3078 = vst [vmem:[#allocation2 + $0x188] sm:$0xff] %v2982_v5  ;;  %v2798_v32 = vpop.f32.mrf.mxu3  ;;  %v3014_v10 = vpack.c.bf16 %v2982_v5, %v2982_v5  ;;  %v9132_v8 = vadd.f32 %v4048_v42, %v3960_v53  ;;  %v7793_v53 = vld [vmem:[#allocation3 + $0x100] sm:$0xf0] }
 0x2fc   :  { %v3269_v41 = vsel %vm74_vm1, 0.0, %v3237_v33  ;;  %v3300_v58 = vpack.c.bf16 %v3236_v51, %v3236_v51  ;;  %v2799_v13 = vadd.f32 %v2798_v32, %v2720_v36  ;;  %v3962_v23 = vpop.f32.mrf.mxu1  ;;  %v3879_v36 = vadd.f32 %v9102_v11, %v9123_v44  ;;  %v7858_v42 = vld [vmem:[#allocation3 + $0xc8] sm:$0xf0] }
 0x2fd   :  { %v3301_v60 = vpack.c.bf16 %v3269_v41, %v3269_v41  ;;  %9575 = vst [vmem:[#allocation38_spill] sm:$0xff] %v9132_v8  ;;  %v9134_v4 = vpop.f32.mrf.mxu0  ;;  %v3963_v3 = vadd.f32 %v3962_v23, %v3874_v22  ;;  %v6877_v39 = vld [vmem:[#allocation3 + $0x114] sm:$0xf0] }
 0x2fe   :  { %3205 = vst [vmem:[#allocation3 + $0x114] sm:$0xf] %v3173_v49  ;;  %v2831_v56 = vadd.f32 %v2799_v13, %v9576_v40  ;;  %v6875_v12 = vld [vmem:[#allocation3 + $0x108] sm:$0xf]  ;;  %v9580_v13 = vld [vmem:[#allocation42_spill] sm:$0xff] }
 0x2ff   :  { %3332 = vst [vmem:[#allocation3 + $0x110] sm:$0xf] %v3300_v58  ;;  %4001 = vmatmul.bf16.gmra.mxu1 %v6856_v24  ;;  %4090 = vmatmul.bf16.gmra.mxu2 %v6860_v57  ;;  %v7791_v58 = vld [vmem:[#allocation3 + $0xf4] sm:$0xf] }
 0x300   :  { %3333 = vst [vmem:[#allocation3 + $0x11c] sm:$0xf] %v3301_v60  ;;  %vm2919_vm3 = vcmp.ge.f32.partialorder %v2831_v56, 0.0  ;;  %v2951_v52 = vmul.f32 0.2, %v2831_v56  ;;  %4701 = vmatmul.bf16.gmra.mxu3 %v7116_v0  ;;  %v6868_v44 = vor.u32 %v7791_v58, %v6865_v35  ;;  %v6872_v60 = vor.u32 %v7793_v53, %v6871_v34 }
 0x301   :  { %3046 = vst [vmem:[#allocation3 + $0x124] sm:$0xf] %v3014_v10  ;;  %v7127_v10 = vld [vmem:[#allocation3 + $0xc0] sm:$0xf] }
 0x302   :  { %v3110_v38 = vld [vmem:[#allocation2 + $0x187] sm:$0xff]  ;;  %v2983_v1 = vsel %vm2919_vm3, %v2831_v56, %v2951_v52  ;;  %v4051_v18 = vpop.f32.mrf.mxu2  ;;  %v7128_v43 = vor.u32 %v7858_v42, %v7127_v10  ;;  %v3881_v56 = vadd.f32 %v9102_v11, %v9134_v4 }
 0x303   :  { %v3142_v30 = vsel %vm71_vm0, 0.0, %v3110_v38  ;;  %v3015_v6 = vpack.c.bf16 %v2983_v1, %v2983_v1  ;;  %3079 = vst [vmem:[#allocation2 + $0x190] sm:$0xff] %v2983_v1  ;;  %v2801_v20 = vpop.f32.mrf.mxu3  ;;  %v9143_v15 = vadd.f32 %v4051_v18, %v3963_v3  ;;  %v7948_v3 = vld [vmem:[#allocation10 + $0x1b8] sm:$0xff]  ;;  %v7883_v4 = vld [vmem:[#allocation10 + $0x40] sm:$0xff] }
 0x304   :  { %v3174_v27 = vpack.c.bf16 %v3142_v30, %v3142_v30  ;;  %v2802_v55 = vadd.f32 %v2801_v20, %v2723_v2  ;;  %v3964_v28 = vpop.f32.mrf.mxu1  ;;  %5452 = vmatpush.bf16.msrb.mxu2 %v7948_v3  ;;  %4744 = vmatpush.bf16.msrb.mxu0 %v7883_v4  ;;  %v7864_v3 = vld [vmem:[#allocation3 + $0xf8] sm:$0xf0] }
 0x305   :  { %9577 = vst [vmem:[#allocation34_spill] sm:$0xff] %v9143_v15  ;;  %v7795_v9 = vld [vmem:[#allocation3 + $0x110] sm:$0xf0]  ;;  %v9145_v29 = vpop.f32.mrf.mxu0  ;;  %v3965_v62 = vadd.f32 %v3964_v28, %v3876_v63  ;;  %v7804_v4 = vld [vmem:[#allocation3 + $0x158] sm:$0xf0] }
 0x306   :  { %3047 = vst [vmem:[#allocation3 + $0x130] sm:$0xf] %v3015_v6  ;;  %v6876_v59 = vor.u32 %v7795_v9, %v6875_v12  ;;  %v2832_v47 = vadd.f32 %v2802_v55, %v9578_v26  ;;  %v6883_v55 = vld [vmem:[#allocation3 + $0x110] sm:$0xf]  ;;  %v3884_v12 = vadd.f32 %v9102_v11, %v9145_v29 }
 0x307   :  { %3206 = vst [vmem:[#allocation3 + $0x120] sm:$0xf] %v3174_v27  ;;  %v7898_v27 = vld [vmem:[#allocation10 + $0xb8] sm:$0xff] }
 0x308   :  { %vm2920_vm4 = vcmp.ge.f32.partialorder %v2832_v47, 0.0  ;;  %v2952_v61 = vmul.f32 0.2, %v2832_v47  ;;  %3922 = vmatmul.bf16.gmra.mxu0 %v6876_v59  ;;  %v7796_v28 = vld [vmem:[#allocation3 + $0x118] sm:$0xf0]  ;;  %4816 = vmatpush.bf16.msra.mxu1 %v7898_v27 }
 0x30a   :  { %v3111_v50 = vld [vmem:[#allocation2 + $0x18f] sm:$0xff]  ;;  %v2984_v48 = vsel %vm2920_vm4, %v2832_v47, %v2952_v61  ;;  %v4053_v17 = vpop.f32.mrf.mxu2 }
 0x30b   :  { %v3238_v31 = vld [vmem:[#allocation2 + $0x189] sm:$0xff]  ;;  %v3239_v19 = vld [vmem:[#allocation2 + $0x191] sm:$0xff]  ;;  %v3175_v46 = vpack.c.bf16 %v3111_v50, %v3111_v50  ;;  %3080 = vst [vmem:[#allocation2 + $0x1a8] sm:$0xff] %v2984_v48  ;;  %v2803_v5 = vpop.f32.mrf.mxu3  ;;  %v3016_v49 = vpack.c.bf16 %v2984_v48, %v2984_v48  ;;  %v9154_v7 = vadd.f32 %v4053_v17, %v3965_v62 }
 0x30c   :  { %v3271_v51 = vsel %vm74_vm1, 0.0, %v3239_v19  ;;  %v3302_v33 = vpack.c.bf16 %v3238_v31, %v3238_v31  ;;  %v2804_v41 = vadd.f32 %v2803_v5, %v2725_v37  ;;  %v3967_v54 = vpop.f32.mrf.mxu1  ;;  %v7861_v37 = vld [vmem:[#allocation3 + $0xe0] sm:$0xf0]  ;;  %v7794_v19 = vld [vmem:[#allocation3 + $0x10c] sm:$0xf] }
 0x30d   :  { %v3303_v22 = vpack.c.bf16 %v3271_v51, %v3271_v51  ;;  %9579 = vst [vmem:[#allocation18_spill] sm:$0xff] %v9154_v7  ;;  %v9156_v32 = vpop.f32.mrf.mxu0  ;;  %v3968_v21 = vadd.f32 %v3967_v54, %v3879_v36  ;;  %v6880_v17 = vor.u32 %v7794_v19, %v6877_v39  ;;  %v6884_v36 = vor.u32 %v7796_v28, %v6883_v55  ;;  %v6911_v28 = vld [vmem:[#allocation3 + $0x150] sm:$0xf] }
 0x30e   :  { %3207 = vst [vmem:[#allocation3 + $0x12c] sm:$0xf] %v3175_v46  ;;  %v2833_v23 = vadd.f32 %v2804_v41, %v9580_v13  ;;  %v6887_v18 = vld [vmem:[#allocation3 + $0x120] sm:$0xf]  ;;  %v7139_v46 = vld [vmem:[#allocation3 + $0xd8] sm:$0xf] }
 0x30f   :  { %3334 = vst [vmem:[#allocation3 + $0x128] sm:$0xf] %v3302_v33  ;;  %4006 = vmatmul.bf16.gmra.mxu1 %v6868_v44  ;;  %4095 = vmatmul.bf16.gmra.mxu2 %v6872_v60  ;;  %v7140_v51 = vor.u32 %v7861_v37, %v7139_v46  ;;  %v3886_v33 = vadd.f32 %v9102_v11, %v9156_v32  ;;  %v6889_v60 = vld [vmem:[#allocation3 + $0x12c] sm:$0xf0] }
 0x310   :  { %3335 = vst [vmem:[#allocation3 + $0x134] sm:$0xf] %v3303_v22  ;;  %vm2921_vm5 = vcmp.ge.f32.partialorder %v2833_v23, 0.0  ;;  %v2953_v24 = vmul.f32 0.2, %v2833_v23  ;;  %4706 = vmatmul.bf16.gmra.mxu3 %v7128_v43 }
 0x311   :  { %3048 = vst [vmem:[#allocation3 + $0x13c] sm:$0xf] %v3016_v49 }
 0x312   :  { %v3112_v57 = vld [vmem:[#allocation2 + $0x1a7] sm:$0xff]  ;;  %v2985_v45 = vsel %vm2921_vm5, %v2833_v23, %v2953_v24  ;;  %v4056_v40 = vpop.f32.mrf.mxu2 }
 0x313   :  { %v3144_v0 = vsel %vm71_vm0, 0.0, %v3112_v57  ;;  %v3017_v14 = vpack.c.bf16 %v2985_v45, %v2985_v45  ;;  %3081 = vst [vmem:[#allocation2 + $0x1b0] sm:$0xff] %v2985_v45  ;;  %v9163_v2 = vadd.f32 %v4056_v40, %v3968_v21  ;;  %v9165_v52 = vpop.f32.mrf.mxu3  ;;  %v7797_v57 = vld [vmem:[#allocation3 + $0x124] sm:$0xf] }
 0x314   :  { %v3176_v38 = vpack.c.bf16 %v3144_v0, %v3144_v0  ;;  %v3969_v1 = vpop.f32.mrf.mxu1 }
 0x315   :  { %v7798_v63 = vld [vmem:[#allocation3 + $0x128] sm:$0xf0]  ;;  %3049 = vst [vmem:[#allocation3 + $0x148] sm:$0xf] %v3017_v14  ;;  %v3888_v30 = vpop.f32.mrf.mxu0  ;;  %v3970_v6 = vadd.f32 %v3969_v1, %v3881_v56  ;;  %v6892_v56 = vor.u32 %v7797_v57, %v6889_v60  ;;  %v7151_v14 = vld [vmem:[#allocation3 + $0xf0] sm:$0xf] }
 0x316   :  { %v6888_v20 = vor.u32 %v7798_v63, %v6887_v18  ;;  %3208 = vst [vmem:[#allocation3 + $0x138] sm:$0xf] %v3176_v38  ;;  %v6895_v10 = vld [vmem:[#allocation3 + $0x128] sm:$0xf]  ;;  %v3889_v23 = vadd.f32 %v9102_v11, %v3888_v30  ;;  %v7152_v38 = vor.u32 %v7864_v3, %v7151_v14  ;;  %v7947_v1 = vld [vmem:[#allocation10 + $0x1b0] sm:$0xff]  ;;  %v7956_v18 = vld [vmem:[#allocation10 + $0x1f8] sm:$0xff] }
 0x317   :  { %v7799_v13 = vld [vmem:[#allocation3 + $0x130] sm:$0xf0]  ;;  %5453 = vmatpush.bf16.msrb.mxu2 %v7947_v1  ;;  %5531 = vmatpush.bf16.msra.mxu3 %v7956_v18  ;;  %v7944_v60 = vld [vmem:[#allocation10 + $0x198] sm:$0xff]  ;;  %v6923_v14 = vld [vmem:[#allocation3 + $0x168] sm:$0xf] }
 0x318   :  { %3927 = vmatmul.bf16.gmra.mxu0 %v6888_v20  ;;  %v6896_v0 = vor.u32 %v7799_v13, %v6895_v10  ;;  %v7800_v46 = vld [vmem:[#allocation3 + $0x13c] sm:$0xf]  ;;  %v7807_v57 = vld [vmem:[#allocation3 + $0x170] sm:$0xf0] }
 0x319   :  { %v7952_v10 = vld [vmem:[#allocation10 + $0x1d8] sm:$0xff]  ;;  %v7893_v1 = vld [vmem:[#allocation10 + $0x90] sm:$0xff] }
 0x31a   :  { %v3113_v9 = vld [vmem:[#allocation2 + $0x1af] sm:$0xff]  ;;  %v4058_v26 = vpop.f32.mrf.mxu2 }
 0x31b   :  { %v3240_v62 = vld [vmem:[#allocation2 + $0x1a9] sm:$0xff]  ;;  %v3241_v59 = vld [vmem:[#allocation2 + $0x1b1] sm:$0xff]  ;;  %v3177_v47 = vpack.c.bf16 %v3113_v9, %v3113_v9  ;;  %v9171_v34 = vadd.f32 %v4058_v26, %v3970_v6  ;;  %v9173_v53 = vpop.f32.mrf.mxu3 }
 0x31c   :  { %v3273_v61 = vsel %vm74_vm1, 0.0, %v3241_v59  ;;  %v3304_v35 = vpack.c.bf16 %v3240_v62, %v3240_v62  ;;  %v3972_v31 = vpop.f32.mrf.mxu1  ;;  %v7897_v9 = vld [vmem:[#allocation10 + $0xb0] sm:$0xff]  ;;  %v7964_v59 = vld [vmem:[#allocation10 + $0x238] sm:$0xff]  ;;  %v7896_v26 = vld [vmem:[#allocation10 + $0xa8] sm:$0xff] }
 0x31d   :  { %v3305_v50 = vpack.c.bf16 %v3273_v61, %v3273_v61  ;;  %3209 = vst [vmem:[#allocation3 + $0x144] sm:$0xf] %v3177_v47  ;;  %v3890_v29 = vpop.f32.mrf.mxu0  ;;  %v3973_v48 = vadd.f32 %v3972_v31, %v3884_v12  ;;  %v6899_v49 = vld [vmem:[#allocation3 + $0x138] sm:$0xf]  ;;  %v6912_v12 = vor.u32 %v7804_v4, %v6911_v28  ;;  %v7955_v62 = vld [vmem:[#allocation10 + $0x1f0] sm:$0xff]  ;;  %4817 = vmatpush.bf16.msra.mxu1 %v7897_v9  ;;  %v7946_v47 = vld [vmem:[#allocation10 + $0x1a8] sm:$0xff] }
 0x31e   :  { %3336 = vst [vmem:[#allocation3 + $0x140] sm:$0xf] %v3304_v35  ;;  %v3891_v30 = vadd.f32 %v9102_v11, %v3890_v29  ;;  %5532 = vmatpush.bf16.msra.mxu3 %v7955_v62  ;;  %v7954_v61 = vld [vmem:[#allocation10 + $0x1e8] sm:$0xff]  ;;  %5610 = vmatpush.bf16.msra.mxu0 %v7964_v59  ;;  %v7943_v18 = vld [vmem:[#allocation10 + $0x190] sm:$0xff]  ;;  %v6919_v28 = vld [vmem:[#allocation3 + $0x158] sm:$0xf] }
 0x31f   :  { %3337 = vst [vmem:[#allocation3 + $0x14c] sm:$0xf] %v3305_v50  ;;  %4011 = vmatmul.bf16.gmra.mxu1 %v6880_v17  ;;  %4100 = vmatmul.bf16.gmra.mxu2 %v6884_v36  ;;  %v6901_v37 = vld [vmem:[#allocation3 + $0x144] sm:$0xf0]  ;;  %v7867_v17 = vld [vmem:[#allocation3 + $0x110] sm:$0xf0] }
 0x320   :  { %4711 = vmatmul.bf16.gmra.mxu3 %v7140_v51  ;;  %5454 = vmatpush.bf16.msrb.mxu2 %v7946_v47  ;;  %v7950_v4 = vld [vmem:[#allocation10 + $0x1c8] sm:$0xff] }
 0x321   :  { %4818 = vmatpush.bf16.msra.mxu1 %v7896_v26  ;;  %v7870_v26 = vld [vmem:[#allocation3 + $0x128] sm:$0xf0] }
 0x322   :  { %v4061_v25 = vpop.f32.mrf.mxu2  ;;  %5533 = vmatpush.bf16.msra.mxu3 %v7954_v61  ;;  %v7803_v61 = vld [vmem:[#allocation3 + $0x154] sm:$0xf] }
 0x323   :  { %v9177_v5 = vadd.f32 %v4061_v25, %v3973_v48  ;;  %v9179_v42 = vpop.f32.mrf.mxu3 }
 0x324   :  { %v3974_v22 = vpop.f32.mrf.mxu1  ;;  %v7801_v41 = vld [vmem:[#allocation3 + $0x140] sm:$0xf0] }
 0x325   :  { %v3893_v54 = vpop.f32.mrf.mxu0  ;;  %v3975_v58 = vadd.f32 %v3974_v22, %v3886_v33  ;;  %v6900_v21 = vor.u32 %v7801_v41, %v6899_v49  ;;  %v6907_v50 = vld [vmem:[#allocation3 + $0x140] sm:$0xf]  ;;  %v6904_v33 = vor.u32 %v7800_v46, %v6901_v37  ;;  %v7163_v49 = vld [vmem:[#allocation3 + $0x108] sm:$0xf] }
 0x326   :  { %v7802_v31 = vld [vmem:[#allocation3 + $0x148] sm:$0xf0]  ;;  %v3894_v19 = vadd.f32 %v9102_v11, %v3893_v54  ;;  %v7164_v41 = vor.u32 %v7867_v17, %v7163_v49  ;;  %v7894_v54 = vld [vmem:[#allocation10 + $0x98] sm:$0xff]  ;;  %v7941_v46 = vld [vmem:[#allocation10 + $0x180] sm:$0xff] }
 0x327   :  { %v6908_v22 = vor.u32 %v7802_v31, %v6907_v50 }
 0x328   :  { %3932 = vmatmul.bf16.gmra.mxu0 %v6900_v21  ;;  %v7945_v21 = vld [vmem:[#allocation10 + $0x1a0] sm:$0xff] }
 0x329   :  { %5455 = vmatpush.bf16.msrb.mxu2 %v7945_v21 }
 0x32a   :  { %v4063_v44 = vpop.f32.mrf.mxu2 }
 0x32b   :  { %v9182_v43 = vadd.f32 %v4063_v44, %v3975_v58  ;;  %v9184_v32 = vpop.f32.mrf.mxu3  ;;  %v7895_v58 = vld [vmem:[#allocation10 + $0xa0] sm:$0xff] }
 0x32c   :  { %v3977_v24 = vpop.f32.mrf.mxu1  ;;  %v7953_v44 = vld [vmem:[#allocation10 + $0x1e0] sm:$0xff]  ;;  %4819 = vmatpush.bf16.msra.mxu1 %v7895_v58  ;;  %v7963_v58 = vld [vmem:[#allocation10 + $0x230] sm:$0xff] }
 0x32d   :  { %v9186_v45 = vpop.f32.mrf.mxu0  ;;  %v3978_v40 = vadd.f32 %v3977_v24, %v3889_v23  ;;  %5534 = vmatpush.bf16.msra.mxu3 %v7953_v44  ;;  %5456 = vmatpush.bf16.msrb.mxu2 %v7944_v60  ;;  %v7833_v60 = vld [vmem:[#allocation3 + $0x4] sm:$0xf] }
 0x32e   :  { %v3896_v23 = vadd.f32 %v9102_v11, %v9186_v45  ;;  %v7942_v45 = vld [vmem:[#allocation10 + $0x188] sm:$0xff]  ;;  %5611 = vmatpush.bf16.msra.mxu0 %v7963_v58  ;;  %v7295_v58 = vld [vmem:[#allocation3 + $0x30] sm:$0xf] }
 0x32f   :  { %4016 = vmatmul.bf16.gmra.mxu1 %v6892_v56  ;;  %4105 = vmatmul.bf16.gmra.mxu2 %v6896_v0 }
 0x330   :  { %4716 = vmatmul.bf16.gmra.mxu3 %v7152_v38  ;;  %4820 = vmatpush.bf16.msra.mxu1 %v7894_v54  ;;  %v6924_v38 = vor.u32 %v7807_v57, %v6923_v14  ;;  %v6931_v57 = vld [vmem:[#allocation3 + $0x170] sm:$0xf] }
 0x331   :  { %5535 = vmatpush.bf16.msra.mxu3 %v7952_v10  ;;  %5457 = vmatpush.bf16.msrb.mxu2 %v7943_v18  ;;  %v7806_v18 = vld [vmem:[#allocation3 + $0x16c] sm:$0xf] }
 0x332   :  { %v4066_v63 = vpop.f32.mrf.mxu2 }
 0x333   :  { %v9189_v6 = vadd.f32 %v4066_v63, %v3978_v40  ;;  %v9191_v20 = vpop.f32.mrf.mxu3  ;;  %v7951_v63 = vld [vmem:[#allocation10 + $0x1d0] sm:$0xff] }
 0x334   :  { %v3979_v27 = vpop.f32.mrf.mxu1  ;;  %4821 = vmatpush.bf16.msra.mxu1 %v7893_v1 }
 0x335   :  { %v9193_v39 = vpop.f32.mrf.mxu0  ;;  %v3980_v55 = vadd.f32 %v3979_v27, %v3891_v30  ;;  %v7892_v30 = vld [vmem:[#allocation10 + $0x88] sm:$0xff]  ;;  %5536 = vmatpush.bf16.msra.mxu3 %v7951_v63  ;;  %5458 = vmatpush.bf16.msrb.mxu2 %v7942_v45 }
 0x336   :  { %v3899_v9 = vadd.f32 %v9102_v11, %v9193_v39 }
 0x338   :  { %3937 = vmatmul.bf16.gmra.mxu0 %v6912_v12  ;;  %v7805_v12 = vld [vmem:[#allocation3 + $0x160] sm:$0xf0]  ;;  %4822 = vmatpush.bf16.msra.mxu1 %v7892_v30 }
 0x339   :  { %v6920_v31 = vor.u32 %v7805_v12, %v6919_v28  ;;  %5537 = vmatpush.bf16.msra.mxu3 %v7950_v4  ;;  %5459 = vmatpush.bf16.msrb.mxu2 %v7941_v46  ;;  %v7900_v46 = vld [vmem:[#allocation3 + $0x38] sm:$0xf0] }
 0x33a   :  { %v4068_v35 = vpop.f32.mrf.mxu2 }
 0x33b   :  { %v9196_v29 = vadd.f32 %v4068_v35, %v3980_v55  ;;  %v9198_v48 = vpop.f32.mrf.mxu3  ;;  %v6913_v55 = vld [vmem:[#allocation3 + $0x15c] sm:$0xf0] }
 0x33c   :  { %v3982_v36 = vpop.f32.mrf.mxu1  ;;  %v6916_v50 = vor.u32 %v7803_v61, %v6913_v55 }
 0x33d   :  { %v9200_v51 = vpop.f32.mrf.mxu0  ;;  %v3983_v25 = vadd.f32 %v3982_v36, %v3894_v19  ;;  %v7175_v19 = vld [vmem:[#allocation3 + $0x120] sm:$0xf] }
 0x33e   :  { %v7176_v17 = vor.u32 %v7870_v26, %v7175_v19  ;;  %v7891_v36 = vld [vmem:[#allocation10 + $0x80] sm:$0xff]  ;;  %v7045_v26 = vld [vmem:[#allocation3 + $0x24] sm:$0xf0] }
 0x33f   :  { %4021 = vmatmul.bf16.gmra.mxu1 %v6904_v33  ;;  %4110 = vmatmul.bf16.gmra.mxu2 %v6908_v22  ;;  %v3901_v33 = vadd.f32 %v9102_v11, %v9200_v51 }
 0x340   :  { %4721 = vmatmul.bf16.gmra.mxu3 %v7164_v41  ;;  %4823 = vmatpush.bf16.msra.mxu1 %v7891_v36  ;;  %v7033_v41 = vld [vmem:[#allocation3 + $0xc] sm:$0xf0]  ;;  %v7835_v36 = vld [vmem:[#allocation3 + $0x10] sm:$0xf0] }
 0x341   :  { %v7036_v10 = vor.u32 %v7833_v60, %v7033_v41 }
 0x342   :  { %v4071_v13 = vpop.f32.mrf.mxu2 }
 0x343   :  { %v9204_v3 = vadd.f32 %v4071_v13, %v3983_v25  ;;  %v9206_v24 = vpop.f32.mrf.mxu3  ;;  %v7949_v25 = vld [vmem:[#allocation10 + $0x1c0] sm:$0xff] }
 0x344   :  { %v3984_v40 = vpop.f32.mrf.mxu1  ;;  %5538 = vmatpush.bf16.msra.mxu3 %v7949_v25 }
 0x345   :  { %v3903_v56 = vpop.f32.mrf.mxu0  ;;  %v3985_v0 = vadd.f32 %v3984_v40, %v3896_v23  ;;  %v6925_v23 = vld [vmem:[#allocation3 + $0x174] sm:$0xf0]  ;;  %v7808_v40 = vld [vmem:[#allocation3 + $0x178] sm:$0xf0] }
 0x346   :  { %v6928_v45 = vor.u32 %v7806_v18, %v6925_v23  ;;  %v6932_v4 = vor.u32 %v7808_v40, %v6931_v57  ;;  %v7962_v57 = vld [vmem:[#allocation10 + $0x228] sm:$0xff] }
 0x347   :  { %5612 = vmatpush.bf16.msra.mxu0 %v7962_v57 }
 0x348   :  { %3942 = vmatmul.bf16.gmra.mxu0 %v6924_v38  ;;  %v7873_v38 = vld [vmem:[#allocation3 + $0x140] sm:$0xf0] }
 0x34a   :  { %v4073_v27 = vpop.f32.mrf.mxu2 }
 0x34b   :  { %v9210_v62 = vadd.f32 %v4073_v27, %v3985_v0  ;;  %v9212_v59 = vpop.f32.mrf.mxu3  ;;  %v3904_v0 = vadd.f32 %v9102_v11, %v3903_v56  ;;  %v7187_v27 = vld [vmem:[#allocation3 + $0x138] sm:$0xf] }
 0x34c   :  { %v3987_v47 = vpop.f32.mrf.mxu1  ;;  %v7188_v55 = vor.u32 %v7873_v38, %v7187_v27 }
 0x34d   :  { %v3905_v35 = vpop.f32.mrf.mxu0  ;;  %v3988_v37 = vadd.f32 %v3987_v47, %v3899_v9 }
 0x34e   :  { %v3906_v12 = vadd.f32 %v9102_v11, %v3905_v35 }
 0x34f   :  { %4026 = vmatmul.bf16.gmra.mxu1 %v6916_v50  ;;  %4115 = vmatmul.bf16.gmra.mxu2 %v6920_v31  ;;  %v7836_v50 = vld [vmem:[#allocation3 + $0x1c] sm:$0xf] }
 0x350   :  { %4726 = vmatmul.bf16.gmra.mxu3 %v7176_v17  ;;  %v7048_v31 = vor.u32 %v7836_v50, %v7045_v26  ;;  %v7039_v17 = vld [vmem:[#allocation3 + $0x8] sm:$0xf]  ;;  %v7903_v26 = vld [vmem:[#allocation3 + $0x50] sm:$0xf0]  ;;  %v7309_v50 = vld [vmem:[#allocation3 + $0x54] sm:$0xf0] }
 0x351   :  { %v7040_v60 = vor.u32 %v7835_v36, %v7039_v17 }
 0x352   :  { %v4076_v39 = vpop.f32.mrf.mxu2 }
 0x353   :  { %v9216_v22 = vadd.f32 %v4076_v39, %v3988_v37  ;;  %v9218_v49 = vpop.f32.mrf.mxu3 }
 0x354   :  { %v3989_v21 = vpop.f32.mrf.mxu1 }
 0x355   :  { %v3908_v44 = vpop.f32.mrf.mxu0  ;;  %v3990_v54 = vadd.f32 %v3989_v21, %v3901_v33  ;;  %v7297_v33 = vld [vmem:[#allocation3 + $0x3c] sm:$0xf0] }
 0x356   :  { %v3909_v25 = vadd.f32 %v9102_v11, %v3908_v44 }
 0x358   :  { %4745 = vmatmul.bf16.vlgmr.msrb.gmra.mxu0 %v7036_v10  ;;  %v7296_v10 = vor.u32 %v7900_v46, %v7295_v58 }
 0x35a   :  { %v4078_v13 = vpop.f32.mrf.mxu2 }
 0x35b   :  { %v9221_v51 = vadd.f32 %v4078_v13, %v3990_v54  ;;  %v9223_v14 = vpop.f32.mrf.mxu3  ;;  %v7899_v13 = vld [vmem:[#allocation3 + $0x34] sm:$0xf] }
 0x35c   :  { %v3992_v1 = vpop.f32.mrf.mxu1  ;;  %v7300_v23 = vor.u32 %v7899_v13, %v7297_v33  ;;  %v7902_v33 = vld [vmem:[#allocation3 + $0x4c] sm:$0xf] }
 0x35d   :  { %v3910_v63 = vpop.f32.mrf.mxu0  ;;  %v3993_v30 = vadd.f32 %v3992_v1, %v3904_v0  ;;  %v7057_v1 = vld [vmem:[#allocation3 + $0x3c] sm:$0xf0] }
 0x35e   :  { %v3911_v44 = vadd.f32 %v9102_v11, %v3910_v63 }
 0x35f   :  { %4031 = vmatmul.bf16.gmra.mxu1 %v6928_v45  ;;  %4120 = vmatmul.bf16.gmra.mxu2 %v6932_v4  ;;  %v7839_v4 = vld [vmem:[#allocation3 + $0x34] sm:$0xf] }
 0x360   :  { %4731 = vmatmul.bf16.gmra.mxu3 %v7188_v55  ;;  %v7060_v27 = vor.u32 %v7839_v4, %v7057_v1  ;;  %v7906_v4 = vld [vmem:[#allocation3 + $0x68] sm:$0xf0] }
 0x362   :  { %v4081_v28 = vpop.f32.mrf.mxu2 }
 0x363   :  { %v9226_v56 = vadd.f32 %v4081_v28, %v3993_v30  ;;  %v9228_v9 = vpop.f32.mrf.mxu3  ;;  %v7051_v28 = vld [vmem:[#allocation3 + $0x20] sm:$0xf] }
 0x364   :  { %v3994_v47 = vpop.f32.mrf.mxu1 }
 0x365   :  { %v3913_v61 = vpop.f32.mrf.mxu0  ;;  %v3995_v37 = vadd.f32 %v3994_v47, %v3906_v12  ;;  %v7838_v12 = vld [vmem:[#allocation3 + $0x28] sm:$0xf0] }
 0x366   :  { %v3914_v47 = vadd.f32 %v9102_v11, %v3913_v61  ;;  %v7052_v46 = vor.u32 %v7838_v12, %v7051_v28  ;;  %v7321_v28 = vld [vmem:[#allocation3 + $0x6c] sm:$0xf0]  ;;  %v7961_v12 = vld [vmem:[#allocation10 + $0x220] sm:$0xff] }
 0x367   :  { %5613 = vmatpush.bf16.msra.mxu0 %v7961_v12  ;;  %v7333_v12 = vld [vmem:[#allocation3 + $0x84] sm:$0xf0] }
 0x368   :  { %4750 = vmatmul.bf16.gmra.mxu0 %v7048_v31 }
 0x36a   :  { %v4083_v19 = vpop.f32.mrf.mxu2 }
 0x36b   :  { %v9231_v39 = vadd.f32 %v4083_v19, %v3995_v37  ;;  %v9233_v35 = vpop.f32.mrf.mxu3  ;;  %v7307_v19 = vld [vmem:[#allocation3 + $0x48] sm:$0xf] }
 0x36c   :  { %v3997_v41 = vpop.f32.mrf.mxu1 }
 0x36d   :  { %v3915_v21 = vpop.f32.mrf.mxu0  ;;  %v3998_v54 = vadd.f32 %v3997_v41, %v3909_v25  ;;  %v7308_v25 = vor.u32 %v7903_v26, %v7307_v19  ;;  %v7312_v41 = vor.u32 %v7902_v33, %v7309_v50 }
 0x36f   :  { %4824 = vmatmul.bf16.vlgmr.msra.gmra.mxu1 %v7040_v60  ;;  %5460 = vmatmul.bf16.vlgmr.msrb.gmra.mxu2 %v7296_v10  ;;  %v7069_v10 = vld [vmem:[#allocation3 + $0x54] sm:$0xf0] }
 0x370   :  { %5539 = vmatmul.bf16.vlgmr.msra.gmra.mxu3 %v7300_v23 }
 0x372   :  { %v4086_v40 = vpop.f32.mrf.mxu2 }
 0x373   :  { %v9236_v0 = vadd.f32 %v4086_v40, %v3998_v54  ;;  %v9238_v38 = vpop.f32.mrf.mxu3  ;;  %v3916_v54 = vadd.f32 %v9102_v11, %v3915_v21  ;;  %v7842_v40 = vld [vmem:[#allocation3 + $0x4c] sm:$0xf] }
 0x374   :  { %v3999_v18 = vpop.f32.mrf.mxu1 }
 0x375   :  { %v3918_v30 = vpop.f32.mrf.mxu0  ;;  %v4000_v45 = vadd.f32 %v3999_v18, %v3911_v44  ;;  %v7072_v44 = vor.u32 %v7842_v40, %v7069_v10  ;;  %v7063_v18 = vld [vmem:[#allocation3 + $0x38] sm:$0xf]  ;;  %v7845_v40 = vld [vmem:[#allocation3 + $0x64] sm:$0xf] }
 0x378   :  { %4755 = vmatmul.bf16.gmra.mxu0 %v7060_v27  ;;  %v3919_v27 = vadd.f32 %v9102_v11, %v3918_v30 }
 0x37a   :  { %v4088_v55 = vpop.f32.mrf.mxu2 }
 0x37b   :  { %v9241_v37 = vadd.f32 %v4088_v55, %v4000_v45  ;;  %v9243_v63 = vpop.f32.mrf.mxu3  ;;  %v7841_v45 = vld [vmem:[#allocation3 + $0x40] sm:$0xf0] }
 0x37c   :  { %v4002_v31 = vpop.f32.mrf.mxu1  ;;  %v7064_v19 = vor.u32 %v7841_v45, %v7063_v18  ;;  %v7075_v18 = vld [vmem:[#allocation3 + $0x50] sm:$0xf]  ;;  %v7844_v45 = vld [vmem:[#allocation3 + $0x58] sm:$0xf0] }
 0x37d   :  { %v3920_v17 = vpop.f32.mrf.mxu0  ;;  %v4003_v36 = vadd.f32 %v4002_v31, %v3914_v47  ;;  %v7319_v47 = vld [vmem:[#allocation3 + $0x60] sm:$0xf] }
 0x37e   :  { %v3921_v30 = vadd.f32 %v9102_v11, %v3920_v17 }
 0x37f   :  { %4829 = vmatmul.bf16.gmra.mxu1 %v7052_v46  ;;  %5465 = vmatmul.bf16.gmra.mxu2 %v7308_v25  ;;  %v7905_v46 = vld [vmem:[#allocation3 + $0x64] sm:$0xf] }
 0x380   :  { %5544 = vmatmul.bf16.gmra.mxu3 %v7312_v41  ;;  %v7324_v25 = vor.u32 %v7905_v46, %v7321_v28 }
 0x382   :  { %v4091_v58 = vpop.f32.mrf.mxu2 }
 0x383   :  { %v9246_v61 = vadd.f32 %v4091_v58, %v4003_v36  ;;  %v9248_v60 = vpop.f32.mrf.mxu3  ;;  %v7320_v36 = vor.u32 %v7906_v4, %v7319_v47  ;;  %v7909_v4 = vld [vmem:[#allocation3 + $0x80] sm:$0xf0]  ;;  %v7331_v47 = vld [vmem:[#allocation3 + $0x78] sm:$0xf] }
 0x384   :  { %v4004_v13 = vpop.f32.mrf.mxu1  ;;  %v7332_v46 = vor.u32 %v7909_v4, %v7331_v47  ;;  %v7960_v4 = vld [vmem:[#allocation10 + $0x218] sm:$0xff] }
 0x385   :  { %v3923_v23 = vpop.f32.mrf.mxu0  ;;  %v4005_v57 = vadd.f32 %v4004_v13, %v3916_v54  ;;  %v7081_v54 = vld [vmem:[#allocation3 + $0x6c] sm:$0xf0]  ;;  %v7912_v47 = vld [vmem:[#allocation3 + $0x98] sm:$0xf0]  ;;  %5614 = vmatpush.bf16.msra.mxu0 %v7960_v4 }
 0x388   :  { %4760 = vmatmul.bf16.gmra.mxu0 %v7072_v44  ;;  %v7084_v44 = vor.u32 %v7845_v40, %v7081_v54 }
 0x38a   :  { %v4093_v1 = vpop.f32.mrf.mxu2 }
 0x38b   :  { %v9251_v55 = vadd.f32 %v4093_v1, %v4005_v57  ;;  %v9253_v21 = vpop.f32.mrf.mxu3 }
 0x38c   :  { %v4007_v26 = vpop.f32.mrf.mxu1 }
 0x38d   :  { %v3925_v50 = vpop.f32.mrf.mxu0  ;;  %v4008_v31 = vadd.f32 %v4007_v26, %v3919_v27  ;;  %v3924_v27 = vadd.f32 %v9102_v11, %v3923_v23  ;;  %v9268_v11 = vld [vmem:[%s9497_s4] ss:$0 sm:$0xff]  ;;  %s8126_s4 = smov [#allocation11]  }
 0x38e   :  { %v3926_v23 = vadd.f32 %v9268_v11, %v3925_v50  ;;  %s5909_s16 = sshll.u32 %s8126_s4, 4  ;;  %s5910_s16 = int_to_ptr.vmem [resolvable:$true] %s5909_s16 }
 0x38f   :  { %4834 = vmatmul.bf16.gmra.mxu1 %v7064_v19  ;;  %5470 = vmatmul.bf16.gmra.mxu2 %v7320_v36  ;;  %v7076_v36 = vor.u32 %v7844_v45, %v7075_v18  ;;  %v7848_v18 = vld [vmem:[#allocation3 + $0x7c] sm:$0xf] }
 0x390   :  { %5549 = vmatmul.bf16.gmra.mxu3 %v7324_v25  ;;  %v7908_v25 = vld [vmem:[#allocation3 + $0x7c] sm:$0xf] }
 0x392   :  { %v4096_v33 = vpop.f32.mrf.mxu2 }
 0x393   :  { %v9256_v41 = vadd.f32 %v4096_v33, %v4008_v31  ;;  %v9258_v58 = vpop.f32.mrf.mxu3  ;;  %v7336_v33 = vor.u32 %v7908_v25, %v7333_v12  ;;  %v7087_v12 = vld [vmem:[#allocation3 + $0x68] sm:$0xf] }
 0x394   :  { %v4009_v10 = vpop.f32.mrf.mxu1 }
 0x395   :  { %v3928_v13 = vpop.f32.mrf.mxu0  ;;  %v4010_v57 = vadd.f32 %v4009_v10, %v3921_v30 }
 0x398   :  { %4765 = vmatmul.bf16.gmra.mxu0 %v7084_v44 }
 0x39a   :  { %v4098_v1 = vpop.f32.mrf.mxu2 }
 0x39b   :  { %v9261_v28 = vadd.f32 %v4098_v1, %v4010_v57  ;;  %v9263_v17 = vpop.f32.mrf.mxu3  ;;  %v7093_v57 = vld [vmem:[#allocation3 + $0x84] sm:$0xf0] }
 0x39c   :  { %v4012_v26 = vpop.f32.mrf.mxu1  ;;  %v7096_v45 = vor.u32 %v7848_v18, %v7093_v57  ;;  %v7911_v18 = vld [vmem:[#allocation3 + $0x94] sm:$0xf] }
 0x39d   :  { %v3930_v31 = vpop.f32.mrf.mxu0  ;;  %v4013_v19 = vadd.f32 %v4012_v26, %v3924_v27  ;;  %v7847_v26 = vld [vmem:[#allocation3 + $0x70] sm:$0xf0] }
 0x39e   :  { %v3931_v4 = vadd.f32 %v9268_v11, %v3930_v31 }
 0x39f   :  { %4839 = vmatmul.bf16.gmra.mxu1 %v7076_v36  ;;  %5475 = vmatmul.bf16.gmra.mxu2 %v7332_v46  ;;  %v3929_v36 = vadd.f32 %v9268_v11, %v3928_v13  ;;  %v7345_v46 = vld [vmem:[#allocation3 + $0x9c] sm:$0xf0] }
 0x3a0   :  { %5554 = vmatmul.bf16.gmra.mxu3 %v7336_v33  ;;  %v7343_v33 = vld [vmem:[#allocation3 + $0x90] sm:$0xf] }
 0x3a1   :  { %v7344_v57 = vor.u32 %v7912_v47, %v7343_v33  ;;  %v7850_v47 = vld [vmem:[#allocation3 + $0x88] sm:$0xf0] }
 0x3a2   :  { %v4101_v30 = vpop.f32.mrf.mxu2 }
 0x3a3   :  { %v9271_v54 = vadd.f32 %v4101_v30, %v4013_v19  ;;  %v9273_v10 = vpop.f32.mrf.mxu3 }
 0x3a4   :  { %v4014_v40 = vpop.f32.mrf.mxu1 }
 0x3a5   :  { %v3933_v44 = vpop.f32.mrf.mxu0  ;;  %v4015_v1 = vadd.f32 %v4014_v40, %v3926_v23  ;;  %v7088_v40 = vor.u32 %v7847_v26, %v7087_v12  ;;  %v7099_v26 = vld [vmem:[#allocation3 + $0x80] sm:$0xf] }
 0x3a8   :  { %4770 = vmatmul.bf16.gmra.mxu0 %v7096_v45  ;;  %v7348_v45 = vor.u32 %v7911_v18, %v7345_v46  ;;  %v7915_v46 = vld [vmem:[#allocation3 + $0xb0] sm:$0xf0] }
 0x3aa   :  { %v4103_v27 = vpop.f32.mrf.mxu2 }
 0x3ab   :  { %v9276_v50 = vadd.f32 %v4103_v27, %v4015_v1  ;;  %v9278_v19 = vpop.f32.mrf.mxu3  ;;  %v7105_v27 = vld [vmem:[#allocation3 + $0x9c] sm:$0xf0] }
 0x3ac   :  { %v4017_v25 = vpop.f32.mrf.mxu1 }
 0x3ad   :  { %9581 = vst [vmem:[#allocation44_spill] sm:$0xff] %v9276_v50  ;;  %v3935_v30 = vpop.f32.mrf.mxu0  ;;  %v4018_v23 = vadd.f32 %v4017_v25, %v3929_v36  ;;  %v7851_v50 = vld [vmem:[#allocation3 + $0x94] sm:$0xf]  ;;  %v3934_v25 = vadd.f32 %v9268_v11, %v3933_v44 }
 0x3ae   :  { %v7108_v36 = vor.u32 %v7851_v50, %v7105_v27 }
 0x3af   :  { %4844 = vmatmul.bf16.gmra.mxu1 %v7088_v40  ;;  %5480 = vmatmul.bf16.gmra.mxu2 %v7344_v57  ;;  %v7355_v40 = vld [vmem:[#allocation3 + $0xa8] sm:$0xf] }
 0x3b0   :  { %5559 = vmatmul.bf16.gmra.mxu3 %v7348_v45  ;;  %v7100_v45 = vor.u32 %v7850_v47, %v7099_v26 }
 0x3b2   :  { %v4106_v7 = vpop.f32.mrf.mxu2 }
 0x3b3   :  { %v9281_v13 = vadd.f32 %v4106_v7, %v4018_v23  ;;  %v9283_v1 = vpop.f32.mrf.mxu3  ;;  %v7357_v7 = vld [vmem:[#allocation3 + $0xb4] sm:$0xf0] }
 0x3b4   :  { %9583 = vst [vmem:[#allocation40_spill] sm:$0xff] %v9283_v1  ;;  %v4019_v15 = vpop.f32.mrf.mxu1 }
 0x3b5   :  { %9582 = vst [vmem:[#allocation23_spill] sm:$0xff] %v9281_v13  ;;  %v3938_v8 = vpop.f32.mrf.mxu0  ;;  %v4020_v16 = vadd.f32 %v4019_v15, %v3931_v4  ;;  %v7356_v15 = vor.u32 %v7915_v46, %v7355_v40  ;;  %v7914_v4 = vld [vmem:[#allocation3 + $0xac] sm:$0xf]  ;;  %v7111_v46 = vld [vmem:[#allocation3 + $0x98] sm:$0xf] }
 0x3b6   :  { %v7360_v50 = vor.u32 %v7914_v4, %v7357_v7  ;;  %v7853_v7 = vld [vmem:[#allocation3 + $0xa0] sm:$0xf0]  ;;  %v3939_v40 = vadd.f32 %v9268_v11, %v3938_v8  ;;  %v7367_v4 = vld [vmem:[#allocation3 + $0xc0] sm:$0xf] }
 0x3b8   :  { %4775 = vmatmul.bf16.gmra.mxu0 %v7108_v36  ;;  %v3936_v36 = vadd.f32 %v9268_v11, %v3935_v30 }
 0x3ba   :  { %v4108_v12 = vpop.f32.mrf.mxu2 }
 0x3bb   :  { %v9286_v33 = vadd.f32 %v4108_v12, %v4020_v16  ;;  %v9288_v31 = vpop.f32.mrf.mxu3  ;;  %v7117_v12 = vld [vmem:[#allocation3 + $0xb4] sm:$0xf0] }
 0x3bc   :  { %9585 = vst [vmem:[#allocation19_spill] sm:$0xff] %v9288_v31  ;;  %v4022_v23 = vpop.f32.mrf.mxu1 }
 0x3bd   :  { %9584 = vst [vmem:[#allocation36_spill] sm:$0xff] %v9286_v33  ;;  %v3940_v57 = vpop.f32.mrf.mxu0  ;;  %v4023_v18 = vadd.f32 %v4022_v23, %v3934_v25  ;;  %v7959_v33 = vld [vmem:[#allocation10 + $0x210] sm:$0xff]  ;;  %v7854_v25 = vld [vmem:[#allocation3 + $0xac] sm:$0xf] }
 0x3be   :  { %5615 = vmatpush.bf16.msra.mxu0 %v7959_v33  ;;  %v7120_v26 = vor.u32 %v7854_v25, %v7117_v12  ;;  %v7918_v23 = vld [vmem:[#allocation3 + $0xc8] sm:$0xf0]  ;;  %v7917_v33 = vld [vmem:[#allocation3 + $0xc4] sm:$0xf] }
 0x3bf   :  { %4849 = vmatmul.bf16.gmra.mxu1 %v7100_v45  ;;  %5485 = vmatmul.bf16.gmra.mxu2 %v7356_v15  ;;  %v7369_v45 = vld [vmem:[#allocation3 + $0xcc] sm:$0xf0] }
 0x3c0   :  { %5564 = vmatmul.bf16.gmra.mxu3 %v7360_v50  ;;  %v7372_v12 = vor.u32 %v7917_v33, %v7369_v45  ;;  %v7921_v45 = vld [vmem:[#allocation3 + $0xe0] sm:$0xf0] }
 0x3c2   :  { %v4111_v27 = vpop.f32.mrf.mxu2 }
 0x3c3   :  { %v9291_v44 = vadd.f32 %v4111_v27, %v4023_v18  ;;  %v9293_v16 = vpop.f32.mrf.mxu3 }
 0x3c4   :  { %9587 = vst [vmem:[#allocation25_spill] sm:$0xff] %v9293_v16  ;;  %v4024_v31 = vpop.f32.mrf.mxu1  ;;  %v7857_v16 = vld [vmem:[#allocation3 + $0xc4] sm:$0xf] }
 0x3c5   :  { %9586 = vst [vmem:[#allocation46_spill] sm:$0xff] %v9291_v44  ;;  %v3943_v13 = vpop.f32.mrf.mxu0  ;;  %v4025_v1 = vadd.f32 %v4024_v31, %v3936_v36  ;;  %v7112_v31 = vor.u32 %v7853_v7, %v7111_v46  ;;  %v7368_v36 = vor.u32 %v7918_v23, %v7367_v4  ;;  %v7123_v7 = vld [vmem:[#allocation3 + $0xb0] sm:$0xf]  ;;  %v7856_v23 = vld [vmem:[#allocation3 + $0xb8] sm:$0xf0] }
 0x3c8   :  { %4780 = vmatmul.bf16.gmra.mxu0 %v7120_v26  ;;  %v3941_v26 = vadd.f32 %v9268_v11, %v3940_v57 }
 0x3ca   :  { %v4113_v47 = vpop.f32.mrf.mxu2 }
 0x3cb   :  { %v9296_v30 = vadd.f32 %v4113_v47, %v4025_v1  ;;  %v9298_v18 = vpop.f32.mrf.mxu3  ;;  %v7129_v47 = vld [vmem:[#allocation3 + $0xcc] sm:$0xf0] }
 0x3cc   :  { %9589 = vst [vmem:[#allocation37_spill] sm:$0xff] %v9298_v18  ;;  %v4027_v15 = vpop.f32.mrf.mxu1 }
 0x3cd   :  { %9588 = vst [vmem:[#allocation43_spill] sm:$0xff] %v9296_v30  ;;  %v3945_v50 = vpop.f32.mrf.mxu0  ;;  %v4028_v27 = vadd.f32 %v4027_v15, %v3939_v40  ;;  %v7132_v40 = vor.u32 %v7857_v16, %v7129_v47  ;;  %v3944_v15 = vadd.f32 %v9268_v11, %v3943_v13  ;;  %v7958_v47 = vld [vmem:[#allocation10 + $0x208] sm:$0xff] }
 0x3ce   :  { %5616 = vmatpush.bf16.msra.mxu0 %v7958_v47  ;;  %v3946_v13 = vadd.f32 %v9268_v11, %v3945_v50  ;;  %v7393_v50 = vld [vmem:[#allocation3 + $0xfc] sm:$0xf0] }
 0x3cf   :  { %4854 = vmatmul.bf16.gmra.mxu1 %v7112_v31  ;;  %5490 = vmatmul.bf16.gmra.mxu2 %v7368_v36  ;;  %v7379_v36 = vld [vmem:[#allocation3 + $0xd8] sm:$0xf] }
 0x3d0   :  { %5569 = vmatmul.bf16.gmra.mxu3 %v7372_v12 }
 0x3d2   :  { %v4116_v25 = vpop.f32.mrf.mxu2 }
 0x3d3   :  { %v9301_v8 = vadd.f32 %v4116_v25, %v4028_v27  ;;  %v9303_v1 = vpop.f32.mrf.mxu3  ;;  %v7381_v27 = vld [vmem:[#allocation3 + $0xe4] sm:$0xf0]  ;;  %v7124_v25 = vor.u32 %v7856_v23, %v7123_v7  ;;  %v7860_v7 = vld [vmem:[#allocation3 + $0xdc] sm:$0xf] }
 0x3d4   :  { %v4029_v30 = vpop.f32.mrf.mxu1 }
 0x3d5   :  { %9590 = vst [vmem:[#allocation20_spill] sm:$0xff] %v9301_v8  ;;  %v4746_v18 = vpop.f32.mrf.mxu0  ;;  %v4030_v44 = vadd.f32 %v4029_v30, %v3941_v26  ;;  %v7380_v30 = vor.u32 %v7921_v45, %v7379_v36  ;;  %v7920_v26 = vld [vmem:[#allocation3 + $0xdc] sm:$0xf] }
 0x3d6   :  { %v7384_v16 = vor.u32 %v7920_v26, %v7381_v27  ;;  %v7135_v27 = vld [vmem:[#allocation3 + $0xc8] sm:$0xf]  ;;  %v7924_v36 = vld [vmem:[#allocation3 + $0xf8] sm:$0xf0]  ;;  %v7391_v26 = vld [vmem:[#allocation3 + $0xf0] sm:$0xf] }
 0x3d8   :  { %4785 = vmatmul.bf16.gmra.mxu0 %v7132_v40 }
 0x3da   :  { %v4118_v46 = vpop.f32.mrf.mxu2 }
 0x3db   :  { %v9306_v4 = vadd.f32 %v4118_v46, %v4030_v44  ;;  %v9308_v57 = vpop.f32.mrf.mxu3 }
 0x3dc   :  { %9592 = vst [vmem:[#allocation27_spill] sm:$0xff] %v9308_v57  ;;  %v4032_v31 = vpop.f32.mrf.mxu1 }
 0x3dd   :  { %9591 = vst [vmem:[#allocation48_spill] sm:$0xff] %v9306_v4  ;;  %v4748_v33 = vpop.f32.mrf.mxu0  ;;  %v4033_v12 = vadd.f32 %v4032_v31, %v3944_v15  ;;  %v7141_v4 = vld [vmem:[#allocation3 + $0xe4] sm:$0xf0]  ;;  %v7859_v31 = vld [vmem:[#allocation3 + $0xd0] sm:$0xf0] }
 0x3de   :  { %v7144_v23 = vor.u32 %v7860_v7, %v7141_v4 }
 0x3df   :  { %4859 = vmatmul.bf16.gmra.mxu1 %v7124_v25  ;;  %5495 = vmatmul.bf16.gmra.mxu2 %v7380_v30  ;;  %v4747_v25 = vadd.f32 %v4746_v18, %v9165_v52  ;;  %v4749_v18 = vadd.f32 %v4748_v33, %v9173_v53  ;;  %v7405_v33 = vld [vmem:[#allocation3 + $0x114] sm:$0xf0] }
 0x3e0   :  { %5574 = vmatmul.bf16.gmra.mxu3 %v7384_v16 }
 0x3e2   :  { %v4121_v40 = vpop.f32.mrf.mxu2 }
 0x3e3   :  { %v9311_v44 = vadd.f32 %v4121_v40, %v4033_v12  ;;  %v9313_v46 = vpop.f32.mrf.mxu3  ;;  %v7136_v40 = vor.u32 %v7859_v31, %v7135_v27  ;;  %v7863_v27 = vld [vmem:[#allocation3 + $0xf4] sm:$0xf] }
 0x3e4   :  { %v4034_v57 = vpop.f32.mrf.mxu1 }
 0x3e5   :  { %v4751_v8 = vpop.f32.mrf.mxu0  ;;  %v4035_v15 = vadd.f32 %v4034_v57, %v3946_v13  ;;  %v7392_v57 = vor.u32 %v7924_v36, %v7391_v26  ;;  %v7923_v13 = vld [vmem:[#allocation3 + $0xf4] sm:$0xf] }
 0x3e6   :  { %v7396_v4 = vor.u32 %v7923_v13, %v7393_v50  ;;  %v7147_v50 = vld [vmem:[#allocation3 + $0xe0] sm:$0xf]  ;;  %v7927_v26 = vld [vmem:[#allocation3 + $0x110] sm:$0xf0]  ;;  %v7403_v13 = vld [vmem:[#allocation3 + $0x108] sm:$0xf] }
 0x3e8   :  { %4790 = vmatmul.bf16.gmra.mxu0 %v7144_v23  ;;  %v7153_v23 = vld [vmem:[#allocation3 + $0xfc] sm:$0xf0] }
 0x3e9   :  { %v7156_v31 = vor.u32 %v7863_v27, %v7153_v23 }
 0x3ea   :  { %v4123_v45 = vpop.f32.mrf.mxu2 }
 0x3eb   :  { %v9316_v30 = vadd.f32 %v4123_v45, %v4035_v15  ;;  %v9318_v11 = vpop.f32.mrf.mxu3 }
 0x3ec   :  { %9594 = vst [vmem:[#allocation39_spill] sm:$0xff] %v9318_v11  ;;  %v4825_v12 = vpop.f32.mrf.mxu1 }
 0x3ed   :  { %9593 = vst [vmem:[#allocation45_spill] sm:$0xff] %v9316_v30  ;;  %v4753_v16 = vpop.f32.mrf.mxu0  ;;  %v4826_v47 = vadd.f32 %v4825_v12, %v4747_v25  ;;  %v7862_v12 = vld [vmem:[#allocation3 + $0xe8] sm:$0xf0] }
 0x3ef   :  { %v9321_v7 = vadd.f32 %v4826_v47, %v9163_v2  ;;  %4864 = vmatmul.bf16.gmra.mxu1 %v7136_v40  ;;  %5500 = vmatmul.bf16.gmra.mxu2 %v7392_v57  ;;  %v4752_v47 = vadd.f32 %v4751_v8, %v9179_v42  ;;  %v4754_v8 = vadd.f32 %v4753_v16, %v9184_v32  ;;  %v7417_v16 = vld [vmem:[#allocation3 + $0x12c] sm:$0xf0] }
 0x3f0   :  { %5579 = vmatmul.bf16.gmra.mxu3 %v7396_v4  ;;  %v7957_v4 = vld [vmem:[#allocation10 + $0x200] sm:$0xff] }
 0x3f1   :  { %5617 = vmatpush.bf16.msra.mxu0 %v7957_v4  ;;  %v7930_v4 = vld [vmem:[#allocation3 + $0x128] sm:$0xf0] }
 0x3f2   :  { %v5461_v52 = vpop.f32.mrf.mxu2 }
 0x3f3   :  { %v5540_v15 = vpop.f32.mrf.mxu3 }
 0x3f4   :  { %v9324_v45 = vadd.f32 %v5540_v15, %v5461_v52  ;;  %v4827_v30 = vpop.f32.mrf.mxu1  ;;  %v7404_v15 = vor.u32 %v7927_v26, %v7403_v13  ;;  %v7865_v13 = vld [vmem:[#allocation3 + $0x100] sm:$0xf0] }
 0x3f5   :  { %v4756_v11 = vpop.f32.mrf.mxu0  ;;  %v4828_v25 = vadd.f32 %v4827_v30, %v4749_v18  ;;  %v7148_v18 = vor.u32 %v7862_v12, %v7147_v50  ;;  %v7866_v12 = vld [vmem:[#allocation3 + $0x10c] sm:$0xf] }
 0x3f7   :  { %v9327_v36 = vadd.f32 %v4828_v25, %v9171_v34  ;;  %v7926_v34 = vld [vmem:[#allocation3 + $0x10c] sm:$0xf] }
 0x3f8   :  { %4795 = vmatmul.bf16.gmra.mxu0 %v7156_v31  ;;  %v7408_v23 = vor.u32 %v7926_v34, %v7405_v33  ;;  %v7165_v31 = vld [vmem:[#allocation3 + $0x114] sm:$0xf0]  ;;  %v7415_v34 = vld [vmem:[#allocation3 + $0x120] sm:$0xf] }
 0x3f9   :  { %v7168_v26 = vor.u32 %v7866_v12, %v7165_v31  ;;  %v7929_v31 = vld [vmem:[#allocation3 + $0x124] sm:$0xf] }
 0x3fa   :  { %v5463_v2 = vpop.f32.mrf.mxu2 }
 0x3fb   :  { %v5542_v53 = vpop.f32.mrf.mxu3 }
 0x3fc   :  { %v9330_v40 = vadd.f32 %v5542_v53, %v5463_v2  ;;  %v4830_v57 = vpop.f32.mrf.mxu1 }
 0x3fd   :  { %v4758_v30 = vpop.f32.mrf.mxu0  ;;  %v4831_v52 = vadd.f32 %v4830_v57, %v4752_v47  ;;  %v7159_v57 = vld [vmem:[#allocation3 + $0xf8] sm:$0xf] }
 0x3ff   :  { %v9333_v25 = vadd.f32 %v4831_v52, %v9177_v5  ;;  %4869 = vmatmul.bf16.gmra.mxu1 %v7148_v18  ;;  %5505 = vmatmul.bf16.gmra.mxu2 %v7404_v15  ;;  %v4757_v52 = vadd.f32 %v4756_v11, %v9191_v20  ;;  %v4759_v20 = vadd.f32 %v4758_v30, %v9198_v48  ;;  %v7177_v11 = vld [vmem:[#allocation3 + $0x12c] sm:$0xf0] }
 0x400   :  { %5584 = vmatmul.bf16.gmra.mxu3 %v7408_v23 }
 0x402   :  { %v5466_v42 = vpop.f32.mrf.mxu2 }
 0x403   :  { %v5545_v27 = vpop.f32.mrf.mxu3 }
 0x404   :  { %v9336_v2 = vadd.f32 %v5545_v27, %v5466_v42  ;;  %v4832_v53 = vpop.f32.mrf.mxu1  ;;  %v7416_v27 = vor.u32 %v7930_v4, %v7415_v34  ;;  %v7933_v4 = vld [vmem:[#allocation3 + $0x140] sm:$0xf0]  ;;  %v7427_v34 = vld [vmem:[#allocation3 + $0x138] sm:$0xf] }
 0x405   :  { %v4761_v47 = vpop.f32.mrf.mxu0  ;;  %v4833_v50 = vadd.f32 %v4832_v53, %v4754_v8  ;;  %v7160_v8 = vor.u32 %v7865_v13, %v7159_v57  ;;  %v7171_v57 = vld [vmem:[#allocation3 + $0x110] sm:$0xf]  ;;  %v7868_v13 = vld [vmem:[#allocation3 + $0x118] sm:$0xf0] }
 0x406   :  { %v7172_v30 = vor.u32 %v7868_v13, %v7171_v57  ;;  %v7871_v57 = vld [vmem:[#allocation3 + $0x130] sm:$0xf0]  ;;  %v7936_v13 = vld [vmem:[#allocation3 + $0x158] sm:$0xf0] }
 0x407   :  { %v9339_v33 = vadd.f32 %v4833_v50, %v9182_v43  ;;  %v7420_v43 = vor.u32 %v7929_v31, %v7417_v16  ;;  %v7429_v16 = vld [vmem:[#allocation3 + $0x144] sm:$0xf0] }
 0x408   :  { %4800 = vmatmul.bf16.gmra.mxu0 %v7168_v26 }
 0x40a   :  { %v5468_v5 = vpop.f32.mrf.mxu2 }
 0x40b   :  { %v5547_v32 = vpop.f32.mrf.mxu3 }
 0x40c   :  { %v9342_v18 = vadd.f32 %v5547_v32, %v5468_v5  ;;  %v4835_v15 = vpop.f32.mrf.mxu1  ;;  %v7869_v5 = vld [vmem:[#allocation3 + $0x124] sm:$0xf] }
 0x40d   :  { %v4763_v23 = vpop.f32.mrf.mxu0  ;;  %v4836_v42 = vadd.f32 %v4835_v15, %v4757_v52  ;;  %v7180_v32 = vor.u32 %v7869_v5, %v7177_v11 }
 0x40f   :  { %v9345_v53 = vadd.f32 %v4836_v42, %v9189_v6  ;;  %4874 = vmatmul.bf16.gmra.mxu1 %v7160_v8  ;;  %5510 = vmatmul.bf16.gmra.mxu2 %v7416_v27  ;;  %v4762_v6 = vadd.f32 %v4761_v47, %v9206_v24  ;;  %v7428_v8 = vor.u32 %v7933_v4, %v7427_v34  ;;  %v7932_v27 = vld [vmem:[#allocation3 + $0x13c] sm:$0xf]  ;;  %v7441_v4 = vld [vmem:[#allocation3 + $0x15c] sm:$0xf0] }
 0x410   :  { %5589 = vmatmul.bf16.gmra.mxu3 %v7420_v43  ;;  %v7432_v31 = vor.u32 %v7932_v27, %v7429_v16  ;;  %v7439_v16 = vld [vmem:[#allocation3 + $0x150] sm:$0xf]  ;;  %v7303_v27 = vld [vmem:[#allocation3 + $0x38] sm:$0xf] }
 0x411   :  { %v7440_v34 = vor.u32 %v7936_v13, %v7439_v16  ;;  %v7451_v13 = vld [vmem:[#allocation3 + $0x168] sm:$0xf] }
 0x414   :  { %v4837_v50 = vpop.f32.mrf.mxu1 }
 0x415   :  { %v4766_v12 = vpop.f32.mrf.mxu0  ;;  %v4838_v26 = vadd.f32 %v4837_v50, %v4759_v20  ;;  %v7189_v20 = vld [vmem:[#allocation3 + $0x144] sm:$0xf0]  ;;  %v7872_v50 = vld [vmem:[#allocation3 + $0x13c] sm:$0xf] }
 0x417   :  { %v9349_v52 = vadd.f32 %v4838_v26, %v9196_v29  ;;  %v4764_v29 = vadd.f32 %v4763_v23, %v9212_v59  ;;  %v7192_v26 = vor.u32 %v7872_v50, %v7189_v20  ;;  %v7874_v50 = vld [vmem:[#allocation3 + $0x148] sm:$0xf0] }
 0x418   :  { %4805 = vmatmul.bf16.gmra.mxu0 %v7180_v32  ;;  %v7183_v32 = vld [vmem:[#allocation3 + $0x128] sm:$0xf] }
 0x419   :  { %v7184_v23 = vor.u32 %v7871_v57, %v7183_v32  ;;  %v7453_v32 = vld [vmem:[#allocation3 + $0x174] sm:$0xf0] }
 0x41c   :  { %v4840_v15 = vpop.f32.mrf.mxu1 }
 0x41d   :  { %v4768_v42 = vpop.f32.mrf.mxu0  ;;  %v4841_v48 = vadd.f32 %v4840_v15, %v4762_v6 }
 0x41f   :  { %v9353_v43 = vadd.f32 %v4841_v48, %v9204_v3  ;;  %4879 = vmatmul.bf16.gmra.mxu1 %v7172_v30  ;;  %5515 = vmatmul.bf16.gmra.mxu2 %v7428_v8  ;;  %v4767_v3 = vadd.f32 %v4766_v12, %v9218_v49  ;;  %v7935_v48 = vld [vmem:[#allocation3 + $0x154] sm:$0xf] }
 0x420   :  { %5594 = vmatmul.bf16.gmra.mxu3 %v7432_v31  ;;  %v7444_v30 = vor.u32 %v7935_v48, %v7441_v4  ;;  %v7901_v31 = vld [vmem:[#allocation3 + $0x40] sm:$0xf0] }
 0x421   :  { %v7304_v20 = vor.u32 %v7901_v31, %v7303_v27 }
 0x424   :  { %v4842_v11 = vpop.f32.mrf.mxu1 }
 0x425   :  { %v4771_v24 = vpop.f32.mrf.mxu0  ;;  %v4843_v47 = vadd.f32 %v4842_v11, %v4764_v29 }
 0x427   :  { %v9357_v5 = vadd.f32 %v4843_v47, %v9210_v62  ;;  %v4769_v62 = vadd.f32 %v4768_v42, %v9223_v14  ;;  %v7195_v47 = vld [vmem:[#allocation3 + $0x140] sm:$0xf] }
 0x428   :  { %4810 = vmatmul.bf16.gmra.mxu0 %v7192_v26  ;;  %v7939_v26 = vld [vmem:[#allocation3 + $0x170] sm:$0xf0]  ;;  %v7196_v42 = vor.u32 %v7874_v50, %v7195_v47 }
 0x429   :  { %v7452_v4 = vor.u32 %v7939_v26, %v7451_v13  ;;  %v7339_v13 = vld [vmem:[#allocation3 + $0x80] sm:$0xf] }
 0x42c   :  { %v4845_v6 = vpop.f32.mrf.mxu1 }
 0x42d   :  { %v4773_v15 = vpop.f32.mrf.mxu0  ;;  %v4846_v59 = vadd.f32 %v4845_v6, %v4767_v3  ;;  %v7938_v6 = vld [vmem:[#allocation3 + $0x16c] sm:$0xf] }
 0x42e   :  { %v7456_v16 = vor.u32 %v7938_v6, %v7453_v32 }
 0x42f   :  { %v9361_v8 = vadd.f32 %v4846_v59, %v9216_v22  ;;  %4884 = vmatmul.bf16.gmra.mxu1 %v7184_v23  ;;  %5520 = vmatmul.bf16.gmra.mxu2 %v7440_v34  ;;  %v4772_v22 = vadd.f32 %v4771_v24, %v9228_v9  ;;  %v7315_v23 = vld [vmem:[#allocation3 + $0x50] sm:$0xf]  ;;  %v7904_v34 = vld [vmem:[#allocation3 + $0x58] sm:$0xf0] }
 0x430   :  { %5599 = vmatmul.bf16.gmra.mxu3 %v7444_v30  ;;  %v7316_v30 = vor.u32 %v7904_v34, %v7315_v23  ;;  %v7351_v34 = vld [vmem:[#allocation3 + $0x98] sm:$0xf] }
 0x434   :  { %v4847_v49 = vpop.f32.mrf.mxu1 }
 0x435   :  { %v4776_v12 = vpop.f32.mrf.mxu0  ;;  %v4848_v29 = vadd.f32 %v4847_v49, %v4769_v62 }
 0x436   :  { %v4777_v27 = vadd.f32 %v4776_v12, %v9238_v38 }
 0x437   :  { %v9365_v11 = vadd.f32 %v4848_v29, %v9221_v51  ;;  %v4774_v51 = vadd.f32 %v4773_v15, %v9233_v35  ;;  %v7327_v15 = vld [vmem:[#allocation3 + $0x68] sm:$0xf] }
 0x438   :  { %5618 = vmatmul.bf16.vlgmr.msra.gmra.mxu0 %v7304_v20  ;;  %v7907_v20 = vld [vmem:[#allocation3 + $0x70] sm:$0xf0] }
 0x43c   :  { %v4850_v57 = vpop.f32.mrf.mxu1 }
 0x43d   :  { %v4778_v3 = vpop.f32.mrf.mxu0  ;;  %v4851_v14 = vadd.f32 %v4850_v57, %v4772_v22  ;;  %v7328_v22 = vor.u32 %v7907_v20, %v7327_v15  ;;  %v7916_v15 = vld [vmem:[#allocation3 + $0xb8] sm:$0xf0] }
 0x43e   :  { %v4779_v35 = vadd.f32 %v4778_v3, %v9243_v63  ;;  %v7910_v3 = vld [vmem:[#allocation3 + $0x88] sm:$0xf0] }
 0x43f   :  { %v9369_v59 = vadd.f32 %v4851_v14, %v9226_v56  ;;  %4889 = vmatmul.bf16.gmra.mxu1 %v7196_v42  ;;  %5525 = vmatmul.bf16.gmra.mxu2 %v7452_v4  ;;  %v7340_v6 = vor.u32 %v7910_v3, %v7339_v13  ;;  %v9598_v13 = vld [vmem:[#allocation19_spill] sm:$0xff]  ;;  %v7375_v3 = vld [vmem:[#allocation3 + $0xc8] sm:$0xf] }
 0x440   :  { %5604 = vmatmul.bf16.gmra.mxu3 %v7456_v16 }
 0x444   :  { %v4852_v9 = vpop.f32.mrf.mxu1 }
 0x445   :  { %v4781_v24 = vpop.f32.mrf.mxu0  ;;  %v4853_v48 = vadd.f32 %v4852_v9, %v4774_v51  ;;  %v7913_v9 = vld [vmem:[#allocation3 + $0xa0] sm:$0xf0] }
 0x446   :  { %v4782_v38 = vadd.f32 %v4781_v24, %v9248_v60 }
 0x447   :  { %v9373_v62 = vadd.f32 %v4853_v48, %v9231_v39 }
 0x448   :  { %5623 = vmatmul.bf16.gmra.mxu0 %v7316_v30 }
 0x44c   :  { %v4855_v31 = vpop.f32.mrf.mxu1 }
 0x44d   :  { %v4783_v56 = vpop.f32.mrf.mxu0  ;;  %v4856_v49 = vadd.f32 %v4855_v31, %v4777_v27  ;;  %v7352_v27 = vor.u32 %v7913_v9, %v7351_v34 }
 0x44e   :  { %v4784_v63 = vadd.f32 %v4783_v56, %v9253_v21 }
 0x44f   :  { %v9377_v29 = vadd.f32 %v4856_v49, %v9236_v0 }
 0x454   :  { %v4857_v47 = vpop.f32.mrf.mxu1 }
 0x455   :  { %v4786_v50 = vpop.f32.mrf.mxu0  ;;  %v4858_v26 = vadd.f32 %v4857_v47, %v4779_v35  ;;  %v7363_v35 = vld [vmem:[#allocation3 + $0xb0] sm:$0xf] }
 0x456   :  { %v4787_v60 = vadd.f32 %v4786_v50, %v9258_v58 }
 0x457   :  { %v9381_v39 = vadd.f32 %v4858_v26, %v9241_v37  ;;  %v7364_v26 = vor.u32 %v7916_v15, %v7363_v35 }
 0x458   :  { %5628 = vmatmul.bf16.gmra.mxu0 %v7328_v22  ;;  %v9595_v22 = vld [vmem:[#allocation44_spill] sm:$0xff] }
 0x45c   :  { %v4860_v12 = vpop.f32.mrf.mxu1 }
 0x45d   :  { %v4788_v32 = vpop.f32.mrf.mxu0  ;;  %v4861_v57 = vadd.f32 %v4860_v12, %v4782_v38  ;;  %v9596_v38 = vld [vmem:[#allocation40_spill] sm:$0xff] }
 0x45e   :  { %v4789_v21 = vadd.f32 %v4788_v32, %v9263_v17 }
 0x45f   :  { %v9385_v0 = vadd.f32 %v4861_v57, %v9246_v61 }
 0x464   :  { %v4862_v14 = vpop.f32.mrf.mxu1 }
 0x465   :  { %v4791_v42 = vpop.f32.mrf.mxu0  ;;  %v4863_v4 = vadd.f32 %v4862_v14, %v4784_v63  ;;  %v9597_v63 = vld [vmem:[#allocation23_spill] sm:$0xff]  ;;  %v7919_v14 = vld [vmem:[#allocation3 + $0xd0] sm:$0xf0] }
 0x466   :  { %v4792_v58 = vadd.f32 %v4791_v42, %v9273_v10 }
 0x467   :  { %v9389_v37 = vadd.f32 %v4863_v4, %v9251_v55 }
 0x468   :  { %5633 = vmatmul.bf16.gmra.mxu0 %v7340_v6 }
 0x46c   :  { %v4865_v16 = vpop.f32.mrf.mxu1 }
 0x46d   :  { %v4793_v51 = vpop.f32.mrf.mxu0  ;;  %v4866_v23 = vadd.f32 %v4865_v16, %v4787_v60  ;;  %v7376_v60 = vor.u32 %v7919_v14, %v7375_v3  ;;  %v9599_v16 = vld [vmem:[#allocation36_spill] sm:$0xff]  ;;  %v9605_v14 = vld [vmem:[#allocation27_spill] sm:$0xff] }
 0x46e   :  { %v4794_v17 = vadd.f32 %v4793_v51, %v9278_v19 }
 0x46f   :  { %v9393_v61 = vadd.f32 %v4866_v23, %v9256_v41  ;;  %v9600_v23 = vld [vmem:[#allocation25_spill] sm:$0xff] }
 0x474   :  { %v4867_v24 = vpop.f32.mrf.mxu1 }
 0x475   :  { %v4796_v48 = vpop.f32.mrf.mxu0  ;;  %v4868_v30 = vadd.f32 %v4867_v24, %v4789_v21 }
 0x476   :  { %v4797_v10 = vadd.f32 %v4796_v48, %v9596_v38  ;;  %v9601_v48 = vld [vmem:[#allocation46_spill] sm:$0xff] }
 0x477   :  { %v9397_v55 = vadd.f32 %v4868_v30, %v9261_v28 }
 0x478   :  { %5638 = vmatmul.bf16.gmra.mxu0 %v7352_v27  ;;  %v9419_v27 = vpop.f32.mrf.mxu2 }
 0x47c   :  { %v4870_v31 = vpop.f32.mrf.mxu1 }
 0x47d   :  { %v4798_v56 = vpop.f32.mrf.mxu0  ;;  %v4871_v49 = vadd.f32 %v4870_v31, %v4792_v58  ;;  %v9421_v58 = vpop.f32.mrf.mxu3  ;;  %v9602_v31 = vld [vmem:[#allocation37_spill] sm:$0xff] }
 0x47e   :  { %v4799_v19 = vadd.f32 %v4798_v56, %v9598_v13 }
 0x47f   :  { %v9401_v41 = vadd.f32 %v4871_v49, %v9271_v54  ;;  %v7387_v49 = vld [vmem:[#allocation3 + $0xe0] sm:$0xf] }
 0x480   :  { %v9428_v38 = vpop.f32.mrf.mxu2 }
 0x484   :  { %v4872_v20 = vpop.f32.mrf.mxu1 }
 0x485   :  { %v4801_v47 = vpop.f32.mrf.mxu0  ;;  %v4873_v50 = vadd.f32 %v4872_v20, %v4794_v17  ;;  %v7922_v17 = vld [vmem:[#allocation3 + $0xe8] sm:$0xf0] }
 0x486   :  { %v4802_v21 = vadd.f32 %v4801_v47, %v9600_v23 }
 0x487   :  { %v9405_v28 = vadd.f32 %v4873_v50, %v9595_v22  ;;  %v7388_v50 = vor.u32 %v7922_v17, %v7387_v49  ;;  %v9607_v49 = vld [vmem:[#allocation21_spill] sm:$0xff] }
 0x488   :  { %5643 = vmatmul.bf16.gmra.mxu0 %v7364_v26  ;;  %v9603_v26 = vld [vmem:[#allocation43_spill] sm:$0xff] }
 0x48c   :  { %v4875_v12 = vpop.f32.mrf.mxu1 }
 0x48d   :  { %v4803_v32 = vpop.f32.mrf.mxu0  ;;  %v4876_v57 = vadd.f32 %v4875_v12, %v4797_v10  ;;  %v9430_v12 = vpop.f32.mrf.mxu3 }
 0x48e   :  { %v4804_v56 = vadd.f32 %v4803_v32, %v9602_v31  ;;  %v9604_v32 = vld [vmem:[#allocation20_spill] sm:$0xff] }
 0x48f   :  { %v9409_v54 = vadd.f32 %v4876_v57, %v9597_v63  ;;  %v9606_v31 = vld [vmem:[#allocation48_spill] sm:$0xff] }
 0x494   :  { %v4877_v42 = vpop.f32.mrf.mxu1 }
 0x495   :  { %v4806_v4 = vpop.f32.mrf.mxu0  ;;  %v4878_v6 = vadd.f32 %v4877_v42, %v4799_v19  ;;  %v5837_v19 = vld [vmem:[#allocation5 + $0xe0] sm:$0xff] }
 0x496   :  { %v4807_v22 = vadd.f32 %v4806_v4, %v9303_v1  ;;  %v9434_v4 = vpop.f32.mrf.mxu2 }
 0x497   :  { %v9413_v51 = vadd.f32 %v4878_v6, %v9599_v16  ;;  %v7925_v16 = vld [vmem:[#allocation3 + $0x100] sm:$0xf0] }
 0x498   :  { %5648 = vmatmul.bf16.gmra.mxu0 %v7376_v60  ;;  %v7399_v60 = vld [vmem:[#allocation3 + $0xf8] sm:$0xf] }
 0x49c   :  { %v4880_v34 = vpop.f32.mrf.mxu1 }
 0x49d   :  { %v4808_v9 = vpop.f32.mrf.mxu0  ;;  %v4881_v24 = vadd.f32 %v4880_v34, %v4802_v21 }
 0x49e   :  { %v4809_v42 = vadd.f32 %v4808_v9, %v9605_v14  ;;  %v5809_v9 = vld [vmem:[#allocation5] sm:$0xff]  ;;  %v9608_v14 = vld [vmem:[#allocation38_spill] sm:$0xff] }
 0x49f   :  { %v9417_v30 = vadd.f32 %v4881_v24, %v9601_v48  ;;  %v7400_v24 = vor.u32 %v7925_v16, %v7399_v60  ;;  %v9437_v48 = vpop.f32.mrf.mxu3  ;;  %v5810_v16 = vld [vmem:[#allocation5 + $0x8] sm:$0xff] }
 0x4a4   :  { %v4882_v35 = vpop.f32.mrf.mxu1 }
 0x4a5   :  { %v4811_v15 = vpop.f32.mrf.mxu0  ;;  %v4883_v20 = vadd.f32 %v4882_v35, %v4804_v56  ;;  %v5838_v35 = vld [vmem:[#allocation5 + $0xe8] sm:$0xff] }
 0x4a7   :  { %v9425_v47 = vadd.f32 %v4883_v20, %v9603_v26  ;;  %v4812_v26 = vadd.f32 %v4811_v15, %v9313_v46  ;;  %v9447_v60 = vpop.f32.mrf.mxu3 }
 0x4a8   :  { %5653 = vmatmul.bf16.gmra.mxu0 %v7388_v50 }
 0x4ac   :  { %v4885_v10 = vpop.f32.mrf.mxu1 }
 0x4ad   :  { %v4813_v57 = vpop.f32.mrf.mxu0  ;;  %v4886_v63 = vadd.f32 %v4885_v10, %v4807_v22 }
 0x4af   :  { %v4919_v13 = vadd.f32 %v4886_v63, %v9604_v32 }
 0x4b1   :  { %v5805_v3 = vmul.f32 0.1, %v4919_v13 }
 0x4b3   :  { %v5869_v6 = vadd.f32 %v5837_v19, %v5805_v3  ;;  %v9444_v3 = vpop.f32.mrf.mxu2 }
 0x4b4   :  { %v4887_v23 = vpop.f32.mrf.mxu1 }
 0x4b5   :  { %5901 = vst [vmem:[#allocation11 + $0xe0] sm:$0xff] %v5869_v6  ;;  %v5619_v21 = vpop.f32.mrf.mxu0  ;;  %v4888_v1 = vadd.f32 %v4887_v23, %v4809_v42  ;;  %v5839_v6 = vld [vmem:[#allocation5 + $0xf0] sm:$0xff]  ;;  %v9609_v23 = vld [vmem:[#allocation39_spill] sm:$0xff] }
 0x4b6   :  { %v5620_v34 = vadd.f32 %v5619_v21, %v9324_v45  ;;  %v4814_v21 = vadd.f32 %v4813_v57, %v9609_v23  ;;  %v5551_v23 = vadd.f32 %v9421_v58, %v9419_v27 }
 0x4b7   :  { %v4920_v56 = vadd.f32 %v4888_v1, %v9606_v31 }
 0x4b8   :  { %v5689_v17 = vadd.f32 %v5620_v34, %v9607_v49  ;;  %5658 = vmatmul.bf16.gmra.mxu0 %v7400_v24  ;;  %v7411_v34 = vld [vmem:[#allocation3 + $0x110] sm:$0xf]  ;;  %v7928_v24 = vld [vmem:[#allocation3 + $0x118] sm:$0xf0] }
 0x4b9   :  { %v5806_v20 = vmul.f32 0.1, %v4920_v56 }
 0x4ba   :  { %v5777_v50 = vmul.f32 0.1, %v5689_v17  ;;  %v7412_v17 = vor.u32 %v7928_v24, %v7411_v34 }
 0x4bb   :  { %v5870_v22 = vadd.f32 %v5838_v35, %v5806_v20  ;;  %v9610_v35 = vld [vmem:[#allocation45_spill] sm:$0xff]  ;;  %v9611_v20 = vld [vmem:[#allocation34_spill] sm:$0xff] }
 0x4bc   :  { %v5841_v10 = vadd.f32 %v5809_v9, %v5777_v50  ;;  %v4890_v63 = vpop.f32.mrf.mxu1 }
 0x4bd   :  { %5902 = vst [vmem:[#allocation11 + $0xe8] sm:$0xff] %v5870_v22  ;;  %v5621_v32 = vpop.f32.mrf.mxu0  ;;  %v4891_v45 = vadd.f32 %v4890_v63, %v4812_v26  ;;  %v5840_v26 = vld [vmem:[#allocation5 + $0xf8] sm:$0xff]  ;;  %v5811_v22 = vld [vmem:[#allocation5 + $0x10] sm:$0xff] }
 0x4be   :  { %5873 = vst [vmem:[#allocation11] sm:$0xff] %v5841_v10  ;;  %v5622_v13 = vadd.f32 %v5621_v32, %v9330_v40  ;;  %v5481_v10 = vpop.f32.mrf.mxu2  ;;  %v5560_v32 = vpop.f32.mrf.mxu3 }
 0x4bf   :  { %v4921_v19 = vadd.f32 %v4891_v45, %v9311_v44 }
 0x4c0   :  { %v5690_v42 = vadd.f32 %v5622_v13, %v9608_v14 }
 0x4c1   :  { %v5807_v46 = vmul.f32 0.1, %v4921_v19 }
 0x4c2   :  { %v5778_v15 = vmul.f32 0.1, %v5690_v42 }
 0x4c3   :  { %v5871_v1 = vadd.f32 %v5839_v6, %v5807_v46  ;;  %v5812_v6 = vld [vmem:[#allocation5 + $0x18] sm:$0xff]  ;;  %v7423_v46 = vld [vmem:[#allocation3 + $0x128] sm:$0xf] }
 0x4c4   :  { %v5842_v31 = vadd.f32 %v5810_v16, %v5778_v15  ;;  %v4892_v56 = vpop.f32.mrf.mxu1  ;;  %v7931_v15 = vld [vmem:[#allocation3 + $0x130] sm:$0xf0] }
 0x4c5   :  { %5903 = vst [vmem:[#allocation11 + $0xf0] sm:$0xff] %v5871_v1  ;;  %v5624_v40 = vpop.f32.mrf.mxu0  ;;  %v4893_v44 = vadd.f32 %v4892_v56, %v4814_v21  ;;  %v7424_v56 = vor.u32 %v7931_v15, %v7423_v46 }
 0x4c6   :  { %5874 = vst [vmem:[#allocation11 + $0x8] sm:$0xff] %v5842_v31  ;;  %v5625_v49 = vadd.f32 %v5624_v40, %v9336_v2  ;;  %v9612_v2 = vld [vmem:[#allocation18_spill] sm:$0xff]  ;;  %v5483_v21 = vpop.f32.mrf.mxu2  ;;  %v5562_v34 = vpop.f32.mrf.mxu3 }
 0x4c7   :  { %v4922_v9 = vadd.f32 %v4893_v44, %v9610_v35 }
 0x4c8   :  { %v5691_v50 = vadd.f32 %v5625_v49, %v9611_v20  ;;  %5663 = vmatmul.bf16.gmra.mxu0 %v7412_v17  ;;  %v5553_v49 = vadd.f32 %v9430_v12, %v9428_v38 }
 0x4c9   :  { %v5808_v57 = vmul.f32 0.1, %v4922_v9 }
 0x4ca   :  { %v5779_v63 = vmul.f32 0.1, %v5691_v50  ;;  %v5814_v50 = vld [vmem:[#allocation5 + $0x28] sm:$0xff] }
 0x4cb   :  { %v5872_v45 = vadd.f32 %v5840_v26, %v5808_v57  ;;  %v7934_v57 = vld [vmem:[#allocation3 + $0x148] sm:$0xf0] }
 0x4cc   :  { %v5843_v13 = vadd.f32 %v5811_v22, %v5779_v63  ;;  %v7435_v22 = vld [vmem:[#allocation3 + $0x140] sm:$0xf] }
 0x4cd   :  { %5904 = vst [vmem:[#allocation11 + $0xf8] sm:$0xff] %v5872_v45  ;;  %v5626_v19 = vpop.f32.mrf.mxu0  ;;  %v7436_v38 = vor.u32 %v7934_v57, %v7435_v22  ;;  %v7459_v22 = vld [vmem:[#allocation3 + $0x170] sm:$0xf]  ;;  %v7940_v57 = vld [vmem:[#allocation3 + $0x178] sm:$0xf0] }
 0x4ce   :  { %5875 = vst [vmem:[#allocation11 + $0x10] sm:$0xff] %v5843_v13  ;;  %v5627_v14 = vadd.f32 %v5626_v19, %v9342_v18  ;;  %v5813_v18 = vld [vmem:[#allocation5 + $0x20] sm:$0xff]  ;;  %v5486_v9 = vpop.f32.mrf.mxu2  ;;  %v5565_v58 = vpop.f32.mrf.mxu3 }
 0x4d0   :  { %v5692_v42 = vadd.f32 %v5627_v14, %v9612_v2  ;;  %v5815_v2 = vld [vmem:[#allocation5 + $0x30] sm:$0xff] }
 0x4d2   :  { %v5780_v16 = vmul.f32 0.1, %v5692_v42 }
 0x4d4   :  { %v5844_v1 = vadd.f32 %v5812_v6, %v5780_v16 }
 0x4d5   :  { %v5629_v24 = vpop.f32.mrf.mxu0 }
 0x4d6   :  { %5876 = vst [vmem:[#allocation11 + $0x18] sm:$0xff] %v5844_v1  ;;  %v5630_v31 = vadd.f32 %v5629_v24, %v5551_v23  ;;  %v5488_v12 = vpop.f32.mrf.mxu2  ;;  %v5567_v14 = vpop.f32.mrf.mxu3  ;;  %v7447_v24 = vld [vmem:[#allocation3 + $0x158] sm:$0xf] }
 0x4d8   :  { %v5693_v40 = vadd.f32 %v5630_v31, %v9321_v7  ;;  %5668 = vmatmul.bf16.gmra.mxu0 %v7424_v56  ;;  %v5556_v7 = vadd.f32 %v9437_v48, %v9434_v4  ;;  %v5816_v48 = vld [vmem:[#allocation5 + $0x38] sm:$0xff]  ;;  %v7937_v31 = vld [vmem:[#allocation3 + $0x160] sm:$0xf0] }
 0x4da   :  { %v5781_v44 = vmul.f32 0.1, %v5693_v40 }
 0x4dc   :  { %v5845_v17 = vadd.f32 %v5813_v18, %v5781_v44  ;;  %v7448_v44 = vor.u32 %v7937_v31, %v7447_v24 }
 0x4dd   :  { %v5631_v35 = vpop.f32.mrf.mxu0 }
 0x4de   :  { %5877 = vst [vmem:[#allocation11 + $0x20] sm:$0xff] %v5845_v17  ;;  %v5632_v27 = vadd.f32 %v5631_v35, %v5553_v49  ;;  %v5491_v15 = vpop.f32.mrf.mxu2  ;;  %v5570_v1 = vpop.f32.mrf.mxu3  ;;  %v5563_v17 = vadd.f32 %v5562_v34, %v5483_v21 }
 0x4e0   :  { %v5694_v20 = vadd.f32 %v5632_v27, %v9327_v36  ;;  %v5558_v36 = vadd.f32 %v9447_v60, %v9444_v3  ;;  %v5817_v60 = vld [vmem:[#allocation5 + $0x40] sm:$0xff] }
 0x4e2   :  { %v5782_v26 = vmul.f32 0.1, %v5694_v20 }
 0x4e4   :  { %v5846_v63 = vadd.f32 %v5814_v50, %v5782_v26 }
 0x4e5   :  { %v5634_v45 = vpop.f32.mrf.mxu0 }
 0x4e6   :  { %5878 = vst [vmem:[#allocation11 + $0x28] sm:$0xff] %v5846_v63  ;;  %v5635_v13 = vadd.f32 %v5634_v45, %v5556_v7  ;;  %v5493_v35 = vpop.f32.mrf.mxu2  ;;  %v5572_v27 = vpop.f32.mrf.mxu3  ;;  %v5566_v7 = vadd.f32 %v5565_v58, %v5486_v9 }
 0x4e8   :  { %v5695_v19 = vadd.f32 %v5635_v13, %v9333_v25  ;;  %5673 = vmatmul.bf16.gmra.mxu0 %v7436_v38  ;;  %v5561_v25 = vadd.f32 %v5560_v32, %v5481_v10  ;;  %v5818_v10 = vld [vmem:[#allocation5 + $0x48] sm:$0xff]  ;;  %v7460_v38 = vor.u32 %v7940_v57, %v7459_v22 }
 0x4ea   :  { %v5783_v42 = vmul.f32 0.1, %v5695_v19  ;;  %v5819_v19 = vld [vmem:[#allocation5 + $0x50] sm:$0xff] }
 0x4ec   :  { %v5847_v6 = vadd.f32 %v5815_v2, %v5783_v42  ;;  %v5568_v42 = vadd.f32 %v5567_v14, %v5488_v12 }
 0x4ed   :  { %v5636_v16 = vpop.f32.mrf.mxu0 }
 0x4ee   :  { %5879 = vst [vmem:[#allocation11 + $0x30] sm:$0xff] %v5847_v6  ;;  %v5637_v46 = vadd.f32 %v5636_v16, %v5558_v36  ;;  %v5575_v21 = vpop.f32.mrf.mxu3 }
 0x4f0   :  { %v5696_v4 = vadd.f32 %v5637_v46, %v9339_v33  ;;  %v5820_v46 = vld [vmem:[#allocation5 + $0x58] sm:$0xff] }
 0x4f2   :  { %v5784_v23 = vmul.f32 0.1, %v5696_v4 }
 0x4f4   :  { %v5848_v56 = vadd.f32 %v5816_v48, %v5784_v23  ;;  %v5571_v48 = vadd.f32 %v5570_v1, %v5491_v15 }
 0x4f5   :  { %v5639_v40 = vpop.f32.mrf.mxu0 }
 0x4f6   :  { %5880 = vst [vmem:[#allocation11 + $0x38] sm:$0xff] %v5848_v56  ;;  %v5640_v18 = vadd.f32 %v5639_v40, %v5561_v25  ;;  %v5577_v58 = vpop.f32.mrf.mxu3  ;;  %v5821_v25 = vld [vmem:[#allocation5 + $0x60] sm:$0xff]  ;;  %v5573_v40 = vadd.f32 %v5572_v27, %v5493_v35 }
 0x4f8   :  { %v5697_v3 = vadd.f32 %v5640_v18, %v9345_v53  ;;  %5678 = vmatmul.bf16.gmra.mxu0 %v7448_v44  ;;  %v5496_v53 = vpop.f32.mrf.mxu2 }
 0x4f9   :  { %v5576_v15 = vadd.f32 %v5575_v21, %v5496_v53 }
 0x4fa   :  { %v5785_v49 = vmul.f32 0.1, %v5697_v3 }
 0x4fc   :  { %v5849_v33 = vadd.f32 %v5817_v60, %v5785_v49  ;;  %v5822_v60 = vld [vmem:[#allocation5 + $0x68] sm:$0xff] }
 0x4fd   :  { %v5641_v20 = vpop.f32.mrf.mxu0 }
 0x4fe   :  { %5881 = vst [vmem:[#allocation11 + $0x40] sm:$0xff] %v5849_v33  ;;  %v5642_v50 = vadd.f32 %v5641_v20, %v5563_v17  ;;  %v5580_v14 = vpop.f32.mrf.mxu3 }
 0x500   :  { %v5698_v26 = vadd.f32 %v5642_v50, %v9349_v52  ;;  %v5498_v16 = vpop.f32.mrf.mxu2 }
 0x501   :  { %v5578_v35 = vadd.f32 %v5577_v58, %v5498_v16 }
 0x502   :  { %v5786_v32 = vmul.f32 0.1, %v5698_v26  ;;  %v5823_v26 = vld [vmem:[#allocation5 + $0x70] sm:$0xff] }
 0x504   :  { %v5850_v63 = vadd.f32 %v5818_v10, %v5786_v32 }
 0x505   :  { %v5644_v45 = vpop.f32.mrf.mxu0 }
 0x506   :  { %5882 = vst [vmem:[#allocation11 + $0x48] sm:$0xff] %v5850_v63  ;;  %v5645_v13 = vadd.f32 %v5644_v45, %v5566_v7  ;;  %v5582_v33 = vpop.f32.mrf.mxu3  ;;  %v5824_v63 = vld [vmem:[#allocation5 + $0x78] sm:$0xff] }
 0x508   :  { %v5699_v34 = vadd.f32 %v5645_v13, %v9353_v43  ;;  %5683 = vmatmul.bf16.gmra.mxu0 %v7460_v38  ;;  %v5501_v56 = vpop.f32.mrf.mxu2 }
 0x509   :  { %v5581_v53 = vadd.f32 %v5580_v14, %v5501_v56 }
 0x50a   :  { %v5787_v2 = vmul.f32 0.1, %v5699_v34 }
 0x50c   :  { %v5851_v36 = vadd.f32 %v5819_v19, %v5787_v2  ;;  %v5825_v2 = vld [vmem:[#allocation5 + $0x80] sm:$0xff] }
 0x50d   :  { %v5646_v52 = vpop.f32.mrf.mxu0 }
 0x50e   :  { %5883 = vst [vmem:[#allocation11 + $0x50] sm:$0xff] %v5851_v36  ;;  %v5647_v6 = vadd.f32 %v5646_v52, %v5568_v42 }
 0x510   :  { %v5700_v9 = vadd.f32 %v5647_v6, %v9357_v5  ;;  %v5503_v1 = vpop.f32.mrf.mxu2 }
 0x511   :  { %v5583_v36 = vadd.f32 %v5582_v33, %v5503_v1 }
 0x512   :  { %v5788_v4 = vmul.f32 0.1, %v5700_v9  ;;  %v5826_v9 = vld [vmem:[#allocation5 + $0x88] sm:$0xff] }
 0x514   :  { %v5852_v23 = vadd.f32 %v5820_v46, %v5788_v4 }
 0x515   :  { %v5649_v24 = vpop.f32.mrf.mxu0 }
 0x516   :  { %5884 = vst [vmem:[#allocation11 + $0x58] sm:$0xff] %v5852_v23  ;;  %v5650_v31 = vadd.f32 %v5649_v24, %v5571_v48 }
 0x518   :  { %v5701_v43 = vadd.f32 %v5650_v31, %v9361_v8  ;;  %v5506_v22 = vpop.f32.mrf.mxu2 }
 0x51a   :  { %v5789_v12 = vmul.f32 0.1, %v5701_v43  ;;  %v5827_v43 = vld [vmem:[#allocation5 + $0x90] sm:$0xff] }
 0x51c   :  { %v5853_v18 = vadd.f32 %v5821_v25, %v5789_v12 }
 0x51d   :  { %v5651_v44 = vpop.f32.mrf.mxu0 }
 0x51e   :  { %5885 = vst [vmem:[#allocation11 + $0x60] sm:$0xff] %v5853_v18  ;;  %v5652_v3 = vadd.f32 %v5651_v44, %v5573_v40 }
 0x520   :  { %v5702_v5 = vadd.f32 %v5652_v3, %v9365_v11  ;;  %v5585_v11 = vpop.f32.mrf.mxu3  ;;  %v5508_v34 = vpop.f32.mrf.mxu2  ;;  %v5828_v3 = vld [vmem:[#allocation5 + $0x98] sm:$0xff] }
 0x521   :  { %v5586_v48 = vadd.f32 %v5585_v11, %v5506_v22  ;;  %v5830_v22 = vld [vmem:[#allocation5 + $0xa8] sm:$0xff] }
 0x522   :  { %v5790_v49 = vmul.f32 0.1, %v5702_v5 }
 0x524   :  { %v5854_v17 = vadd.f32 %v5822_v60, %v5790_v49 }
 0x525   :  { %v5654_v20 = vpop.f32.mrf.mxu0 }
 0x526   :  { %5886 = vst [vmem:[#allocation11 + $0x68] sm:$0xff] %v5854_v17  ;;  %v5655_v8 = vadd.f32 %v5654_v20, %v5576_v15  ;;  %v5829_v20 = vld [vmem:[#allocation5 + $0xa0] sm:$0xff] }
 0x528   :  { %v5703_v50 = vadd.f32 %v5655_v8, %v9369_v59  ;;  %v5587_v19 = vpop.f32.mrf.mxu3  ;;  %v5511_v58 = vpop.f32.mrf.mxu2 }
 0x529   :  { %v5588_v56 = vadd.f32 %v5587_v19, %v5508_v34 }
 0x52a   :  { %v5791_v10 = vmul.f32 0.1, %v5703_v50 }
 0x52c   :  { %v5855_v27 = vadd.f32 %v5823_v26, %v5791_v10 }
 0x52d   :  { %v5656_v32 = vpop.f32.mrf.mxu0 }
 0x52e   :  { %5887 = vst [vmem:[#allocation11 + $0x70] sm:$0xff] %v5855_v27  ;;  %v5657_v57 = vadd.f32 %v5656_v32, %v5578_v35 }
 0x530   :  { %v5704_v7 = vadd.f32 %v5657_v57, %v9373_v62  ;;  %v5590_v4 = vpop.f32.mrf.mxu3  ;;  %v5513_v12 = vpop.f32.mrf.mxu2 }
 0x531   :  { %v5591_v60 = vadd.f32 %v5590_v4, %v5511_v58 }
 0x532   :  { %v5792_v45 = vmul.f32 0.1, %v5704_v7 }
 0x534   :  { %v5856_v13 = vadd.f32 %v5824_v63, %v5792_v45 }
 0x535   :  { %v5659_v38 = vpop.f32.mrf.mxu0 }
 0x536   :  { %5888 = vst [vmem:[#allocation11 + $0x78] sm:$0xff] %v5856_v13  ;;  %v5660_v21 = vadd.f32 %v5659_v38, %v5581_v53  ;;  %v5831_v53 = vld [vmem:[#allocation5 + $0xb0] sm:$0xff] }
 0x538   :  { %v5705_v59 = vadd.f32 %v5660_v21, %v9377_v29  ;;  %v5592_v40 = vpop.f32.mrf.mxu3  ;;  %v5516_v1 = vpop.f32.mrf.mxu2 }
 0x539   :  { %v5593_v50 = vadd.f32 %v5592_v40, %v5513_v12 }
 0x53a   :  { %v5793_v42 = vmul.f32 0.1, %v5705_v59 }
 0x53c   :  { %v5857_v52 = vadd.f32 %v5825_v2, %v5793_v42  ;;  %v5832_v42 = vld [vmem:[#allocation5 + $0xb8] sm:$0xff] }
 0x53d   :  { %v5661_v6 = vpop.f32.mrf.mxu0 }
 0x53e   :  { %5889 = vst [vmem:[#allocation11 + $0x80] sm:$0xff] %v5857_v52  ;;  %v5662_v16 = vadd.f32 %v5661_v6, %v5583_v36 }
 0x540   :  { %v5706_v62 = vadd.f32 %v5662_v16, %v9381_v39  ;;  %v5518_v27 = vpop.f32.mrf.mxu2 }
 0x542   :  { %v5794_v46 = vmul.f32 0.1, %v5706_v62 }
 0x544   :  { %v5858_v23 = vadd.f32 %v5826_v9, %v5794_v46  ;;  %v5833_v46 = vld [vmem:[#allocation5 + $0xc0] sm:$0xff] }
 0x545   :  { %v5664_v24 = vpop.f32.mrf.mxu0 }
 0x546   :  { %5890 = vst [vmem:[#allocation11 + $0x88] sm:$0xff] %v5858_v23  ;;  %v5665_v31 = vadd.f32 %v5664_v24, %v5586_v48 }
 0x548   :  { %v5707_v29 = vadd.f32 %v5665_v31, %v9385_v0  ;;  %v5595_v0 = vpop.f32.mrf.mxu3  ;;  %v5521_v13 = vpop.f32.mrf.mxu2 }
 0x549   :  { %v5596_v11 = vadd.f32 %v5595_v0, %v5516_v1 }
 0x54a   :  { %v5795_v25 = vmul.f32 0.1, %v5707_v29 }
 0x54c   :  { %v5859_v14 = vadd.f32 %v5827_v43, %v5795_v25  ;;  %v5834_v25 = vld [vmem:[#allocation5 + $0xc8] sm:$0xff] }
 0x54d   :  { %v5666_v18 = vpop.f32.mrf.mxu0 }
 0x54e   :  { %5891 = vst [vmem:[#allocation11 + $0x90] sm:$0xff] %v5859_v14  ;;  %v5667_v39 = vadd.f32 %v5666_v18, %v5588_v56 }
 0x550   :  { %v5708_v44 = vadd.f32 %v5667_v39, %v9389_v37  ;;  %v5597_v32 = vpop.f32.mrf.mxu3  ;;  %v5523_v6 = vpop.f32.mrf.mxu2 }
 0x551   :  { %v5598_v34 = vadd.f32 %v5597_v32, %v5518_v27 }
 0x552   :  { %v5796_v5 = vmul.f32 0.1, %v5708_v44 }
 0x554   :  { %v5860_v49 = vadd.f32 %v5828_v3, %v5796_v5  ;;  %v5835_v3 = vld [vmem:[#allocation5 + $0xd0] sm:$0xff] }
 0x555   :  { %v5669_v15 = vpop.f32.mrf.mxu0 }
 0x556   :  { %5892 = vst [vmem:[#allocation11 + $0x98] sm:$0xff] %v5860_v49  ;;  %v5670_v17 = vadd.f32 %v5669_v15, %v5591_v60 }
 0x558   :  { %v5709_v33 = vadd.f32 %v5670_v17, %v9393_v61  ;;  %v5600_v21 = vpop.f32.mrf.mxu3  ;;  %v5526_v29 = vpop.f32.mrf.mxu2  ;;  %v5836_v17 = vld [vmem:[#allocation5 + $0xd8] sm:$0xff] }
 0x559   :  { %v5601_v52 = vadd.f32 %v5600_v21, %v5521_v13 }
 0x55a   :  { %v5797_v8 = vmul.f32 0.1, %v5709_v33 }
 0x55c   :  { %v5861_v26 = vadd.f32 %v5829_v20, %v5797_v8 }
 0x55d   :  { %v5671_v10 = vpop.f32.mrf.mxu0 }
 0x55e   :  { %5893 = vst [vmem:[#allocation11 + $0xa0] sm:$0xff] %v5861_v26  ;;  %v5672_v35 = vadd.f32 %v5671_v10, %v5593_v50 }
 0x560   :  { %v5710_v37 = vadd.f32 %v5672_v35, %v9397_v55  ;;  %v5602_v62 = vpop.f32.mrf.mxu3  ;;  %v5528_v39 = vpop.f32.mrf.mxu2 }
 0x561   :  { %v5603_v48 = vadd.f32 %v5602_v62, %v5523_v6 }
 0x562   :  { %v5798_v57 = vmul.f32 0.1, %v5710_v37 }
 0x564   :  { %v5862_v7 = vadd.f32 %v5830_v22, %v5798_v57 }
 0x565   :  { %v5674_v63 = vpop.f32.mrf.mxu0 }
 0x566   :  { %5894 = vst [vmem:[#allocation11 + $0xa8] sm:$0xff] %v5862_v7  ;;  %v5675_v45 = vadd.f32 %v5674_v63, %v5596_v11 }
 0x568   :  { %v5711_v61 = vadd.f32 %v5675_v45, %v9401_v41 }
 0x56a   :  { %v5799_v38 = vmul.f32 0.1, %v5711_v61 }
 0x56c   :  { %v5863_v59 = vadd.f32 %v5831_v53, %v5799_v38 }
 0x56d   :  { %v5676_v19 = vpop.f32.mrf.mxu0 }
 0x56e   :  { %5895 = vst [vmem:[#allocation11 + $0xb0] sm:$0xff] %v5863_v59  ;;  %v5677_v2 = vadd.f32 %v5676_v19, %v5598_v34 }
 0x570   :  { %v5712_v55 = vadd.f32 %v5677_v2, %v9405_v28  ;;  %v5605_v28 = vpop.f32.mrf.mxu3 }
 0x571   :  { %v5606_v12 = vadd.f32 %v5605_v28, %v5526_v29 }
 0x572   :  { %v5800_v36 = vmul.f32 0.1, %v5712_v55 }
 0x574   :  { %v5864_v16 = vadd.f32 %v5832_v42, %v5800_v36 }
 0x575   :  { %v5679_v9 = vpop.f32.mrf.mxu0 }
 0x576   :  { %5896 = vst [vmem:[#allocation11 + $0xb8] sm:$0xff] %v5864_v16  ;;  %v5680_v41 = vadd.f32 %v5679_v9, %v5601_v52 }
 0x578   :  { %v5713_v58 = vadd.f32 %v5680_v41, %v9409_v54  ;;  %v5607_v44 = vpop.f32.mrf.mxu3 }
 0x579   :  { %v5608_v60 = vadd.f32 %v5607_v44, %v5528_v39 }
 0x57a   :  { %v5801_v4 = vmul.f32 0.1, %v5713_v58 }
 0x57c   :  { %v5865_v23 = vadd.f32 %v5833_v46, %v5801_v4 }
 0x57d   :  { %v5681_v24 = vpop.f32.mrf.mxu0 }
 0x57e   :  { %5897 = vst [vmem:[#allocation11 + $0xc0] sm:$0xff] %v5865_v23  ;;  %v5682_v31 = vadd.f32 %v5681_v24, %v5603_v48 }
 0x580   :  { %v5714_v43 = vadd.f32 %v5682_v31, %v9413_v51 }
 0x582   :  { %v5802_v56 = vmul.f32 0.1, %v5714_v43 }
 0x584   :  { %v5866_v14 = vadd.f32 %v5834_v25, %v5802_v56 }
 0x585   :  { %v5684_v40 = vpop.f32.mrf.mxu0 }
 0x586   :  { %5898 = vst [vmem:[#allocation11 + $0xc8] sm:$0xff] %v5866_v14  ;;  %v5685_v18 = vadd.f32 %v5684_v40, %v5606_v12 }
 0x588   :  { %v5715_v54 = vadd.f32 %v5685_v18, %v9417_v30 }
 0x58a   :  { %v5803_v5 = vmul.f32 0.1, %v5715_v54 }
 0x58c   :  { %v5867_v49 = vadd.f32 %v5835_v3, %v5803_v5 }
 0x58d   :  { %v5686_v15 = vpop.f32.mrf.mxu0 }
 0x58e   :  { %5899 = vst [vmem:[#allocation11 + $0xd0] sm:$0xff] %v5867_v49  ;;  %v5687_v1 = vadd.f32 %v5686_v15, %v5608_v60 }
 0x590   :  { %v5716_v51 = vadd.f32 %v5687_v1, %v9425_v47 }
 0x592   :  { %v5804_v0 = vmul.f32 0.1, %v5716_v51 }
 0x594   :  { %v5868_v30 = vadd.f32 %v5836_v17, %v5804_v0 }
 0x596   :  { %5900 = vst [vmem:[#allocation11 + $0xd8] sm:$0xff] %v5868_v30 }
 0x597   :  { %5917 = dma.vmem_to_hbm [thread:$0]  %s5910_s16, 4096, %s5912_s19, [#allocation7], %s8123_s30, %s8123_s30, %s8124_s6  }
 0x598   :  { %8117 = dma.done.wait [#allocation7], 4096  }
 0x599   :  { %8118 = vsyncadd [#allocation7], 4294963200 }
 0x59a   :  { %5922 = vsyncpa [#allocation6], 1 }
 0x59b   :  { %5923 = vsyncpa [#allocation9], 1 }
 0x59c   :  { %5924 = vsyncpa [#allocation7], 1 }

</bundles_post_ra>
